<compile_context>
chip_gen: v6e
topology: v6e:2x2x1
jax: 0.10.0
libtpu: 0.0.40
codegen_flags: <defaults>
</compile_context>

<pallas_src>
import math

import jax
import jax.numpy as jnp
from jax import lax
from jax.experimental import pallas as pl
from jax.experimental.pallas import tpu as pltpu

DIM = 2048        # trans_linear_in_dim (resnet50)
HIDDEN = 1024     # hidden projection dim


# ---------------------------------------------------------------------------
# Kernel 1: fused projection matmul  y = x @ w
#   x: (N, K) bf16, w: (K, M) bf16  ->  y: (N, M) f32
#   grid = (M-blocks ["parallel"], K-blocks ["arbitrary"]); accumulate into o_ref.
# ---------------------------------------------------------------------------
def _proj_kernel(x_ref, w_ref, o_ref):
    @pl.when(pl.program_id(1) == 0)
    def _zero():
        o_ref[...] = jnp.zeros_like(o_ref)

    o_ref[...] += jnp.dot(x_ref[...], w_ref[...],
                          preferred_element_type=jnp.float32)


def _pick_tk(k, max_tk=1024):
    """Largest K tile <= max_tk that divides K; falls back to K (single step)."""
    for cand in (max_tk, 512, 256, 128):
        if k >= cand and k % cand == 0:
            return cand
    return k


def proj(x, w):
    """x: (N, K), w: (K, M)  ->  (N, M) float32 = x @ w (K-tiled, M-parallel)."""
    N, K = x.shape
    Kw, M = w.shape
    assert K == Kw
    tk = _pick_tk(K)
    nk = K // tk
    # Split M across the two v7x TensorCores (harmless 2-step loop elsewhere).
    nm = 2 if (M % 256 == 0) else 1
    tm = M // nm
    return pl.pallas_call(
        _proj_kernel,
        out_shape=jax.ShapeDtypeStruct((N, M), jnp.float32),
        grid_spec=pltpu.PrefetchScalarGridSpec(
            num_scalar_prefetch=0,
            grid=(nm, nk),
            in_specs=[pl.BlockSpec((N, tk), lambda m, k: (0, k)),
                      pl.BlockSpec((tk, tm), lambda m, k: (k, m))],
            out_specs=pl.BlockSpec((N, tm), lambda m, k: (0, m))),
        compiler_params=pltpu.CompilerParams(
            dimension_semantics=("parallel", "arbitrary")),
    )(x, w)


# ---------------------------------------------------------------------------
# Kernel 2: cross-transformer attention + per-frame class similarities (fused)
# ---------------------------------------------------------------------------
def _make_attn_kernel(way, v_per_class, hidden, eps=1e-12):
    scale = float(hidden) ** (-0.5)
    eps2 = eps * eps          # F.normalize clamp, applied on the squared norm
    V = v_per_class

    def kernel(q_ref, sk_ref, sv_ref, qv_ref, o_ref):
        # q_ref  : (BT, H)     query key-projection
        # sk_ref : (W*V, H)    support keys, lane-dense, class-major rows
        # sv_ref : (W*V, H)    support values, same row ordering as sk_ref
        # qv_ref : (BT, H)     query value-projection
        # o_ref  : (BT, W)     per-frame class similarity
        q = q_ref[...]
        sk = sk_ref[...]
        sv = sv_ref[...]
        qv = qv_ref[...]

        qv_n = qv * lax.rsqrt(
            jnp.maximum(jnp.sum(qv * qv, axis=1, keepdims=True), eps2))

        # One batched score matmul over all classes: (BT, H) x (W*V, H)^T -> (BT, W*V)
        scores = lax.dot_general(
            q, sk, (((1,), (1,)), ((), ())),
            preferred_element_type=jnp.float32) * scale

        for n in range(way):  # static loop, way is tiny
            s = scores[:, n * V:(n + 1) * V]                   # (BT, V)
            s = s - jnp.max(s, axis=-1, keepdims=True)
            e = jnp.exp(s)
            attn = e / jnp.sum(e, axis=-1, keepdims=True)

            # query_aligned_prototype = attn @ support_value     (BT, H)
            proto = jnp.dot(attn, sv[n * V:(n + 1) * V, :],
                            preferred_element_type=jnp.float32)
            proto_n = proto * lax.rsqrt(
                jnp.maximum(jnp.sum(proto * proto, axis=1, keepdims=True), eps2))

            # cosine-style similarity per query frame, written straight into o_ref
            o_ref[:, n:n + 1] = jnp.sum(proto_n * qv_n, axis=1, keepdims=True)

    return kernel


def cross_attention_distances(query, skey, sval, qval, *, way):
    BT, H = query.shape
    WV = skey.shape[0]
    V = WV // way
    kernel = _make_attn_kernel(way, V, H)
    return pl.pallas_call(
        kernel,
        out_shape=jax.ShapeDtypeStruct((BT, way), jnp.float32),
        grid_spec=pltpu.PrefetchScalarGridSpec(
            num_scalar_prefetch=0,
            grid=(1,),
            in_specs=[pl.BlockSpec((BT, H), lambda i: (0, 0)),
                      pl.BlockSpec((WV, H), lambda i: (0, 0)),
                      pl.BlockSpec((WV, H), lambda i: (0, 0)),
                      pl.BlockSpec((BT, H), lambda i: (0, 0))],
            out_specs=pl.BlockSpec((BT, way), lambda i: (0, 0))),
        compiler_params=pltpu.CompilerParams(
            dimension_semantics=("arbitrary",)),
    )(query, skey, sval, qval)


# ---------------------------------------------------------------------------
# Model wrapper (JAX glue: parameters, reshapes, class reordering)
# ---------------------------------------------------------------------------
class CNNCrossTransformer:
    def __init__(self, key, way, shot, frames, in_channels):
        self.dim = DIM
        self.hidden_dim = HIDDEN
        self.way = way
        self.shot = shot
        self.frames = frames
        k1, k2, k3 = jax.random.split(key, 3)
        # TODO(synk): pretrained ResNet backbone not translated; replaced by
        # global-average-pool + linear projection (plain XLA dot: K=in_channels
        # is tiny, a Pallas launch would be pure overhead).
        self.w_backbone = jax.random.normal(
            k1, (in_channels, self.dim), jnp.float32) * 0.02
        # Conv1d(dim, hidden, 1, bias=False) weights, stored (dim, hidden) and
        # fused along the output axis as [key | value], kept in bf16 so the
        # bandwidth-bound projection streams half the bytes.  query head == key head.
        w_key = jax.random.normal(
            k2, (self.dim, self.hidden_dim), jnp.float32) * (1.0 / math.sqrt(self.dim))
        w_value = jax.random.normal(
            k3, (self.dim, self.hidden_dim), jnp.float32) * (1.0 / math.sqrt(self.dim))
        self.w_kv = jnp.concatenate([w_key, w_value], axis=1).astype(jnp.bfloat16)

    def get_feats(self, support_images, target_images):
        # images: NCHW
        def backbone(x):
            pooled = jnp.mean(x, axis=(2, 3))                 # (N, C) global avg pool
            return jnp.dot(pooled, self.w_backbone)           # (N, dim), plain XLA
        sup = backbone(support_images).reshape(-1, self.frames, self.dim)
        tgt = backbone(target_images).reshape(-1, self.frames, self.dim)
        return sup, tgt

    def forward(self, support_images, support_labels, target_images):
        support_features, query_image_features = self.get_feats(
            support_images, target_images)

        # Reorder support set by class label (== unique + index_select + cat).
        # Stable sort so within-class shot ordering matches PyTorch when shot > 1.
        order = jnp.argsort(support_labels, stable=True)
        support_features = jnp.take(support_features, order, axis=0)

        W, S, T = self.way, self.shot, self.frames
        D, H = self.dim, self.hidden_dim
        B = query_image_features.shape[0]
        BT = B * T

        q2d = query_image_features.reshape(BT, D)
        s2d = support_features.reshape(W * S * T, D)

        # Single fused projection: [queries ; support] @ [w_key | w_value]
        x_all = jnp.concatenate([q2d, s2d], axis=0).astype(jnp.bfloat16)
        y = proj(x_all, self.w_kv)                            # (BT + W*S*T, 2H) f32

        query = y[:BT, :H]        # query head shares key head
        qval = y[:BT, H:]
        skey = y[BT:, :H]         # (W*S*T, H) lane-dense; rows already class-major,
        sval = y[BT:, H:]         # keys and values share the same per-class ordering
                                  # so no wrapper transposes are needed.

        # per-frame class similarities; frame-sum and /frames done here (cheap XLA)
        frame_sims = cross_attention_distances(query, skey, sval, qval, way=W)
        logits = frame_sims.reshape(B, T, W).sum(axis=1) / float(self.frames)
        return {"logits": logits}


# ---------------------------------------------------------------------------
if __name__ == "__main__":
    way, shot, frames = 3, 1, 8
    B, C, HW = 2, 4, 16          # query videos, image channels, spatial size

    key = jax.random.PRNGKey(0)
    k0, k1, k2, k3 = jax.random.split(key, 4)

    model = CNNCrossTransformer(k0, way, shot, frames, C)

    support_images = jax.random.normal(
        k1, (way * shot * frames, C, HW, HW), jnp.float32)
    target_images = jax.random.normal(
        k2, (B * frames, C, HW, HW), jnp.float32)
    support_labels = jax.random.permutation(
        k3, jnp.repeat(jnp.arange(way), shot))

    out = model.forward(support_images, support_labels, target_images)
    logits = jax.block_until_ready(out["logits"])
    assert logits.shape == (B, way)
    assert logits.dtype == jnp.float32
    print("KERNEL_OK")
</pallas_src>

<mosaic_0001>
module attributes {stable_mosaic.version = 11 : i64} {
  func.func @_proj_kernel(%arg0: i32, %arg1: i32, %arg2: memref<40x1024xbf16, #tpu.memory_space<vmem>>, %arg3: memref<1024x1024xbf16, #tpu.memory_space<vmem>>, %arg4: memref<40x1024xf32, #tpu.memory_space<vmem>>) attributes {dimension_semantics = [#tpu.dimension_semantics<parallel>, #tpu.dimension_semantics<arbitrary>], iteration_bounds = array<i64: 2, 2>, scalar_prefetch = 0 : i64, scratch_operands = 0 : i64, tpu.core_type = #tpu.core_type<tc>, window_params = [{transform_indices = @transform_0, window_bounds = array<i64: 40, 1024>}, {transform_indices = @transform_1, window_bounds = array<i64: 1024, 1024>}, {transform_indices = @transform_2, window_bounds = array<i64: 40, 1024>}]} {
    %c0_i32 = arith.constant 0 : i32
    %0 = arith.cmpi eq, %arg1, %c0_i32 : i32
    %1 = arith.extui %0 : i1 to i32
    %c0_i32_0 = arith.constant 0 : i32
    %2 = arith.cmpi ne, %1, %c0_i32_0 : i32
    scf.if %2 {
      %cst_8 = arith.constant 0.000000e+00 : f32
      %9 = vector.broadcast %cst_8 : f32 to vector<40x1024xf32>
      %c0_9 = arith.constant 0 : index
      %c0_10 = arith.constant 0 : index
      %10 = vector.load %arg4[%c0_9, %c0_10] : memref<40x1024xf32, #tpu.memory_space<vmem>>, vector<40x1024xf32>
      tpu.vector_store %arg4[%c0_9, %c0_10], %9 {strides = array<i32>} : memref<40x1024xf32, #tpu.memory_space<vmem>>, vector<40x1024xf32>,
    } else {
    }
    %c0 = arith.constant 0 : index
    %c0_1 = arith.constant 0 : index
    %3 = vector.load %arg4[%c0, %c0_1] : memref<40x1024xf32, #tpu.memory_space<vmem>>, vector<40x1024xf32>
    %c0_2 = arith.constant 0 : index
    %c0_3 = arith.constant 0 : index
    %4 = vector.load %arg2[%c0_2, %c0_3] : memref<40x1024xbf16, #tpu.memory_space<vmem>>, vector<40x1024xbf16>
    %c0_4 = arith.constant 0 : index
    %c0_5 = arith.constant 0 : index
    %5 = vector.load %arg3[%c0_4, %c0_5] : memref<1024x1024xbf16, #tpu.memory_space<vmem>>, vector<1024x1024xbf16>
    %cst = arith.constant dense<0.000000e+00> : vector<40x1024xf32>
    %6 = tpu.matmul %4, %5, %cst {dimension_numbers = #tpu.dot_dimension_numbers<[1], [0], [0], [1], [0, 0, 1, 1], [], []>} : vector<40x1024xbf16>, vector<1024x1024xbf16>, vector<40x1024xf32> -> vector<40x1024xf32>
    %7 = arith.addf %3, %6 : vector<40x1024xf32>
    %c0_6 = arith.constant 0 : index
    %c0_7 = arith.constant 0 : index
    %8 = vector.load %arg4[%c0_6, %c0_7] : memref<40x1024xf32, #tpu.memory_space<vmem>>, vector<40x1024xf32>
    tpu.vector_store %arg4[%c0_6, %c0_7], %7 {strides = array<i32>} : memref<40x1024xf32, #tpu.memory_space<vmem>>, vector<40x1024xf32>,
    return
  }
  func.func @transform_0(%arg0: i32, %arg1: i32) -> (i32, i32) {
    %c0_i32 = arith.constant 0 : i32
    %c0_i32_0 = arith.constant 0 : i32
    return %c0_i32, %arg1 : i32, i32
  }
  func.func @transform_1(%arg0: i32, %arg1: i32) -> (i32, i32) {
    %c0_i32 = arith.constant 0 : i32
    return %arg1, %arg0 : i32, i32
  }
  func.func @transform_2(%arg0: i32, %arg1: i32) -> (i32, i32) {
    %c0_i32 = arith.constant 0 : i32
    %c0_i32_0 = arith.constant 0 : i32
    return %c0_i32, %arg0 : i32, i32
  }
}

</mosaic_0001>

<bundles_post_ra>
// kernel: tpu_custom_call.1
= control target key start
LH: loop header
LB: loop body
LE: loop exit
PB: predicated region body
PF: predicated region fallthrough
CT: control target
= control target key end

     0   :  { %s7029_s0 = inlined_call_operand.hbm [shape: bf16[40,2048], index: 0, kind: input, shape index: {}]   ;;  %s7030_s1 = inlined_call_operand.hbm [shape: bf16[2048,2048], index: 1, kind: input, shape index: {}]   ;;  %s7031_s2 = inlined_call_operand.hbm [shape: f32[40,2048], index: 2, kind: output, shape index: {}]  }
   0x1   :  { %7046 = sst [smem:[#allocation21_spill]] %s7029_s0 }
   0x2   :  { %7047 = sst [smem:[#allocation22_spill]] %s7031_s2 }
   0x3   :  { %7 = vsyncpa [#allocation3], 0 }
   0x4   :  { %9 = vsyncpa [#allocation3 + $0x1], 0 }
   0x5   :  { %10 = vsyncpa [#allocation6], 0 }
   0x6   :  { %12 = vsyncpa [#allocation6 + $0x1], 0 }
   0x7   :  { %13 = vsyncpa [#allocation4], 0 }
   0x8   :  { %15 = vsyncpa [#allocation4 + $0x1], 0  ;;  %s5624_s9 = smov 0   ;;  %s5626_s10 = smov 0  }
   0x9   :  { %s5628_s11 = smov 0   ;;  %s5630_s12 = smov 0  }
   0xa   :  { %s5632_s13 = smov 0   ;;  %s5634_s14 = smov 0  }
   0xb   :  { %s5636_s15 = smov 0   ;;  %s5638_s16 = smov 0  }
   0xc   :  { %s5640_s17 = smov 0   ;;  %s5642_s18 = smov 0  }
   0xd   :  { %s5644_s19 = smov 0   ;;  %s5646_s20 = smov 0  }
   0xe   :  { %s5648_s21 = smov 0   ;;  %s5650_s22 = smov 0  }
   0xf LB: > { %7048 = sst [smem:[#allocation11_spill]] %s5577_s17  ;;  %s4687_s23 = sadd.s32 4294967295, %s5597_s22   ;;  %s5597_s22 = sphi %s5650_s22, %s21_s22   ;;  %s5593_s21 = sphi %s5648_s21, %s7087_s21   ;;  %s5589_s20 = sphi %s5646_s20, %s7097_s20   ;;  %s5585_s19 = sphi %s5644_s19, %s7085_s19   ;;  %s5581_s18 = sphi %s5642_s18, %s7096_s18   ;;  %s5577_s17 = sphi %s5640_s17, %s7084_s17   ;;  %s5573_s16 = sphi %s5638_s16, %s7095_s16   ;;  %s5569_s15 = sphi %s5636_s15, %s7094_s15   ;;  %s5565_s14 = sphi %s5634_s14, %s7093_s14   ;;  %s5561_s13 = sphi %s5632_s13, %s7092_s13   ;;  %s5557_s12 = sphi %s5630_s12, %s7091_s12   ;;  %s5553_s11 = sphi %s5628_s11, %s7090_s11   ;;  %s5549_s10 = sphi %s5626_s10, %s7089_s10   ;;  %s5545_s9 = sphi %s5624_s9, %s7088_s9  }
  0x10   : > { %7049 = sst [smem:[#allocation12_spill]] %s5581_s18  ;;  %s30_s24 = sadd.s32 1, %s5589_s20 }
  0x11   : > { %7050 = sst [smem:[#allocation13_spill]] %s5585_s19  ;;  %p5694_p0 = scmp.ge.s32.totalorder %s30_s24, 2 }
  0x12   : > { %7051 = sst [smem:[#allocation14_spill]] %s5593_s21  ;;  %s40_s26 = sadd.s32 1, %s5577_s17 }
  0x13   : > { %p47_p1 = scmp.ne.s32.totalorder %s5577_s17, %s5573_s16  ;;  %p48_p2 = scmp.eq.s32.totalorder %s5597_s22, 0 }
  0x14   : > { %s7099_s24 = smov (%p5694_p0, %s30_s24), 0  ;;  %p53_p4 = scmp.ne.s32.totalorder %s5573_s16, %s5569_s15 }
  0x15   : > { %7053 = sst [smem:[#allocation15_spill]] %s7099_s24  ;;  %p49_p3 = por %p48_p2, %p47_p1 }
  0x16   : > { %s5711_s27 = ssub.s32 %s5589_s20, %s7099_s24  ;;  %p5713_p5 = scmp.eq.s32.totalorder %s4687_s23, 0 }
  0x17   : > { %p38_p6 = scmp.eq.s32.totalorder %s5711_s27, 0  ;;  %p5718_p7 = scmp.eq.s32.totalorder %s4687_s23, 3 }
  0x18   : > { %p5724_p8 = por %p5713_p5, %p53_p4  ;;  %p7035_p9 = scmp.lt.s32.totalorder %s5597_s22, 4 }
  0x19   : > { %s5729_s3 = scalar_select %p38_p6, %s5577_s17, %s40_s26  }
  0x1a   : > { %s131_s4 = sand.u32 1, %s5577_s17   ;;  %s5241_s6 = sshll.u32 %s5589_s20, 9 }
  0x1b   : > { %7057 = sst [smem:[#allocation16_spill]] %s5729_s3  ;;  %s5244_s5 = smul.u32 160, %s131_s4 }
  0x1c   : > { %p5736_p10 = pnand %p7035_p9, %p49_p3  ;;  %s7059_s0 = sld [smem:[#allocation21_spill]] }
  0x1d   : > { %s135_s24 = scalar_lea.vmem [#allocation2], %s5244_s5  ;;  %s132_s19 = scalar_lea.sflag [#allocation3], %s131_s4 }
  0x1e   : > { %s142_s2 = sshll.u32 %s135_s24, 4  ;;  %p5395_p11 = pneg %p5736_p10  ;;  %s143_s2 = int_to_ptr.vmem [resolvable:$true] %s142_s2 }
  0x1f   : > { %s5406_s26 = scalar_lea.vmem %s143_s2, 2560  ;;  %s5599_s3 = smov [#allocation2]  }
  0x20   : > { %p5407_p12 = scmp.ne.s32.totalorder %s143_s2, %s5406_s26  ;;  %s5411_s17 = sshll.u32 %s5599_s3, 4  ;;  %s5412_s17 = int_to_ptr.vmem [resolvable:$false] %s5411_s17 }
  0x21   : > { %s5413_s18 = scalar_lea.vmem %s5412_s17, 5120  ;;  %p5414_p3 = scmp.lt.s32.totalorder %s143_s2, %s5412_s17 }
  0x22   : > { %s141_s23 = scalar_lea.hbm %s7059_s0, %s5241_s6  ;;  %p5409_p13 = pnand %p5407_p12, %p5395_p11 }
  0x23   : > { %p5415_p4 = scmp.lt.s32.totalorder %s5413_s18, %s5406_s26 }
  0x24   : > { %p5410_p1 = pneg %p5409_p13 }
  0x25   : > { %p5416_p6 = por %p5415_p4, %p5414_p3 }
  0x27   : > { %p5417_p9 = pnand %p5416_p6, %p5410_p1 }
  0x29   : > { %5420 = shalt.err (!%p5417_p9)
}
  0x2a   : > { %s7036_s6 = smov 1024   ;;  %s7037_s17 = smov 512  }
  0x2b   : > { %s7038_s18 = smov 32   ;;  %p4698_p9 = scmp.ge.s32.totalorder %s5597_s22, 1 }
  0x2c   : > { %5256 = dma.hbm_to_vmem [thread:$0]  (!%p5736_p10), %s141_s23, 2560, %s143_s2, %s132_s19, %s7036_s6, %s7037_s17, %s7038_s18  }
  0x2d   : > { %p174_p11 = scmp.lt.s32.totalorder %s5597_s22, 5  ;;  %s4688_s3 = sadd.s32 4294967294, %s5597_s22  }
  0x2e   : > { %s33_s4 = sadd.s32 1, %s5593_s21  ;;  %s68_s5 = sadd.s32 1, %s5565_s14 }
  0x2f   : > { %p5752_p12 = pnand %p4698_p9, %p174_p11  ;;  %s7101_s4 = smov (!%p5694_p0, %s33_s4), %s5593_s21 }
  0x30   : > { %p75_p13 = scmp.ne.s32.totalorder %s5565_s14, %s5561_s13  ;;  %p81_p10 = scmp.ne.s32.totalorder %s5561_s13, %s5557_s12 }
  0x31   : > { %p35_p1 = scmp.ge.s32.totalorder %s7101_s4, 2  ;;  %s94_s2 = sadd.s32 1, %s5553_s11 }
  0x32   : > { %p5769_p3 = por %p75_p13, %p48_p2  ;;  %p5775_p4 = por %p81_p10, %p5713_p5 }
  0x33   : > { %s7103_s4 = smov (%p35_p1, %s7101_s4), 0  ;;  %p104_p0 = scmp.ne.s32.totalorder %s5553_s11, %s5549_s10 }
  0x34   : > { %7063 = sst [smem:[#allocation17_spill]] %s7103_s4  ;;  %p110_p6 = scmp.ne.s32.totalorder %s5549_s10, %s5545_s9 }
  0x35   : > { %s64_s12 = ssub.s32 %s5593_s21, %s7103_s4  ;;  %p111_p9 = scmp.eq.s32.totalorder %s4688_s3, 3 }
  0x36   : > { %s65_s25 = sor.u32 %s64_s12, %s5711_s27  ;;  %p92_p2 = scmp.eq.s32.totalorder %s64_s12, 0 }
  0x37   : > { %p66_p11 = scmp.eq.s32.totalorder %s65_s25, 0  ;;  %p5790_p13 = por %p5718_p7, %p104_p0 }
  0x38   : > { %s5795_s8 = scalar_select %p92_p2, %s5553_s11, %s94_s2  }
  0x39   : > { %s5798_s15 = scalar_select %p66_p11, %s5565_s14, %s68_s5  }
  0x3a   : > { %p5800_p5 = por %p111_p9, %p110_p6  ;;  %s152_s26 = sand.u32 1, %s5565_s14  }
  0x3b   : > { %s4693_s3 = sshll.u32 %s152_s26, 12  ;;  %s4695_s27 = sshll.u32 %s5593_s21, 3 }
  0x3c   : > { %s5242_s6 = sshll.u32 %s5589_s20, 11  ;;  %s156_s17 = scalar_lea.vmem [#allocation5], %s4693_s3 }
  0x3d   : > { %s166_s12 = sshll.u32 %s156_s17, 4  ;;  %s163_s25 = sadd.s32 %s5242_s6, %s4695_s27  ;;  %s167_s12 = int_to_ptr.vmem [resolvable:$true] %s166_s12 }
  0x3e   : > { %s4697_s29 = sshll.u32 %s163_s25, 6  ;;  %p7066_p7 = scmp.lt.s32.totalorder %s5597_s22, 4 }
  0x3f   : > { %s165_s0 = scalar_lea.hbm %s7030_s1, %s4697_s29  ;;  %s153_s4 = scalar_lea.sflag [#allocation6], %s152_s26 }
  0x40   : > { %p5811_p10 = pnand %p7066_p7, %p5769_p3  ;;  %s5434_s21 = scalar_lea.vmem %s167_s12, 65536 }
  0x41   : > { %p5435_p0 = scmp.ne.s32.totalorder %s167_s12, %s5434_s21  ;;  %s5603_s6 = smov [#allocation5]  }
  0x42   : > { %p5423_p1 = pneg %p5811_p10  ;;  %s5439_s17 = sshll.u32 %s5603_s6, 4  ;;  %s5440_s17 = int_to_ptr.vmem [resolvable:$false] %s5439_s17 }
  0x43   : > { %s5441_s19 = scalar_lea.vmem %s5440_s17, 131072  ;;  %p5442_p3 = scmp.lt.s32.totalorder %s167_s12, %s5440_s17 }
  0x44   : > { %p5437_p6 = pnand %p5435_p0, %p5423_p1  ;;  %p5443_p2 = scmp.lt.s32.totalorder %s5441_s19, %s5434_s21 }
  0x46   : > { %p5438_p9 = pneg %p5437_p6  ;;  %p5444_p11 = por %p5443_p2, %p5442_p3 }
  0x48   : > { %p5445_p7 = pnand %p5444_p11, %p5438_p9 }
  0x4a   : > { %5448 = shalt.err (!%p5445_p7)
}
  0x4b   : > { %s7068_s18 = smov 32   ;;  %s7069_s3 = smov 512  }
  0x4c   : > { %s7070_s26 = smov 1024   ;;  %178 = sbr.rel (%p5752_p12) target bundleno = 878 (0x36e), region = 28 }
  0x4d   : > { %5259 = dma.hbm_to_vmem [thread:$0]  (!%p5811_p10), %s165_s0, 65536, %s167_s12, %s153_s4, %s7070_s26, %s7069_s3, %s7068_s18  }
  0x51   : > { %s180_s27 = sand.u32 1, %s5573_s16  }
  0x52   : > { %s5245_s25 = smul.u32 160, %s180_s27  ;;  %s181_s29 = scalar_lea.sflag [#allocation3], %s180_s27 }
  0x54   : > { %s5828_s5 = scalar_lea.vmem [#allocation2], %s5245_s25 }
  0x55   : > { %5532 = dma.done.wait (%p5724_p8), %s181_s29, 2560  }
  0x56   : > { %5534 = vsyncadd (%p5724_p8), %s181_s29, 4294964736  ;;  %s189_s21 = sand.u32 1, %s5561_s13  }
  0x57   : > { %s4699_s2 = sshll.u32 %s189_s21, 12  ;;  %s190_s0 = scalar_lea.sflag [#allocation6], %s189_s21 }
  0x58   : > { %s5835_s4 = scalar_lea.vmem [#allocation5], %s4699_s2 }
  0x59   : > { %5536 = dma.done.wait (%p5775_p4), %s190_s0, 65536  }
  0x5a   : > { %5538 = vsyncadd (%p5775_p4), %s190_s0, 4294901760  ;;  %s216_s24 = sand.u32 1, %s5549_s10   ;;  %s7071_s30 = sld [smem:[#allocation12_spill]] }
  0x5b   : > { %s5246_s12 = smul.u32 320, %s216_s24 }
  0x5d   : > { %s5844_s6 = scalar_lea.vmem [#allocation7], %s5246_s12 }
  0x60   : > { %p4700_p8 = scmp.ne.s32.totalorder %s7071_s30, 0 }
  0x62   : > { %226 = sbr.rel (%p4700_p8) target bundleno = 124 (0x7c), region = 40 }
  0x67   : > { %v5604_v0 = vmov 0.0  }
  0x68   : > { %227 = vst [vmem:[%s5844_s6] sm:$0xff] %v5604_v0  ;;  %228 = vst [vmem:[%s5844_s6 + $0x8] sm:$0xff] %v5604_v0 }
  0x69   : > { %229 = vst [vmem:[%s5844_s6 + $0x10] sm:$0xff] %v5604_v0  ;;  %230 = vst [vmem:[%s5844_s6 + $0x18] sm:$0xff] %v5604_v0 }
  0x6a   : > { %231 = vst [vmem:[%s5844_s6 + $0x20] sm:$0xff] %v5604_v0  ;;  %232 = vst [vmem:[%s5844_s6 + $0x28] sm:$0xff] %v5604_v0 }
  0x6b   : > { %233 = vst [vmem:[%s5844_s6 + $0x30] sm:$0xff] %v5604_v0  ;;  %234 = vst [vmem:[%s5844_s6 + $0x38] sm:$0xff] %v5604_v0 }
  0x6c   : > { %235 = vst [vmem:[%s5844_s6 + $0x40] sm:$0xff] %v5604_v0  ;;  %236 = vst [vmem:[%s5844_s6 + $0x48] sm:$0xff] %v5604_v0 }
  0x6d   : > { %237 = vst [vmem:[%s5844_s6 + $0x50] sm:$0xff] %v5604_v0  ;;  %238 = vst [vmem:[%s5844_s6 + $0x58] sm:$0xff] %v5604_v0 }
  0x6e   : > { %239 = vst [vmem:[%s5844_s6 + $0x60] sm:$0xff] %v5604_v0  ;;  %240 = vst [vmem:[%s5844_s6 + $0x68] sm:$0xff] %v5604_v0 }
  0x6f   : > { %241 = vst [vmem:[%s5844_s6 + $0x70] sm:$0xff] %v5604_v0  ;;  %242 = vst [vmem:[%s5844_s6 + $0x78] sm:$0xff] %v5604_v0 }
  0x70   : > { %243 = vst [vmem:[%s5844_s6 + $0x80] sm:$0xff] %v5604_v0  ;;  %244 = vst [vmem:[%s5844_s6 + $0x88] sm:$0xff] %v5604_v0 }
  0x71   : > { %245 = vst [vmem:[%s5844_s6 + $0x90] sm:$0xff] %v5604_v0  ;;  %246 = vst [vmem:[%s5844_s6 + $0x98] sm:$0xff] %v5604_v0 }
  0x72   : > { %247 = vst [vmem:[%s5844_s6 + $0xa0] sm:$0xff] %v5604_v0  ;;  %248 = vst [vmem:[%s5844_s6 + $0xa8] sm:$0xff] %v5604_v0 }
  0x73   : > { %249 = vst [vmem:[%s5844_s6 + $0xb0] sm:$0xff] %v5604_v0  ;;  %250 = vst [vmem:[%s5844_s6 + $0xb8] sm:$0xff] %v5604_v0 }
  0x74   : > { %251 = vst [vmem:[%s5844_s6 + $0xc0] sm:$0xff] %v5604_v0  ;;  %252 = vst [vmem:[%s5844_s6 + $0xc8] sm:$0xff] %v5604_v0 }
  0x75   : > { %253 = vst [vmem:[%s5844_s6 + $0xd0] sm:$0xff] %v5604_v0  ;;  %254 = vst [vmem:[%s5844_s6 + $0xd8] sm:$0xff] %v5604_v0 }
  0x76   : > { %255 = vst [vmem:[%s5844_s6 + $0xe0] sm:$0xff] %v5604_v0  ;;  %256 = vst [vmem:[%s5844_s6 + $0xe8] sm:$0xff] %v5604_v0 }
  0x77   : > { %257 = vst [vmem:[%s5844_s6 + $0xf0] sm:$0xff] %v5604_v0  ;;  %258 = vst [vmem:[%s5844_s6 + $0xf8] sm:$0xff] %v5604_v0 }
  0x78   : > { %259 = vst [vmem:[%s5844_s6 + $0x100] sm:$0xff] %v5604_v0  ;;  %260 = vst [vmem:[%s5844_s6 + $0x108] sm:$0xff] %v5604_v0 }
  0x79   : > { %261 = vst [vmem:[%s5844_s6 + $0x110] sm:$0xff] %v5604_v0  ;;  %262 = vst [vmem:[%s5844_s6 + $0x118] sm:$0xff] %v5604_v0 }
  0x7a   : > { %263 = vst [vmem:[%s5844_s6 + $0x120] sm:$0xff] %v5604_v0  ;;  %264 = vst [vmem:[%s5844_s6 + $0x128] sm:$0xff] %v5604_v0 }
  0x7b   : > { %265 = vst [vmem:[%s5844_s6 + $0x130] sm:$0xff] %v5604_v0  ;;  %266 = vst [vmem:[%s5844_s6 + $0x138] sm:$0xff] %v5604_v0 }
  0x7c PF: > { %v383_v1 = vld [vmem:[%s5835_s4 + $0x1c0] sm:$0xff]  ;;  %v5928_v60 = vld [vmem:[%s5828_s5 + $0x8] sm:$0xff]  ;;  %s7080_s7 = sld [smem:[#allocation13_spill]]  ;;  %s4577_s19 = sshll.u32 %s5844_s6, 4  ;;  %s6948_s19 = int_to_ptr.vmem [resolvable:$true] %s4577_s19 }
  0x7d   : > { %v387_v2 = vld [vmem:[%s5835_s4 + $0x1e0] sm:$0xff]  ;;  %v5931_v61 = vld [vmem:[%s5828_s5 + $0x28] sm:$0xff]  ;;  %s7081_s26 = sld [smem:[#allocation22_spill]]  ;;  %s6954_s25 = scalar_lea.sflag [#allocation4], %s216_s24 }
  0x7e   : > { %v511_v3 = vld [vmem:[%s5835_s4 + $0x5c0] sm:$0xff]  ;;  %v4782_v4 = vcombine.high %v383_v1, %v387_v2  ;;  %v4781_v6 = vcombine.low %v383_v1, %v387_v2  ;;  %v5937_v0 = vcombine.high %v5928_v60, %v5931_v61  ;;  %s5449_s29 = scalar_lea.vmem %s6948_s19, 5120 }
  0x7f   : > { %v515_v5 = vld [vmem:[%s5835_s4 + $0x5e0] sm:$0xff]  ;;  %p5450_p12 = scmp.ne.s32.totalorder %s6948_s19, %s5449_s29 }
  0x80   : > { %v375_v7 = vld [vmem:[%s5835_s4 + $0x180] sm:$0xff]  ;;  %v4910_v9 = vcombine.high %v511_v3, %v515_v5  ;;  %v4909_v10 = vcombine.low %v511_v3, %v515_v5  ;;  %3507 = vmatprep.subr.bf16.mxu0 %v4782_v4  ;;  %3600 = vmatprep.mubr.bf16.mxu1 %v5937_v0 }
  0x81   : > { %v379_v8 = vld [vmem:[%s5835_s4 + $0x1a0] sm:$0xff]  ;;  %3508 = vmatpush1.bf16.msra.mxu0 %v4781_v6  ;;  %p5451_p4 = pnand %p5450_p12, %p5790_p13 }
  0x82   : > { %v4774_v11 = vcombine.high %v375_v7, %v379_v8  ;;  %v503_v12 = vld [vmem:[%s5835_s4 + $0x580] sm:$0xff]  ;;  %3568 = vmatprep.subr.bf16.mxu1 %v4910_v9  ;;  %v4773_v19 = vcombine.low %v375_v7, %v379_v8  ;;  %s5243_s17 = sshll.u32 %s7080_s7, 10 }
  0x83   : > { %v507_v13 = vld [vmem:[%s5835_s4 + $0x5a0] sm:$0xff]  ;;  %3569 = vmatpush1.bf16.msra.mxu1 %v4909_v10  ;;  %s6946_s27 = scalar_lea.hbm %s7081_s26, %s5243_s17  ;;  %p5452_p10 = pneg %p5451_p4 }
  0x84   : > { %v367_v14 = vld [vmem:[%s5835_s4 + $0x140] sm:$0xff]  ;;  %v4902_v15 = vcombine.high %v503_v12, %v507_v13  ;;  %3509 = vmatprep.subr.bf16.mxu0 %v4774_v11  ;;  %v4901_v20 = vcombine.low %v503_v12, %v507_v13 }
  0x85   : > { %v371_v16 = vld [vmem:[%s5835_s4 + $0x160] sm:$0xff]  ;;  %3510 = vmatpush1.bf16.msra.mxu0 %v4773_v19 }
  0x86   : > { %v495_v17 = vld [vmem:[%s5835_s4 + $0x540] sm:$0xff]  ;;  %v4766_v21 = vcombine.high %v367_v14, %v371_v16  ;;  %3570 = vmatprep.subr.bf16.mxu1 %v4902_v15  ;;  %v4765_v27 = vcombine.low %v367_v14, %v371_v16 }
  0x87   : > { %v499_v18 = vld [vmem:[%s5835_s4 + $0x560] sm:$0xff]  ;;  %3571 = vmatpush1.bf16.msra.mxu1 %v4901_v20 }
  0x88   : > { %v4894_v22 = vcombine.high %v495_v17, %v499_v18  ;;  %v359_v23 = vld [vmem:[%s5835_s4 + $0x100] sm:$0xff]  ;;  %3511 = vmatprep.subr.bf16.mxu0 %v4766_v21  ;;  %v4893_v28 = vcombine.low %v495_v17, %v499_v18 }
  0x89   : > { %v363_v24 = vld [vmem:[%s5835_s4 + $0x120] sm:$0xff]  ;;  %3512 = vmatpush1.bf16.msra.mxu0 %v4765_v27 }
  0x8a   : > { %v487_v25 = vld [vmem:[%s5835_s4 + $0x500] sm:$0xff]  ;;  %v4758_v29 = vcombine.high %v359_v23, %v363_v24  ;;  %3572 = vmatprep.subr.bf16.mxu1 %v4894_v22  ;;  %v4757_v35 = vcombine.low %v359_v23, %v363_v24 }
  0x8b   : > { %v491_v26 = vld [vmem:[%s5835_s4 + $0x520] sm:$0xff]  ;;  %3573 = vmatpush1.bf16.msra.mxu1 %v4893_v28 }
  0x8c   : > { %v4886_v30 = vcombine.high %v487_v25, %v491_v26  ;;  %v351_v31 = vld [vmem:[%s5835_s4 + $0xc0] sm:$0xff]  ;;  %3513 = vmatprep.subr.bf16.mxu0 %v4758_v29  ;;  %v4885_v36 = vcombine.low %v487_v25, %v491_v26 }
  0x8d   : > { %v355_v32 = vld [vmem:[%s5835_s4 + $0xe0] sm:$0xff]  ;;  %3514 = vmatpush1.bf16.msra.mxu0 %v4757_v35 }
  0x8e   : > { %v479_v33 = vld [vmem:[%s5835_s4 + $0x4c0] sm:$0xff]  ;;  %v4750_v37 = vcombine.high %v351_v31, %v355_v32  ;;  %3574 = vmatprep.subr.bf16.mxu1 %v4886_v30  ;;  %v4749_v43 = vcombine.low %v351_v31, %v355_v32 }
  0x8f   : > { %v483_v34 = vld [vmem:[%s5835_s4 + $0x4e0] sm:$0xff]  ;;  %3575 = vmatpush1.bf16.msra.mxu1 %v4885_v36 }
  0x90   : > { %v4878_v38 = vcombine.high %v479_v33, %v483_v34  ;;  %v343_v39 = vld [vmem:[%s5835_s4 + $0x80] sm:$0xff]  ;;  %3515 = vmatprep.subr.bf16.mxu0 %v4750_v37  ;;  %v4877_v44 = vcombine.low %v479_v33, %v483_v34 }
  0x91   : > { %v347_v40 = vld [vmem:[%s5835_s4 + $0xa0] sm:$0xff]  ;;  %3516 = vmatpush1.bf16.msra.mxu0 %v4749_v43 }
  0x92   : > { %v471_v41 = vld [vmem:[%s5835_s4 + $0x480] sm:$0xff]  ;;  %v4742_v45 = vcombine.high %v343_v39, %v347_v40  ;;  %3576 = vmatprep.subr.bf16.mxu1 %v4878_v38  ;;  %v4741_v51 = vcombine.low %v343_v39, %v347_v40 }
  0x93   : > { %v475_v42 = vld [vmem:[%s5835_s4 + $0x4a0] sm:$0xff]  ;;  %3577 = vmatpush1.bf16.msra.mxu1 %v4877_v44 }
  0x94   : > { %v4870_v46 = vcombine.high %v471_v41, %v475_v42  ;;  %v335_v47 = vld [vmem:[%s5835_s4 + $0x40] sm:$0xff]  ;;  %3517 = vmatprep.subr.bf16.mxu0 %v4742_v45  ;;  %v4869_v52 = vcombine.low %v471_v41, %v475_v42 }
  0x95   : > { %v339_v48 = vld [vmem:[%s5835_s4 + $0x60] sm:$0xff]  ;;  %3518 = vmatpush1.bf16.msra.mxu0 %v4741_v51 }
  0x96   : > { %v463_v49 = vld [vmem:[%s5835_s4 + $0x440] sm:$0xff]  ;;  %v4734_v53 = vcombine.high %v335_v47, %v339_v48  ;;  %3578 = vmatprep.subr.bf16.mxu1 %v4870_v46  ;;  %v4733_v1 = vcombine.low %v335_v47, %v339_v48 }
  0x97   : > { %v467_v50 = vld [vmem:[%s5835_s4 + $0x460] sm:$0xff]  ;;  %3579 = vmatpush1.bf16.msra.mxu1 %v4869_v52 }
  0x98   : > { %v327_v54 = vld [vmem:[%s5835_s4] sm:$0xff]  ;;  %v4862_v57 = vcombine.high %v463_v49, %v467_v50  ;;  %3519 = vmatprep.subr.bf16.mxu0 %v4734_v53  ;;  %v4861_v2 = vcombine.low %v463_v49, %v467_v50 }
  0x99   : > { %v5917_v55 = vld [vmem:[%s5828_s5] sm:$0xff]  ;;  %3520 = vmatpush1.bf16.msra.mxu0 %v4733_v1 }
  0x9a   : > { %v5920_v56 = vld [vmem:[%s5828_s5 + $0x20] sm:$0xff]  ;;  %3580 = vmatprep.subr.bf16.mxu1 %v4862_v57 }
  0x9b   : > { %v331_v58 = vld [vmem:[%s5835_s4 + $0x20] sm:$0xff]  ;;  %v5925_v59 = vcombine.high %v5917_v55, %v5920_v56  ;;  %3581 = vmatpush1.bf16.msra.mxu1 %v4861_v2 }
  0x9c   : > { %v455_v62 = vld [vmem:[%s5835_s4 + $0x400] sm:$0xff]  ;;  %v4726_v3 = vcombine.high %v327_v54, %v331_v58  ;;  %v4725_v9 = vcombine.low %v327_v54, %v331_v58 }
  0x9d   : > { %7072 = vst [vmem:[#allocation18_spill] sm:$0xff] %v5925_v59  ;;  %v459_v63 = vld [vmem:[%s5835_s4 + $0x420] sm:$0xff]  ;;  %3539 = vmatprep.mubr.bf16.mxu0 %v5925_v59 }
  0x9e   : > { %v4854_v4 = vcombine.high %v455_v62, %v459_v63  ;;  %v447_v5 = vld [vmem:[%s5835_s4 + $0x3c0] sm:$0xff]  ;;  %3521 = vmatprep.subr.bf16.mxu0 %v4726_v3  ;;  %v4853_v10 = vcombine.low %v455_v62, %v459_v63 }
  0x9f   : > { %v451_v6 = vld [vmem:[%s5835_s4 + $0x3e0] sm:$0xff]  ;;  %3522 = vmatpush1.bf16.msra.mxu0 %v4725_v9 }
  0xa0   : > { %v575_v7 = vld [vmem:[%s5835_s4 + $0x7c0] sm:$0xff]  ;;  %v4846_v11 = vcombine.high %v447_v5, %v451_v6  ;;  %3582 = vmatprep.subr.bf16.mxu1 %v4854_v4  ;;  %v4845_v17 = vcombine.low %v447_v5, %v451_v6 }
  0xa1   : > { %v579_v8 = vld [vmem:[%s5835_s4 + $0x7e0] sm:$0xff]  ;;  %3583 = vmatpush1.bf16.msra.mxu1 %v4853_v10 }
  0xa2   : > { %v4974_v12 = vcombine.high %v575_v7, %v579_v8  ;;  %v439_v13 = vld [vmem:[%s5835_s4 + $0x380] sm:$0xff]  ;;  %3523 = vmatprep.subr.bf16.mxu0 %v4846_v11  ;;  %v4973_v18 = vcombine.low %v575_v7, %v579_v8 }
  0xa3   : > { %v443_v14 = vld [vmem:[%s5835_s4 + $0x3a0] sm:$0xff]  ;;  %3524 = vmatpush2.bf16.msra.mxu0 %v4845_v17 }
  0xa4   : > { %v567_v15 = vld [vmem:[%s5835_s4 + $0x780] sm:$0xff]  ;;  %v4838_v19 = vcombine.high %v439_v13, %v443_v14  ;;  %3584 = vmatprep.subr.bf16.mxu1 %v4974_v12  ;;  %v4837_v25 = vcombine.low %v439_v13, %v443_v14 }
  0xa5   : > { %v571_v16 = vld [vmem:[%s5835_s4 + $0x7a0] sm:$0xff]  ;;  %3585 = vmatpush2.bf16.msra.mxu1 %v4973_v18 }
  0xa6   : > { %v4966_v20 = vcombine.high %v567_v15, %v571_v16  ;;  %v431_v21 = vld [vmem:[%s5835_s4 + $0x340] sm:$0xff]  ;;  %3525 = vmatprep.subr.bf16.mxu0 %v4838_v19  ;;  %v4965_v26 = vcombine.low %v567_v15, %v571_v16 }
  0xa7   : > { %v435_v22 = vld [vmem:[%s5835_s4 + $0x360] sm:$0xff]  ;;  %3526 = vmatpush2.bf16.msra.mxu0 %v4837_v25 }
  0xa8   : > { %v559_v23 = vld [vmem:[%s5835_s4 + $0x740] sm:$0xff]  ;;  %v4830_v27 = vcombine.high %v431_v21, %v435_v22  ;;  %3586 = vmatprep.subr.bf16.mxu1 %v4966_v20  ;;  %v4829_v33 = vcombine.low %v431_v21, %v435_v22  ;;  %v5982_v22 = vcombine.low %v5917_v55, %v5920_v56 }
  0xa9   : > { %v563_v24 = vld [vmem:[%s5835_s4 + $0x760] sm:$0xff]  ;;  %3587 = vmatpush2.bf16.msra.mxu1 %v4965_v26  ;;  %v5989_v26 = vcombine.low %v5928_v60, %v5931_v61 }
  0xaa   : > { %v4958_v28 = vcombine.high %v559_v23, %v563_v24  ;;  %v423_v29 = vld [vmem:[%s5835_s4 + $0x300] sm:$0xff]  ;;  %3527 = vmatprep.subr.bf16.mxu0 %v4830_v27  ;;  %v4957_v34 = vcombine.low %v559_v23, %v563_v24 }
  0xab   : > { %v427_v30 = vld [vmem:[%s5835_s4 + $0x320] sm:$0xff]  ;;  %3528 = vmatpush2.bf16.msra.mxu0 %v4829_v33 }
  0xac   : > { %v551_v31 = vld [vmem:[%s5835_s4 + $0x700] sm:$0xff]  ;;  %v4822_v35 = vcombine.high %v423_v29, %v427_v30  ;;  %3588 = vmatprep.subr.bf16.mxu1 %v4958_v28  ;;  %v4821_v41 = vcombine.low %v423_v29, %v427_v30  ;;  %v316_v28 = vld [vmem:[%s5828_s5 + $0x48] sm:$0xff] }
  0xad   : > { %v555_v32 = vld [vmem:[%s5835_s4 + $0x720] sm:$0xff]  ;;  %3589 = vmatpush2.bf16.msra.mxu1 %v4957_v34  ;;  %v320_v29 = vld [vmem:[%s5828_s5 + $0x68] sm:$0xff] }
  0xae   : > { %v4950_v36 = vcombine.high %v551_v31, %v555_v32  ;;  %v415_v37 = vld [vmem:[%s5835_s4 + $0x2c0] sm:$0xff]  ;;  %3529 = vmatprep.subr.bf16.mxu0 %v4822_v35  ;;  %v4949_v42 = vcombine.low %v551_v31, %v555_v32  ;;  %v6000_v34 = vcombine.high %v316_v28, %v320_v29 }
  0xaf   : > { %v419_v38 = vld [vmem:[%s5835_s4 + $0x2e0] sm:$0xff]  ;;  %3530 = vmatpush2.bf16.msra.mxu0 %v4821_v41 }
  0xb0   : > { %v543_v39 = vld [vmem:[%s5835_s4 + $0x6c0] sm:$0xff]  ;;  %v4814_v43 = vcombine.high %v415_v37, %v419_v38  ;;  %3590 = vmatprep.subr.bf16.mxu1 %v4950_v36  ;;  %v4813_v49 = vcombine.low %v415_v37, %v419_v38 }
  0xb1   : > { %v547_v40 = vld [vmem:[%s5835_s4 + $0x6e0] sm:$0xff]  ;;  %3591 = vmatpush2.bf16.msra.mxu1 %v4949_v42 }
  0xb2   : > { %v4942_v44 = vcombine.high %v543_v39, %v547_v40  ;;  %v407_v45 = vld [vmem:[%s5835_s4 + $0x280] sm:$0xff]  ;;  %3531 = vmatprep.subr.bf16.mxu0 %v4814_v43  ;;  %v4941_v50 = vcombine.low %v543_v39, %v547_v40 }
  0xb3   : > { %v411_v46 = vld [vmem:[%s5835_s4 + $0x2a0] sm:$0xff]  ;;  %3532 = vmatpush2.bf16.msra.mxu0 %v4813_v49 }
  0xb4   : > { %v535_v47 = vld [vmem:[%s5835_s4 + $0x680] sm:$0xff]  ;;  %v4806_v51 = vcombine.high %v407_v45, %v411_v46  ;;  %3592 = vmatprep.subr.bf16.mxu1 %v4942_v44  ;;  %v4805_v62 = vcombine.low %v407_v45, %v411_v46  ;;  %v6012_v46 = vcombine.low %v316_v28, %v320_v29 }
  0xb5   : > { %v539_v48 = vld [vmem:[%s5835_s4 + $0x6a0] sm:$0xff]  ;;  %3593 = vmatpush2.bf16.msra.mxu1 %v4941_v50 }
  0xb6   : > { %v4934_v52 = vcombine.high %v535_v47, %v539_v48  ;;  %v399_v53 = vld [vmem:[%s5835_s4 + $0x240] sm:$0xff]  ;;  %3533 = vmatprep.subr.bf16.mxu0 %v4806_v51  ;;  %v4933_v63 = vcombine.low %v535_v47, %v539_v48  ;;  %v324_v47 = vld [vmem:[%s5828_s5 + $0x88] sm:$0xff] }
  0xb7   : > { %v403_v54 = vld [vmem:[%s5835_s4 + $0x260] sm:$0xff]  ;;  %3534 = vmatpush2.bf16.msra.mxu0 %v4805_v62 }
  0xb8   : > { %v527_v57 = vld [vmem:[%s5835_s4 + $0x640] sm:$0xff]  ;;  %v4798_v1 = vcombine.high %v399_v53, %v403_v54  ;;  %3594 = vmatprep.subr.bf16.mxu1 %v4934_v52  ;;  %v4797_v7 = vcombine.low %v399_v53, %v403_v54 }
  0xb9   : > { %v531_v58 = vld [vmem:[%s5835_s4 + $0x660] sm:$0xff]  ;;  %3595 = vmatpush2.bf16.msra.mxu1 %v4933_v63 }
  0xba   : > { %v4926_v2 = vcombine.high %v527_v57, %v531_v58  ;;  %v391_v3 = vld [vmem:[%s5835_s4 + $0x200] sm:$0xff]  ;;  %3535 = vmatprep.subr.bf16.mxu0 %v4798_v1  ;;  %v4925_v8 = vcombine.low %v527_v57, %v531_v58  ;;  %v6022_v58 = vcombine.high %v324_v47, %v324_v47 }
  0xbb   : > { %v395_v4 = vld [vmem:[%s5835_s4 + $0x220] sm:$0xff]  ;;  %3536 = vmatpush2.bf16.msra.mxu0 %v4797_v7 }
  0xbc   : > { %v519_v5 = vld [vmem:[%s5835_s4 + $0x600] sm:$0xff]  ;;  %v4790_v9 = vcombine.high %v391_v3, %v395_v4  ;;  %3596 = vmatprep.subr.bf16.mxu1 %v4926_v2  ;;  %v4789_v15 = vcombine.low %v391_v3, %v395_v4 }
  0xbd   : > { %v523_v6 = vld [vmem:[%s5835_s4 + $0x620] sm:$0xff]  ;;  %3597 = vmatpush2.bf16.msra.mxu1 %v4925_v8  ;;  %v6034_v8 = vld [vmem:[%s5828_s5 + $0x10] sm:$0xff] }
  0xbe   : > { %v4918_v10 = vcombine.high %v519_v5, %v523_v6  ;;  %v639_v11 = vld [vmem:[%s5835_s4 + $0x9c0] sm:$0xff]  ;;  %3537 = vmatprep.subr.bf16.mxu0 %v4790_v9  ;;  %v4917_v16 = vcombine.low %v519_v5, %v523_v6  ;;  %v6037_v9 = vld [vmem:[%s5828_s5 + $0x30] sm:$0xff] }
  0xbf   : > { %v643_v12 = vld [vmem:[%s5835_s4 + $0x9e0] sm:$0xff]  ;;  %3538 = vmatpush2.bf16.msra.mxu0 %v4789_v15 }
  0xc0   : > { %v767_v13 = vld [vmem:[%s5835_s4 + $0xdc0] sm:$0xff]  ;;  %v5038_v17 = vcombine.high %v639_v11, %v643_v12  ;;  %3598 = vmatprep.subr.bf16.mxu1 %v4918_v10  ;;  %v5037_v27 = vcombine.low %v639_v11, %v643_v12  ;;  %v6039_v11 = vcombine.low %v324_v47, %v324_v47  ;;  %v6042_v12 = vld [vmem:[%s5828_s5 + $0x18] sm:$0xff] }
  0xc1   : > { %v771_v14 = vld [vmem:[%s5835_s4 + $0xde0] sm:$0xff]  ;;  %3599 = vmatpush2.bf16.msra.mxu1 %v4917_v16 }
  0xc2   : > { %v5166_v18 = vcombine.high %v767_v13, %v771_v14  ;;  %v631_v19 = vld [vmem:[%s5835_s4 + $0x980] sm:$0xff]  ;;  %3629 = vmatprep.subr.bf16.mxu0 %v5038_v17  ;;  %v5165_v30 = vcombine.low %v767_v13, %v771_v14  ;;  %3540 = vmatmul.mubr.bf16.vlgmr.msra.gmra.mxu0 %v5982_v22  ;;  %v6045_v13 = vld [vmem:[%s5828_s5 + $0x38] sm:$0xff] }
  0xc3   : > { %v635_v20 = vld [vmem:[%s5835_s4 + $0x9a0] sm:$0xff]  ;;  %3630 = vmatpush1.bf16.msra.mxu0 %v5037_v27 }
  0xc4   : > { %v759_v21 = vld [vmem:[%s5835_s4 + $0xd80] sm:$0xff]  ;;  %v5030_v31 = vcombine.high %v631_v19, %v635_v20  ;;  %3690 = vmatprep.subr.bf16.mxu1 %v5166_v18  ;;  %3601 = vmatmul.mubr.bf16.vlgmr.msra.gmra.mxu1 %v5989_v26  ;;  %v5029_v35 = vcombine.low %v631_v19, %v635_v20  ;;  %v6051_v19 = vcombine.high %v6034_v8, %v6037_v9 }
  0xc5   : > { %v763_v23 = vld [vmem:[%s5835_s4 + $0xda0] sm:$0xff]  ;;  %3691 = vmatpush1.bf16.msra.mxu1 %v5165_v30  ;;  %3610 = vmatprep.mubr.bf16.mxu1 %v6000_v34 }
  0xc6   : > { %v315_v24 = vld [vmem:[%s5828_s5 + $0x40] sm:$0xff]  ;;  %v5158_v55 = vcombine.high %v759_v21, %v763_v23  ;;  %3631 = vmatprep.subr.bf16.mxu0 %v5030_v31  ;;  %v5157_v36 = vcombine.low %v759_v21, %v763_v23  ;;  %v6058_v23 = vcombine.high %v6042_v12, %v6045_v13 }
  0xc7   : > { %v319_v25 = vld [vmem:[%s5828_s5 + $0x60] sm:$0xff]  ;;  %3632 = vmatpush1.bf16.msra.mxu0 %v5029_v35 }
  0xc8   : > { %v623_v56 = vld [vmem:[%s5835_s4 + $0x940] sm:$0xff]  ;;  %v5995_v33 = vcombine.high %v315_v24, %v319_v25  ;;  %3692 = vmatprep.subr.bf16.mxu1 %v5158_v55  ;;  %v6009_v43 = vcombine.low %v315_v24, %v319_v25 }
  0xc9   : > { %v627_v32 = vld [vmem:[%s5835_s4 + $0x960] sm:$0xff]  ;;  %3693 = vmatpush1.bf16.msra.mxu1 %v5157_v36 }
  0xca   : > { %v751_v60 = vld [vmem:[%s5835_s4 + $0xd40] sm:$0xff]  ;;  %v5022_v37 = vcombine.high %v623_v56, %v627_v32  ;;  %3549 = vmatprep.mubr.bf16.mxu0 %v5995_v33  ;;  %v5021_v45 = vcombine.low %v623_v56, %v627_v32 }
  0xcb   : > { %v755_v61 = vld [vmem:[%s5835_s4 + $0xd60] sm:$0xff]  ;;  %3550 = vmatmul.mubr.bf16.gmra.mxu0 %v6009_v43 }
  0xcc   : > { %v5150_v38 = vcombine.high %v751_v60, %v755_v61  ;;  %v615_v39 = vld [vmem:[%s5835_s4 + $0x900] sm:$0xff]  ;;  %3633 = vmatprep.subr.bf16.mxu0 %v5022_v37  ;;  %v5149_v48 = vcombine.low %v751_v60, %v755_v61  ;;  %3611 = vmatmul.mubr.bf16.gmra.mxu1 %v6012_v46 }
  0xcd   : > { %v619_v40 = vld [vmem:[%s5835_s4 + $0x920] sm:$0xff]  ;;  %3634 = vmatpush1.bf16.msra.mxu0 %v5021_v45  ;;  %3620 = vmatprep.mubr.bf16.mxu1 %v6022_v58 }
  0xce   : > { %v743_v41 = vld [vmem:[%s5835_s4 + $0xd00] sm:$0xff]  ;;  %v5014_v49 = vcombine.high %v615_v39, %v619_v40  ;;  %3694 = vmatprep.subr.bf16.mxu1 %v5150_v38  ;;  %v5013_v62 = vcombine.low %v615_v39, %v619_v40 }
  0xcf   : > { %v747_v42 = vld [vmem:[%s5835_s4 + $0xd20] sm:$0xff]  ;;  %3695 = vmatpush1.bf16.msra.mxu1 %v5149_v48 }
  0xd0   : > { %v323_v44 = vld [vmem:[%s5828_s5 + $0x80] sm:$0xff]  ;;  %v5142_v50 = vcombine.high %v743_v41, %v747_v42  ;;  %3635 = vmatprep.subr.bf16.mxu0 %v5014_v49  ;;  %v5141_v63 = vcombine.low %v743_v41, %v747_v42 }
  0xd1   : > { %v607_v51 = vld [vmem:[%s5835_s4 + $0x8c0] sm:$0xff]  ;;  %v6017_v53 = vcombine.high %v323_v44, %v323_v44  ;;  %v6030_v7 = vcombine.low %v323_v44, %v323_v44  ;;  %3636 = vmatpush1.bf16.msra.mxu0 %v5013_v62 }
  0xd2   : > { %v611_v52 = vld [vmem:[%s5835_s4 + $0x8e0] sm:$0xff]  ;;  %3696 = vmatprep.subr.bf16.mxu1 %v5142_v50 }
  0xd3   : > { %v735_v54 = vld [vmem:[%s5835_s4 + $0xcc0] sm:$0xff]  ;;  %v5006_v1 = vcombine.high %v607_v51, %v611_v52  ;;  %3559 = vmatprep.mubr.bf16.mxu0 %v6017_v53  ;;  %v5005_v10 = vcombine.low %v607_v51, %v611_v52  ;;  %3697 = vmatpush1.bf16.msra.mxu1 %v5141_v63 }
  0xd4   : > { %v739_v57 = vld [vmem:[%s5835_s4 + $0xce0] sm:$0xff]  ;;  %3560 = vmatmul.mubr.bf16.gmra.mxu0 %v6030_v7  ;;  %3621 = vmatmul.mubr.bf16.gmra.mxu1 %v6039_v11 }
  0xd5   : > { %v5134_v2 = vcombine.high %v735_v54, %v739_v57  ;;  %v599_v3 = vld [vmem:[%s5835_s4 + $0x880] sm:$0xff]  ;;  %3637 = vmatprep.subr.bf16.mxu0 %v5006_v1  ;;  %v5133_v14 = vcombine.low %v735_v54, %v739_v57  ;;  %3661 = vmatprep.mubr.bf16.mxu0 %v6051_v19 }
  0xd6   : > { %v603_v4 = vld [vmem:[%s5835_s4 + $0x8a0] sm:$0xff]  ;;  %3638 = vmatpush1.bf16.msra.mxu0 %v5005_v10  ;;  %3722 = vmatprep.mubr.bf16.mxu1 %v6058_v23 }
  0xd7   : > { %v727_v5 = vld [vmem:[%s5835_s4 + $0xc80] sm:$0xff]  ;;  %v4998_v15 = vcombine.high %v599_v3, %v603_v4  ;;  %3698 = vmatprep.subr.bf16.mxu1 %v5134_v2  ;;  %v4997_v24 = vcombine.low %v599_v3, %v603_v4 }
  0xd8   : > { %v731_v6 = vld [vmem:[%s5835_s4 + $0xca0] sm:$0xff]  ;;  %3699 = vmatpush1.bf16.msra.mxu1 %v5133_v14 }
  0xd9   : > { %v5126_v16 = vcombine.high %v727_v5, %v731_v6  ;;  %v591_v17 = vld [vmem:[%s5835_s4 + $0x840] sm:$0xff]  ;;  %3639 = vmatprep.subr.bf16.mxu0 %v4998_v15  ;;  %v5125_v25 = vcombine.low %v727_v5, %v731_v6 }
  0xda   : > { %v595_v18 = vld [vmem:[%s5835_s4 + $0x860] sm:$0xff]  ;;  %3640 = vmatpush1.bf16.msra.mxu0 %v4997_v24 }
  0xdb   : > { %v719_v20 = vld [vmem:[%s5835_s4 + $0xc40] sm:$0xff]  ;;  %v4990_v27 = vcombine.high %v591_v17, %v595_v18  ;;  %3700 = vmatprep.subr.bf16.mxu1 %v5126_v16  ;;  %v4989_v56 = vcombine.low %v591_v17, %v595_v18 }
  0xdc   : > { %v723_v21 = vld [vmem:[%s5835_s4 + $0xc60] sm:$0xff]  ;;  %3701 = vmatpush1.bf16.msra.mxu1 %v5125_v25 }
  0xdd   : > { %v5118_v28 = vcombine.high %v719_v20, %v723_v21  ;;  %v583_v29 = vld [vmem:[%s5835_s4 + $0x800] sm:$0xff]  ;;  %3641 = vmatprep.subr.bf16.mxu0 %v4990_v27  ;;  %v5117_v32 = vcombine.low %v719_v20, %v723_v21 }
  0xde   : > { %v587_v30 = vld [vmem:[%s5835_s4 + $0x820] sm:$0xff]  ;;  %3642 = vmatpush1.bf16.msra.mxu0 %v4989_v56 }
  0xdf   : > { %v711_v31 = vld [vmem:[%s5835_s4 + $0xc00] sm:$0xff]  ;;  %v4982_v60 = vcombine.high %v583_v29, %v587_v30  ;;  %3702 = vmatprep.subr.bf16.mxu1 %v5118_v28  ;;  %v4981_v39 = vcombine.low %v583_v29, %v587_v30 }
  0xe0   : > { %v715_v55 = vld [vmem:[%s5835_s4 + $0xc20] sm:$0xff]  ;;  %3703 = vmatpush1.bf16.msra.mxu1 %v5117_v32 }
  0xe1   : > { %v5110_v61 = vcombine.high %v711_v31, %v715_v55  ;;  %v703_v35 = vld [vmem:[%s5835_s4 + $0xbc0] sm:$0xff]  ;;  %3643 = vmatprep.subr.bf16.mxu0 %v4982_v60  ;;  %v5109_v40 = vcombine.low %v711_v31, %v715_v55 }
  0xe2   : > { %v707_v36 = vld [vmem:[%s5835_s4 + $0xbe0] sm:$0xff]  ;;  %3644 = vmatpush1.bf16.msra.mxu0 %v4981_v39 }
  0xe3   : > { %v831_v37 = vld [vmem:[%s5835_s4 + $0xfc0] sm:$0xff]  ;;  %v5102_v41 = vcombine.high %v703_v35, %v707_v36  ;;  %3704 = vmatprep.subr.bf16.mxu1 %v5110_v61  ;;  %v5101_v49 = vcombine.low %v703_v35, %v707_v36 }
  0xe4   : > { %v835_v38 = vld [vmem:[%s5835_s4 + $0xfe0] sm:$0xff]  ;;  %3705 = vmatpush1.bf16.msra.mxu1 %v5109_v40 }
  0xe5   : > { %v5230_v42 = vcombine.high %v831_v37, %v835_v38  ;;  %v695_v44 = vld [vmem:[%s5835_s4 + $0xb80] sm:$0xff]  ;;  %3645 = vmatprep.subr.bf16.mxu0 %v5102_v41  ;;  %v5229_v50 = vcombine.low %v831_v37, %v835_v38 }
  0xe6   : > { %v699_v45 = vld [vmem:[%s5835_s4 + $0xba0] sm:$0xff]  ;;  %3646 = vmatpush2.bf16.msra.mxu0 %v5101_v49 }
  0xe7   : > { %v823_v47 = vld [vmem:[%s5835_s4 + $0xf80] sm:$0xff]  ;;  %v5094_v51 = vcombine.high %v695_v44, %v699_v45  ;;  %3706 = vmatprep.subr.bf16.mxu1 %v5230_v42  ;;  %v5093_v1 = vcombine.low %v695_v44, %v699_v45 }
  0xe8   : > { %v827_v48 = vld [vmem:[%s5835_s4 + $0xfa0] sm:$0xff]  ;;  %3707 = vmatpush2.bf16.msra.mxu1 %v5229_v50 }
  0xe9   : > { %v5222_v52 = vcombine.high %v823_v47, %v827_v48  ;;  %v687_v54 = vld [vmem:[%s5835_s4 + $0xb40] sm:$0xff]  ;;  %3647 = vmatprep.subr.bf16.mxu0 %v5094_v51  ;;  %v5221_v2 = vcombine.low %v823_v47, %v827_v48 }
  0xea   : > { %v691_v57 = vld [vmem:[%s5835_s4 + $0xb60] sm:$0xff]  ;;  %3648 = vmatpush2.bf16.msra.mxu0 %v5093_v1  ;;  %v512_v1 = vld [vmem:[%s5835_s4 + $0x5c8] sm:$0xff] }
  0xeb   : > { %v815_v62 = vld [vmem:[%s5835_s4 + $0xf40] sm:$0xff]  ;;  %v5086_v3 = vcombine.high %v687_v54, %v691_v57  ;;  %3708 = vmatprep.subr.bf16.mxu1 %v5222_v52  ;;  %v5085_v15 = vcombine.low %v687_v54, %v691_v57 }
  0xec   : > { %v819_v63 = vld [vmem:[%s5835_s4 + $0xf60] sm:$0xff]  ;;  %3709 = vmatpush2.bf16.msra.mxu1 %v5221_v2  ;;  %v516_v2 = vld [vmem:[%s5835_s4 + $0x5e8] sm:$0xff] }
  0xed   : > { %v5214_v4 = vcombine.high %v815_v62, %v819_v63  ;;  %v679_v5 = vld [vmem:[%s5835_s4 + $0xb00] sm:$0xff]  ;;  %3649 = vmatprep.subr.bf16.mxu0 %v5086_v3  ;;  %v5213_v16 = vcombine.low %v815_v62, %v819_v63  ;;  %v384_v62 = vld [vmem:[%s5835_s4 + $0x1c8] sm:$0xff] }
  0xee   : > { %v683_v6 = vld [vmem:[%s5835_s4 + $0xb20] sm:$0xff]  ;;  %3650 = vmatpush2.bf16.msra.mxu0 %v5085_v15  ;;  %v388_v63 = vld [vmem:[%s5835_s4 + $0x1e8] sm:$0xff] }
  0xef   : > { %v807_v10 = vld [vmem:[%s5835_s4 + $0xf00] sm:$0xff]  ;;  %v5078_v17 = vcombine.high %v679_v5, %v683_v6  ;;  %3710 = vmatprep.subr.bf16.mxu1 %v5214_v4  ;;  %v5077_v27 = vcombine.low %v679_v5, %v683_v6  ;;  %v4784_v5 = vcombine.high %v384_v62, %v388_v63  ;;  %v4912_v6 = vcombine.high %v512_v1, %v516_v2  ;;  %v504_v15 = vld [vmem:[%s5835_s4 + $0x588] sm:$0xff] }
  0xf0   : > { %v811_v14 = vld [vmem:[%s5835_s4 + $0xf20] sm:$0xff]  ;;  %3711 = vmatpush2.bf16.msra.mxu1 %v5213_v16  ;;  %v6108_v16 = vcombine.low %v6034_v8, %v6037_v9 }
  0xf1   : > { %v5206_v18 = vcombine.high %v807_v10, %v811_v14  ;;  %v671_v20 = vld [vmem:[%s5835_s4 + $0xac0] sm:$0xff]  ;;  %3651 = vmatprep.subr.bf16.mxu0 %v5078_v17  ;;  %v5205_v28 = vcombine.low %v807_v10, %v811_v14  ;;  %v376_v10 = vld [vmem:[%s5835_s4 + $0x188] sm:$0xff] }
  0xf2   : > { %v675_v21 = vld [vmem:[%s5835_s4 + $0xae0] sm:$0xff]  ;;  %3652 = vmatpush2.bf16.msra.mxu0 %v5077_v27  ;;  %v380_v14 = vld [vmem:[%s5835_s4 + $0x1a8] sm:$0xff]  ;;  %v322_v27 = vld [vmem:[%s5828_s5 + $0x78] sm:$0xff] }
  0xf3   : > { %v799_v24 = vld [vmem:[%s5835_s4 + $0xec0] sm:$0xff]  ;;  %v5070_v29 = vcombine.high %v671_v20, %v675_v21  ;;  %3712 = vmatprep.subr.bf16.mxu1 %v5206_v18  ;;  %v5069_v60 = vcombine.low %v671_v20, %v675_v21  ;;  %v508_v17 = vld [vmem:[%s5835_s4 + $0x5a8] sm:$0xff]  ;;  %v317_v18 = vld [vmem:[%s5828_s5 + $0x50] sm:$0xff]  ;;  %v6115_v21 = vcombine.low %v6042_v12, %v6045_v13  ;;  %v4776_v8 = vcombine.high %v376_v10, %v380_v14 }
  0xf4   : > { %v803_v25 = vld [vmem:[%s5835_s4 + $0xee0] sm:$0xff]  ;;  %3713 = vmatpush2.bf16.msra.mxu1 %v5205_v28  ;;  %v321_v20 = vld [vmem:[%s5828_s5 + $0x70] sm:$0xff]  ;;  %v4911_v28 = vcombine.low %v512_v1, %v516_v2  ;;  %v4904_v9 = vcombine.high %v504_v15, %v508_v17  ;;  %v500_v12 = vld [vmem:[%s5835_s4 + $0x568] sm:$0xff] }
  0xf5   : > { %v5198_v30 = vcombine.high %v799_v24, %v803_v25  ;;  %v663_v31 = vld [vmem:[%s5835_s4 + $0xa80] sm:$0xff]  ;;  %3653 = vmatprep.subr.bf16.mxu0 %v5070_v29  ;;  %v5197_v61 = vcombine.low %v799_v24, %v803_v25  ;;  %v4783_v24 = vcombine.low %v384_v62, %v388_v63  ;;  %v318_v25 = vld [vmem:[%s5828_s5 + $0x58] sm:$0xff]  ;;  %v6119_v29 = vcombine.high %v317_v18, %v321_v20 }
  0xf6   : > { %v667_v55 = vld [vmem:[%s5835_s4 + $0xaa0] sm:$0xff]  ;;  %3654 = vmatpush2.bf16.msra.mxu0 %v5069_v60  ;;  %v6126_v13 = vcombine.high %v318_v25, %v322_v27 }
  0xf7   : > { %v791_v56 = vld [vmem:[%s5835_s4 + $0xe80] sm:$0xff]  ;;  %v5062_v35 = vcombine.high %v663_v31, %v667_v55  ;;  %3714 = vmatprep.subr.bf16.mxu1 %v5198_v30  ;;  %v5061_v41 = vcombine.low %v663_v31, %v667_v55  ;;  %v368_v30 = vld [vmem:[%s5835_s4 + $0x148] sm:$0xff] }
  0xf8   : > { %v795_v32 = vld [vmem:[%s5835_s4 + $0xea0] sm:$0xff]  ;;  %3715 = vmatpush2.bf16.msra.mxu1 %v5197_v61  ;;  %v372_v31 = vld [vmem:[%s5835_s4 + $0x168] sm:$0xff] }
  0xf9   : > { %v5190_v36 = vcombine.high %v791_v56, %v795_v32  ;;  %v655_v37 = vld [vmem:[%s5835_s4 + $0xa40] sm:$0xff]  ;;  %3655 = vmatprep.subr.bf16.mxu0 %v5062_v35  ;;  %v5189_v42 = vcombine.low %v791_v56, %v795_v32  ;;  %v496_v55 = vld [vmem:[%s5835_s4 + $0x548] sm:$0xff]  ;;  %v4775_v56 = vcombine.low %v376_v10, %v380_v14  ;;  %v4903_v32 = vcombine.low %v504_v15, %v508_v17 }
  0xfa   : > { %v659_v38 = vld [vmem:[%s5835_s4 + $0xa60] sm:$0xff]  ;;  %3656 = vmatpush2.bf16.msra.mxu0 %v5061_v41  ;;  %v4768_v60 = vcombine.high %v368_v30, %v372_v31  ;;  %v4896_v61 = vcombine.high %v496_v55, %v500_v12  ;;  %v360_v35 = vld [vmem:[%s5835_s4 + $0x108] sm:$0xff]  ;;  %v4767_v41 = vcombine.low %v368_v30, %v372_v31 }
  0xfb   : > { %v783_v39 = vld [vmem:[%s5835_s4 + $0xe40] sm:$0xff]  ;;  %v5054_v44 = vcombine.high %v655_v37, %v659_v38  ;;  %3716 = vmatprep.subr.bf16.mxu1 %v5190_v36  ;;  %v5053_v51 = vcombine.low %v655_v37, %v659_v38  ;;  %v364_v36 = vld [vmem:[%s5835_s4 + $0x128] sm:$0xff]  ;;  %v6132_v37 = vcombine.low %v317_v18, %v321_v20 }
  0xfc   : > { %v787_v40 = vld [vmem:[%s5835_s4 + $0xe60] sm:$0xff]  ;;  %3717 = vmatpush2.bf16.msra.mxu1 %v5189_v42  ;;  %v488_v38 = vld [vmem:[%s5835_s4 + $0x508] sm:$0xff]  ;;  %v6138_v42 = vcombine.low %v318_v25, %v322_v27  ;;  %v4759_v62 = vcombine.low %v360_v35, %v364_v36 }
  0xfd   : > { %v5182_v45 = vcombine.high %v783_v39, %v787_v40  ;;  %v647_v47 = vld [vmem:[%s5835_s4 + $0xa00] sm:$0xff]  ;;  %3657 = vmatprep.subr.bf16.mxu0 %v5054_v44  ;;  %v5181_v52 = vcombine.low %v783_v39, %v787_v40  ;;  %v492_v39 = vld [vmem:[%s5835_s4 + $0x528] sm:$0xff]  ;;  %v325_v40 = vld [vmem:[%s5828_s5 + $0x90] sm:$0xff] }
  0xfe   : > { %v651_v48 = vld [vmem:[%s5835_s4 + $0xa20] sm:$0xff]  ;;  %3658 = vmatpush2.bf16.msra.mxu0 %v5053_v51  ;;  %v326_v44 = vld [vmem:[%s5828_s5 + $0x98] sm:$0xff]  ;;  %v356_v51 = vld [vmem:[%s5835_s4 + $0xe8] sm:$0xff]  ;;  %v4887_v63 = vcombine.low %v488_v38, %v492_v39  ;;  %s5605_s5 = smov [#allocation7]  }
  0xff   : > { %v775_v49 = vld [vmem:[%s5835_s4 + $0xe00] sm:$0xff]  ;;  %v5046_v54 = vcombine.high %v647_v47, %v651_v48  ;;  %3718 = vmatprep.subr.bf16.mxu1 %v5182_v45  ;;  %v5045_v3 = vcombine.low %v647_v47, %v651_v48  ;;  %v4895_v45 = vcombine.low %v496_v55, %v500_v12  ;;  %v4760_v47 = vcombine.high %v360_v35, %v364_v36  ;;  %v476_v10 = vld [vmem:[%s5835_s4 + $0x4a8] sm:$0xff]  ;;  %s5453_s21 = sshll.u32 %s5605_s5, 4  ;;  %s5454_s21 = int_to_ptr.vmem [resolvable:$false] %s5453_s21 }
 0x100   : > { %v779_v50 = vld [vmem:[%s5835_s4 + $0xe20] sm:$0xff]  ;;  %3719 = vmatpush2.bf16.msra.mxu1 %v5181_v52  ;;  %v4888_v48 = vcombine.high %v488_v38, %v492_v39  ;;  %v480_v52 = vld [vmem:[%s5835_s4 + $0x4c8] sm:$0xff]  ;;  %v6159_v15 = vcombine.low %v326_v44, %v326_v44  ;;  %s5455_s2 = scalar_lea.vmem %s5454_s21, 10240  ;;  %p5456_p1 = scmp.lt.s32.totalorder %s6948_s19, %s5454_s21 }
 0x101   : > { %v5174_v57 = vcombine.high %v775_v49, %v779_v50  ;;  %3659 = vmatprep.subr.bf16.mxu0 %v5046_v54  ;;  %v5173_v4 = vcombine.low %v775_v49, %v779_v50  ;;  %v6141_v49 = vcombine.high %v325_v40, %v325_v40  ;;  %v352_v50 = vld [vmem:[%s5835_s4 + $0xc8] sm:$0xff]  ;;  %p5457_p0 = scmp.lt.s32.totalorder %s5455_s2, %s5449_s29 }
 0x102   : > { %3660 = vmatpush2.bf16.msra.mxu0 %v5045_v3  ;;  %v484_v54 = vld [vmem:[%s5835_s4 + $0x4e8] sm:$0xff]  ;;  %v4752_v1 = vcombine.high %v352_v50, %v356_v51  ;;  %v4751_v14 = vcombine.low %v352_v50, %v356_v51  ;;  %7074 = vst [vmem:[#allocation20_spill] sm:$0xff] %v6159_v15 }
 0x103   : > { %3720 = vmatprep.subr.bf16.mxu1 %v5174_v57  ;;  %3751 = vmatprep.subr.bf16.mxu0 %v4784_v5  ;;  %v6148_v57 = vcombine.high %v326_v44, %v326_v44  ;;  %v4880_v2 = vcombine.high %v480_v52, %v484_v54  ;;  %v344_v3 = vld [vmem:[%s5835_s4 + $0x88] sm:$0xff]  ;;  %v6154_v5 = vcombine.low %v325_v40, %v325_v40  ;;  %p5458_p6 = por %p5457_p0, %p5456_p1 }
 0x104   : > { %3721 = vmatpush2.bf16.msra.mxu1 %v5173_v4  ;;  %v348_v4 = vld [vmem:[%s5835_s4 + $0xa8] sm:$0xff]  ;;  %v4879_v17 = vcombine.low %v480_v52, %v484_v54 }
 0x105   : > { %3812 = vmatprep.subr.bf16.mxu1 %v4912_v6  ;;  %3662 = vmatmul.mubr.bf16.vlgmr.msra.gmra.mxu0 %v6108_v16  ;;  %7073 = vst [vmem:[#allocation19_spill] sm:$0xff] %v6154_v5  ;;  %v472_v6 = vld [vmem:[%s5835_s4 + $0x488] sm:$0xff]  ;;  %v4744_v18 = vcombine.high %v344_v3, %v348_v4  ;;  %p5459_p9 = pnand %p5458_p6, %p5452_p10 }
 0x106   : > { %3752 = vmatpush1.bf16.msra.mxu0 %v4783_v24  ;;  %3671 = vmatprep.mubr.bf16.mxu0 %v6119_v29  ;;  %v4872_v20 = vcombine.high %v472_v6, %v476_v10  ;;  %v336_v24 = vld [vmem:[%s5835_s4 + $0x48] sm:$0xff] }
 0x107   : > { %3723 = vmatmul.mubr.bf16.vlgmr.msra.gmra.mxu1 %v6115_v21  ;;  %3753 = vmatprep.subr.bf16.mxu0 %v4776_v8  ;;  %v340_v25 = vld [vmem:[%s5835_s4 + $0x68] sm:$0xff]  ;;  %v4743_v8 = vcombine.low %v344_v3, %v348_v4 }
 0x108   : > { %3813 = vmatpush1.bf16.msra.mxu1 %v4911_v28  ;;  %3732 = vmatprep.mubr.bf16.mxu1 %v6126_v13  ;;  %v464_v27 = vld [vmem:[%s5835_s4 + $0x448] sm:$0xff]  ;;  %v4736_v30 = vcombine.high %v336_v24, %v340_v25 }
 0x109   : > { %3814 = vmatprep.subr.bf16.mxu1 %v4904_v9  ;;  %v468_v28 = vld [vmem:[%s5835_s4 + $0x468] sm:$0xff]  ;;  %v4871_v9 = vcombine.low %v472_v6, %v476_v10 }
 0x10a   : > { %3754 = vmatpush1.bf16.msra.mxu0 %v4775_v56  ;;  %v4864_v31 = vcombine.high %v464_v27, %v468_v28  ;;  %v328_v55 = vld [vmem:[%s5835_s4 + $0x8] sm:$0xff] }
 0x10b   : > { %3755 = vmatprep.subr.bf16.mxu0 %v4768_v60  ;;  %v332_v12 = vld [vmem:[%s5835_s4 + $0x28] sm:$0xff]  ;;  %v4735_v60 = vcombine.low %v336_v24, %v340_v25 }
 0x10c   : > { %3815 = vmatpush1.bf16.msra.mxu1 %v4903_v32  ;;  %v456_v56 = vld [vmem:[%s5835_s4 + $0x408] sm:$0xff]  ;;  %v4728_v35 = vcombine.high %v328_v55, %v332_v12  ;;  %v4727_v44 = vcombine.low %v328_v55, %v332_v12 }
 0x10d   : > { %3816 = vmatprep.subr.bf16.mxu1 %v4896_v61  ;;  %3672 = vmatmul.mubr.bf16.gmra.mxu0 %v6132_v37  ;;  %v460_v32 = vld [vmem:[%s5835_s4 + $0x428] sm:$0xff]  ;;  %v4863_v61 = vcombine.low %v464_v27, %v468_v28 }
 0x10e   : > { %3756 = vmatpush1.bf16.msra.mxu0 %v4767_v41  ;;  %3681 = vmatprep.mubr.bf16.mxu0 %v6141_v49  ;;  %v4856_v36 = vcombine.high %v456_v56, %v460_v32  ;;  %v448_v38 = vld [vmem:[%s5835_s4 + $0x3c8] sm:$0xff] }
 0x10f   : > { %3733 = vmatmul.mubr.bf16.gmra.mxu1 %v6138_v42  ;;  %3757 = vmatprep.subr.bf16.mxu0 %v4760_v47  ;;  %v452_v39 = vld [vmem:[%s5835_s4 + $0x3e8] sm:$0xff] }
 0x110   : > { %3817 = vmatpush1.bf16.msra.mxu1 %v4895_v45  ;;  %3742 = vmatprep.mubr.bf16.mxu1 %v6148_v57  ;;  %v576_v40 = vld [vmem:[%s5835_s4 + $0x7c8] sm:$0xff]  ;;  %v4855_v45 = vcombine.low %v456_v56, %v460_v32  ;;  %v4848_v47 = vcombine.high %v448_v38, %v452_v39 }
 0x111   : > { %3818 = vmatprep.subr.bf16.mxu1 %v4888_v48  ;;  %v580_v41 = vld [vmem:[%s5835_s4 + $0x7e8] sm:$0xff] }
 0x112   : > { %3758 = vmatpush1.bf16.msra.mxu0 %v4759_v62  ;;  %v4976_v48 = vcombine.high %v576_v40, %v580_v41  ;;  %v440_v50 = vld [vmem:[%s5835_s4 + $0x388] sm:$0xff]  ;;  %v4847_v62 = vcombine.low %v448_v38, %v452_v39 }
 0x113   : > { %3759 = vmatprep.subr.bf16.mxu0 %v4752_v1  ;;  %v444_v51 = vld [vmem:[%s5835_s4 + $0x3a8] sm:$0xff] }
 0x114   : > { %3819 = vmatpush1.bf16.msra.mxu1 %v4887_v63  ;;  %v568_v52 = vld [vmem:[%s5835_s4 + $0x788] sm:$0xff]  ;;  %v4975_v63 = vcombine.low %v576_v40, %v580_v41  ;;  %v4840_v1 = vcombine.high %v440_v50, %v444_v51 }
 0x115   : > { %3820 = vmatprep.subr.bf16.mxu1 %v4880_v2  ;;  %3682 = vmatmul.mubr.bf16.gmra.mxu0 %v6154_v5  ;;  %v572_v54 = vld [vmem:[%s5835_s4 + $0x7a8] sm:$0xff] }
 0x116   : > { %3760 = vmatpush1.bf16.msra.mxu0 %v4751_v14  ;;  %3783 = vmatprep.mubr.bf16.mxu0 %v5925_v59  ;;  %v4968_v2 = vcombine.high %v568_v52, %v572_v54  ;;  %v432_v3 = vld [vmem:[%s5835_s4 + $0x348] sm:$0xff]  ;;  %v4839_v14 = vcombine.low %v440_v50, %v444_v51 }
 0x117   : > { %3743 = vmatmul.mubr.bf16.gmra.mxu1 %v6159_v15  ;;  %3761 = vmatprep.subr.bf16.mxu0 %v4744_v18  ;;  %v436_v4 = vld [vmem:[%s5835_s4 + $0x368] sm:$0xff] }
 0x118   : > { %3821 = vmatpush1.bf16.msra.mxu1 %v4879_v17  ;;  %3844 = vmatprep.mubr.bf16.mxu1 %v5937_v0  ;;  %v560_v6 = vld [vmem:[%s5835_s4 + $0x748] sm:$0xff]  ;;  %v4967_v17 = vcombine.low %v568_v52, %v572_v54  ;;  %v4832_v18 = vcombine.high %v432_v3, %v436_v4 }
 0x119   : > { %3822 = vmatprep.subr.bf16.mxu1 %v4872_v20  ;;  %v564_v10 = vld [vmem:[%s5835_s4 + $0x768] sm:$0xff] }
 0x11a   : > { %3762 = vmatpush1.bf16.msra.mxu0 %v4743_v8  ;;  %v4960_v20 = vcombine.high %v560_v6, %v564_v10  ;;  %v424_v24 = vld [vmem:[%s5835_s4 + $0x308] sm:$0xff]  ;;  %v4831_v8 = vcombine.low %v432_v3, %v436_v4 }
 0x11b   : > { %3763 = vmatprep.subr.bf16.mxu0 %v4736_v30  ;;  %v428_v25 = vld [vmem:[%s5835_s4 + $0x328] sm:$0xff] }
 0x11c   : > { %3823 = vmatpush1.bf16.msra.mxu1 %v4871_v9  ;;  %v552_v27 = vld [vmem:[%s5835_s4 + $0x708] sm:$0xff]  ;;  %v4959_v9 = vcombine.low %v560_v6, %v564_v10  ;;  %v4824_v30 = vcombine.high %v424_v24, %v428_v25 }
 0x11d   : > { %3824 = vmatprep.subr.bf16.mxu1 %v4864_v31  ;;  %v556_v28 = vld [vmem:[%s5835_s4 + $0x728] sm:$0xff] }
 0x11e   : > { %3764 = vmatpush1.bf16.msra.mxu0 %v4735_v60  ;;  %v4952_v31 = vcombine.high %v552_v27, %v556_v28  ;;  %v416_v55 = vld [vmem:[%s5835_s4 + $0x2c8] sm:$0xff]  ;;  %v4823_v60 = vcombine.low %v424_v24, %v428_v25 }
 0x11f   : > { %3765 = vmatprep.subr.bf16.mxu0 %v4728_v35  ;;  %v420_v12 = vld [vmem:[%s5835_s4 + $0x2e8] sm:$0xff] }
 0x120   : > { %3825 = vmatpush1.bf16.msra.mxu1 %v4863_v61  ;;  %v544_v56 = vld [vmem:[%s5835_s4 + $0x6c8] sm:$0xff]  ;;  %v4951_v61 = vcombine.low %v552_v27, %v556_v28  ;;  %v4816_v35 = vcombine.high %v416_v55, %v420_v12 }
 0x121   : > { %3826 = vmatprep.subr.bf16.mxu1 %v4856_v36  ;;  %v548_v32 = vld [vmem:[%s5835_s4 + $0x6e8] sm:$0xff] }
 0x122   : > { %3766 = vmatpush1.bf16.msra.mxu0 %v4727_v44  ;;  %v4944_v36 = vcombine.high %v544_v56, %v548_v32  ;;  %v408_v38 = vld [vmem:[%s5835_s4 + $0x288] sm:$0xff]  ;;  %v4815_v44 = vcombine.low %v416_v55, %v420_v12 }
 0x123   : > { %3767 = vmatprep.subr.bf16.mxu0 %v4848_v47  ;;  %v412_v39 = vld [vmem:[%s5835_s4 + $0x2a8] sm:$0xff] }
 0x124   : > { %3827 = vmatpush1.bf16.msra.mxu1 %v4855_v45  ;;  %v536_v40 = vld [vmem:[%s5835_s4 + $0x688] sm:$0xff]  ;;  %v4943_v45 = vcombine.low %v544_v56, %v548_v32  ;;  %v4808_v47 = vcombine.high %v408_v38, %v412_v39 }
 0x125   : > { %3828 = vmatprep.subr.bf16.mxu1 %v4976_v48  ;;  %v540_v41 = vld [vmem:[%s5835_s4 + $0x6a8] sm:$0xff] }
 0x126   : > { %3768 = vmatpush2.bf16.msra.mxu0 %v4847_v62  ;;  %v4936_v48 = vcombine.high %v536_v40, %v540_v41  ;;  %v400_v50 = vld [vmem:[%s5835_s4 + $0x248] sm:$0xff]  ;;  %v4807_v62 = vcombine.low %v408_v38, %v412_v39 }
 0x127   : > { %3769 = vmatprep.subr.bf16.mxu0 %v4840_v1  ;;  %v404_v51 = vld [vmem:[%s5835_s4 + $0x268] sm:$0xff] }
 0x128   : > { %3829 = vmatpush2.bf16.msra.mxu1 %v4975_v63  ;;  %v528_v52 = vld [vmem:[%s5835_s4 + $0x648] sm:$0xff]  ;;  %v4935_v63 = vcombine.low %v536_v40, %v540_v41  ;;  %v4800_v1 = vcombine.high %v400_v50, %v404_v51 }
 0x129   : > { %3830 = vmatprep.subr.bf16.mxu1 %v4968_v2  ;;  %v532_v54 = vld [vmem:[%s5835_s4 + $0x668] sm:$0xff] }
 0x12a   : > { %3770 = vmatpush2.bf16.msra.mxu0 %v4839_v14  ;;  %v4928_v2 = vcombine.high %v528_v52, %v532_v54  ;;  %v392_v3 = vld [vmem:[%s5835_s4 + $0x208] sm:$0xff]  ;;  %v4799_v14 = vcombine.low %v400_v50, %v404_v51 }
 0x12b   : > { %3771 = vmatprep.subr.bf16.mxu0 %v4832_v18  ;;  %v396_v4 = vld [vmem:[%s5835_s4 + $0x228] sm:$0xff] }
 0x12c   : > { %3831 = vmatpush2.bf16.msra.mxu1 %v4967_v17  ;;  %v520_v6 = vld [vmem:[%s5835_s4 + $0x608] sm:$0xff]  ;;  %v4927_v17 = vcombine.low %v528_v52, %v532_v54  ;;  %v4792_v18 = vcombine.high %v392_v3, %v396_v4 }
 0x12d   : > { %3832 = vmatprep.subr.bf16.mxu1 %v4960_v20  ;;  %v524_v10 = vld [vmem:[%s5835_s4 + $0x628] sm:$0xff] }
 0x12e   : > { %3772 = vmatpush2.bf16.msra.mxu0 %v4831_v8  ;;  %v4920_v20 = vcombine.high %v520_v6, %v524_v10  ;;  %v640_v24 = vld [vmem:[%s5835_s4 + $0x9c8] sm:$0xff]  ;;  %v4791_v8 = vcombine.low %v392_v3, %v396_v4 }
 0x12f   : > { %3773 = vmatprep.subr.bf16.mxu0 %v4824_v30  ;;  %v644_v25 = vld [vmem:[%s5835_s4 + $0x9e8] sm:$0xff] }
 0x130   : > { %3833 = vmatpush2.bf16.msra.mxu1 %v4959_v9  ;;  %v768_v27 = vld [vmem:[%s5835_s4 + $0xdc8] sm:$0xff]  ;;  %v4919_v9 = vcombine.low %v520_v6, %v524_v10  ;;  %v5040_v30 = vcombine.high %v640_v24, %v644_v25 }
 0x131   : > { %3834 = vmatprep.subr.bf16.mxu1 %v4952_v31  ;;  %v772_v28 = vld [vmem:[%s5835_s4 + $0xde8] sm:$0xff] }
 0x132   : > { %3774 = vmatpush2.bf16.msra.mxu0 %v4823_v60  ;;  %v5168_v31 = vcombine.high %v768_v27, %v772_v28  ;;  %v632_v55 = vld [vmem:[%s5835_s4 + $0x988] sm:$0xff]  ;;  %v5039_v60 = vcombine.low %v640_v24, %v644_v25 }
 0x133   : > { %3775 = vmatprep.subr.bf16.mxu0 %v4816_v35  ;;  %v636_v12 = vld [vmem:[%s5835_s4 + $0x9a8] sm:$0xff] }
 0x134   : > { %3835 = vmatpush2.bf16.msra.mxu1 %v4951_v61  ;;  %v760_v56 = vld [vmem:[%s5835_s4 + $0xd88] sm:$0xff]  ;;  %v5167_v61 = vcombine.low %v768_v27, %v772_v28  ;;  %v5032_v35 = vcombine.high %v632_v55, %v636_v12 }
 0x135   : > { %3836 = vmatprep.subr.bf16.mxu1 %v4944_v36  ;;  %v764_v32 = vld [vmem:[%s5835_s4 + $0xda8] sm:$0xff] }
 0x136   : > { %3776 = vmatpush2.bf16.msra.mxu0 %v4815_v44  ;;  %v5160_v36 = vcombine.high %v760_v56, %v764_v32  ;;  %v624_v38 = vld [vmem:[%s5835_s4 + $0x948] sm:$0xff]  ;;  %v5031_v44 = vcombine.low %v632_v55, %v636_v12 }
 0x137   : > { %3777 = vmatprep.subr.bf16.mxu0 %v4808_v47  ;;  %v628_v39 = vld [vmem:[%s5835_s4 + $0x968] sm:$0xff] }
 0x138   : > { %3837 = vmatpush2.bf16.msra.mxu1 %v4943_v45  ;;  %v752_v40 = vld [vmem:[%s5835_s4 + $0xd48] sm:$0xff]  ;;  %v5159_v45 = vcombine.low %v760_v56, %v764_v32  ;;  %v5024_v47 = vcombine.high %v624_v38, %v628_v39 }
 0x139   : > { %3838 = vmatprep.subr.bf16.mxu1 %v4936_v48  ;;  %v756_v41 = vld [vmem:[%s5835_s4 + $0xd68] sm:$0xff] }
 0x13a   : > { %3778 = vmatpush2.bf16.msra.mxu0 %v4807_v62  ;;  %v5152_v48 = vcombine.high %v752_v40, %v756_v41  ;;  %v616_v50 = vld [vmem:[%s5835_s4 + $0x908] sm:$0xff]  ;;  %v5023_v62 = vcombine.low %v624_v38, %v628_v39 }
 0x13b   : > { %3779 = vmatprep.subr.bf16.mxu0 %v4800_v1  ;;  %v620_v51 = vld [vmem:[%s5835_s4 + $0x928] sm:$0xff] }
 0x13c   : > { %3839 = vmatpush2.bf16.msra.mxu1 %v4935_v63  ;;  %v744_v52 = vld [vmem:[%s5835_s4 + $0xd08] sm:$0xff]  ;;  %v5151_v63 = vcombine.low %v752_v40, %v756_v41  ;;  %v5016_v1 = vcombine.high %v616_v50, %v620_v51 }
 0x13d   : > { %3840 = vmatprep.subr.bf16.mxu1 %v4928_v2  ;;  %v748_v54 = vld [vmem:[%s5835_s4 + $0xd28] sm:$0xff] }
 0x13e   : > { %3780 = vmatpush2.bf16.msra.mxu0 %v4799_v14  ;;  %v5144_v2 = vcombine.high %v744_v52, %v748_v54  ;;  %v608_v3 = vld [vmem:[%s5835_s4 + $0x8c8] sm:$0xff]  ;;  %v5015_v14 = vcombine.low %v616_v50, %v620_v51 }
 0x13f   : > { %3781 = vmatprep.subr.bf16.mxu0 %v4792_v18  ;;  %v612_v4 = vld [vmem:[%s5835_s4 + $0x8e8] sm:$0xff] }
 0x140   : > { %3841 = vmatpush2.bf16.msra.mxu1 %v4927_v17  ;;  %v736_v6 = vld [vmem:[%s5835_s4 + $0xcc8] sm:$0xff]  ;;  %v5143_v17 = vcombine.low %v744_v52, %v748_v54  ;;  %v5008_v18 = vcombine.high %v608_v3, %v612_v4 }
 0x141   : > { %3842 = vmatprep.subr.bf16.mxu1 %v4920_v20  ;;  %v740_v10 = vld [vmem:[%s5835_s4 + $0xce8] sm:$0xff] }
 0x142   : > { %3782 = vmatpush2.bf16.msra.mxu0 %v4791_v8  ;;  %v5136_v20 = vcombine.high %v736_v6, %v740_v10  ;;  %v600_v24 = vld [vmem:[%s5835_s4 + $0x888] sm:$0xff]  ;;  %v5007_v8 = vcombine.low %v608_v3, %v612_v4 }
 0x143   : > { %3873 = vmatprep.subr.bf16.mxu0 %v5040_v30  ;;  %v604_v25 = vld [vmem:[%s5835_s4 + $0x8a8] sm:$0xff] }
 0x144   : > { %3843 = vmatpush2.bf16.msra.mxu1 %v4919_v9  ;;  %v728_v27 = vld [vmem:[%s5835_s4 + $0xc88] sm:$0xff]  ;;  %v5135_v9 = vcombine.low %v736_v6, %v740_v10  ;;  %v5000_v30 = vcombine.high %v600_v24, %v604_v25 }
 0x145   : > { %3934 = vmatprep.subr.bf16.mxu1 %v5168_v31  ;;  %3784 = vmatmul.mubr.bf16.vlgmr.msra.gmra.mxu0 %v5982_v22  ;;  %v732_v28 = vld [vmem:[%s5835_s4 + $0xca8] sm:$0xff] }
 0x146   : > { %3874 = vmatpush1.bf16.msra.mxu0 %v5039_v60  ;;  %3793 = vmatprep.mubr.bf16.mxu0 %v5995_v33  ;;  %v5128_v31 = vcombine.high %v728_v27, %v732_v28  ;;  %v592_v55 = vld [vmem:[%s5835_s4 + $0x848] sm:$0xff]  ;;  %v4999_v60 = vcombine.low %v600_v24, %v604_v25 }
 0x147   : > { %3845 = vmatmul.mubr.bf16.vlgmr.msra.gmra.mxu1 %v5989_v26  ;;  %3875 = vmatprep.subr.bf16.mxu0 %v5032_v35  ;;  %v596_v12 = vld [vmem:[%s5835_s4 + $0x868] sm:$0xff] }
 0x148   : > { %3935 = vmatpush1.bf16.msra.mxu1 %v5167_v61  ;;  %3854 = vmatprep.mubr.bf16.mxu1 %v6000_v34  ;;  %v720_v56 = vld [vmem:[%s5835_s4 + $0xc48] sm:$0xff]  ;;  %v5127_v61 = vcombine.low %v728_v27, %v732_v28  ;;  %v4992_v35 = vcombine.high %v592_v55, %v596_v12 }
 0x149   : > { %3936 = vmatprep.subr.bf16.mxu1 %v5160_v36  ;;  %v724_v32 = vld [vmem:[%s5835_s4 + $0xc68] sm:$0xff] }
 0x14a   : > { %3876 = vmatpush1.bf16.msra.mxu0 %v5031_v44  ;;  %v5120_v36 = vcombine.high %v720_v56, %v724_v32  ;;  %v584_v38 = vld [vmem:[%s5835_s4 + $0x808] sm:$0xff]  ;;  %v4991_v44 = vcombine.low %v592_v55, %v596_v12 }
 0x14b   : > { %3877 = vmatprep.subr.bf16.mxu0 %v5024_v47  ;;  %v588_v39 = vld [vmem:[%s5835_s4 + $0x828] sm:$0xff] }
 0x14c   : > { %3937 = vmatpush1.bf16.msra.mxu1 %v5159_v45  ;;  %v712_v40 = vld [vmem:[%s5835_s4 + $0xc08] sm:$0xff]  ;;  %v5119_v45 = vcombine.low %v720_v56, %v724_v32  ;;  %v4984_v47 = vcombine.high %v584_v38, %v588_v39 }
 0x14d   : > { %3938 = vmatprep.subr.bf16.mxu1 %v5152_v48  ;;  %3794 = vmatmul.mubr.bf16.gmra.mxu0 %v6009_v43  ;;  %v716_v41 = vld [vmem:[%s5835_s4 + $0xc28] sm:$0xff] }
 0x14e   : > { %3878 = vmatpush1.bf16.msra.mxu0 %v5023_v62  ;;  %3803 = vmatprep.mubr.bf16.mxu0 %v6017_v53  ;;  %v5112_v48 = vcombine.high %v712_v40, %v716_v41  ;;  %v704_v50 = vld [vmem:[%s5835_s4 + $0xbc8] sm:$0xff]  ;;  %v4983_v62 = vcombine.low %v584_v38, %v588_v39 }
 0x14f   : > { %3855 = vmatmul.mubr.bf16.gmra.mxu1 %v6012_v46  ;;  %3879 = vmatprep.subr.bf16.mxu0 %v5016_v1  ;;  %v708_v51 = vld [vmem:[%s5835_s4 + $0xbe8] sm:$0xff] }
 0x150   : > { %3939 = vmatpush1.bf16.msra.mxu1 %v5151_v63  ;;  %3864 = vmatprep.mubr.bf16.mxu1 %v6022_v58  ;;  %v832_v52 = vld [vmem:[%s5835_s4 + $0xfc8] sm:$0xff]  ;;  %v5111_v63 = vcombine.low %v712_v40, %v716_v41  ;;  %v5104_v1 = vcombine.high %v704_v50, %v708_v51 }
 0x151   : > { %3940 = vmatprep.subr.bf16.mxu1 %v5144_v2  ;;  %v836_v54 = vld [vmem:[%s5835_s4 + $0xfe8] sm:$0xff] }
 0x152   : > { %3880 = vmatpush1.bf16.msra.mxu0 %v5015_v14  ;;  %v5232_v2 = vcombine.high %v832_v52, %v836_v54  ;;  %v696_v3 = vld [vmem:[%s5835_s4 + $0xb88] sm:$0xff]  ;;  %v5103_v14 = vcombine.low %v704_v50, %v708_v51 }
 0x153   : > { %3881 = vmatprep.subr.bf16.mxu0 %v5008_v18  ;;  %v700_v4 = vld [vmem:[%s5835_s4 + $0xba8] sm:$0xff] }
 0x154   : > { %3941 = vmatpush1.bf16.msra.mxu1 %v5143_v17  ;;  %v824_v6 = vld [vmem:[%s5835_s4 + $0xf88] sm:$0xff]  ;;  %v5231_v17 = vcombine.low %v832_v52, %v836_v54  ;;  %v5096_v18 = vcombine.high %v696_v3, %v700_v4 }
 0x155   : > { %3942 = vmatprep.subr.bf16.mxu1 %v5136_v20  ;;  %3804 = vmatmul.mubr.bf16.gmra.mxu0 %v6030_v7  ;;  %v828_v10 = vld [vmem:[%s5835_s4 + $0xfa8] sm:$0xff] }
 0x156   : > { %3882 = vmatpush1.bf16.msra.mxu0 %v5007_v8  ;;  %3905 = vmatprep.mubr.bf16.mxu0 %v6051_v19  ;;  %v5224_v20 = vcombine.high %v824_v6, %v828_v10  ;;  %v688_v24 = vld [vmem:[%s5835_s4 + $0xb48] sm:$0xff]  ;;  %v5095_v8 = vcombine.low %v696_v3, %v700_v4 }
 0x157   : > { %3865 = vmatmul.mubr.bf16.gmra.mxu1 %v6039_v11  ;;  %3883 = vmatprep.subr.bf16.mxu0 %v5000_v30  ;;  %v692_v25 = vld [vmem:[%s5835_s4 + $0xb68] sm:$0xff] }
 0x158   : > { %3943 = vmatpush1.bf16.msra.mxu1 %v5135_v9  ;;  %3966 = vmatprep.mubr.bf16.mxu1 %v6058_v23  ;;  %v816_v27 = vld [vmem:[%s5835_s4 + $0xf48] sm:$0xff]  ;;  %v5223_v9 = vcombine.low %v824_v6, %v828_v10  ;;  %v5088_v30 = vcombine.high %v688_v24, %v692_v25 }
 0x159   : > { %3944 = vmatprep.subr.bf16.mxu1 %v5128_v31  ;;  %v820_v28 = vld [vmem:[%s5835_s4 + $0xf68] sm:$0xff] }
 0x15a   : > { %3884 = vmatpush1.bf16.msra.mxu0 %v4999_v60  ;;  %v5216_v31 = vcombine.high %v816_v27, %v820_v28  ;;  %v680_v55 = vld [vmem:[%s5835_s4 + $0xb08] sm:$0xff]  ;;  %v5087_v60 = vcombine.low %v688_v24, %v692_v25 }
 0x15b   : > { %3885 = vmatprep.subr.bf16.mxu0 %v4992_v35  ;;  %v684_v12 = vld [vmem:[%s5835_s4 + $0xb28] sm:$0xff] }
 0x15c   : > { %3945 = vmatpush1.bf16.msra.mxu1 %v5127_v61  ;;  %v808_v56 = vld [vmem:[%s5835_s4 + $0xf08] sm:$0xff]  ;;  %v5215_v61 = vcombine.low %v816_v27, %v820_v28  ;;  %v5080_v35 = vcombine.high %v680_v55, %v684_v12 }
 0x15d   : > { %3946 = vmatprep.subr.bf16.mxu1 %v5120_v36  ;;  %v812_v32 = vld [vmem:[%s5835_s4 + $0xf28] sm:$0xff] }
 0x15e   : > { %3886 = vmatpush1.bf16.msra.mxu0 %v4991_v44  ;;  %v5208_v36 = vcombine.high %v808_v56, %v812_v32  ;;  %v672_v38 = vld [vmem:[%s5835_s4 + $0xac8] sm:$0xff]  ;;  %v5079_v44 = vcombine.low %v680_v55, %v684_v12  ;;  %v385_v55 = vld [vmem:[%s5835_s4 + $0x1d0] sm:$0xff] }
 0x15f   : > { %3887 = vmatprep.subr.bf16.mxu0 %v4984_v47  ;;  %v676_v39 = vld [vmem:[%s5835_s4 + $0xae8] sm:$0xff]  ;;  %v389_v12 = vld [vmem:[%s5835_s4 + $0x1f0] sm:$0xff] }
 0x160   : > { %3947 = vmatpush1.bf16.msra.mxu1 %v5119_v45  ;;  %v800_v40 = vld [vmem:[%s5835_s4 + $0xec8] sm:$0xff]  ;;  %v5207_v45 = vcombine.low %v808_v56, %v812_v32  ;;  %v5072_v47 = vcombine.high %v672_v38, %v676_v39  ;;  %v513_v56 = vld [vmem:[%s5835_s4 + $0x5d0] sm:$0xff] }
 0x161   : > { %3948 = vmatprep.subr.bf16.mxu1 %v5112_v48  ;;  %v804_v41 = vld [vmem:[%s5835_s4 + $0xee8] sm:$0xff]  ;;  %v517_v32 = vld [vmem:[%s5835_s4 + $0x5f0] sm:$0xff] }
 0x162   : > { %3888 = vmatpush1.bf16.msra.mxu0 %v4983_v62  ;;  %v5200_v48 = vcombine.high %v800_v40, %v804_v41  ;;  %v664_v50 = vld [vmem:[%s5835_s4 + $0xa88] sm:$0xff]  ;;  %v5071_v62 = vcombine.low %v672_v38, %v676_v39  ;;  %v377_v38 = vld [vmem:[%s5835_s4 + $0x190] sm:$0xff] }
 0x163   : > { %3889 = vmatprep.subr.bf16.mxu0 %v5104_v1  ;;  %v668_v51 = vld [vmem:[%s5835_s4 + $0xaa8] sm:$0xff]  ;;  %v381_v39 = vld [vmem:[%s5835_s4 + $0x1b0] sm:$0xff] }
 0x164   : > { %3949 = vmatpush1.bf16.msra.mxu1 %v5111_v63  ;;  %v792_v52 = vld [vmem:[%s5835_s4 + $0xe88] sm:$0xff]  ;;  %v5199_v63 = vcombine.low %v800_v40, %v804_v41  ;;  %v5064_v1 = vcombine.high %v664_v50, %v668_v51  ;;  %v505_v40 = vld [vmem:[%s5835_s4 + $0x590] sm:$0xff] }
 0x165   : > { %3950 = vmatprep.subr.bf16.mxu1 %v5232_v2  ;;  %v796_v54 = vld [vmem:[%s5835_s4 + $0xea8] sm:$0xff]  ;;  %v509_v41 = vld [vmem:[%s5835_s4 + $0x5b0] sm:$0xff] }
 0x166   : > { %3890 = vmatpush2.bf16.msra.mxu0 %v5103_v14  ;;  %v5192_v2 = vcombine.high %v792_v52, %v796_v54  ;;  %v656_v3 = vld [vmem:[%s5835_s4 + $0xa48] sm:$0xff]  ;;  %v5063_v14 = vcombine.low %v664_v50, %v668_v51  ;;  %v369_v50 = vld [vmem:[%s5835_s4 + $0x150] sm:$0xff] }
 0x167   : > { %3891 = vmatprep.subr.bf16.mxu0 %v5096_v18  ;;  %v660_v4 = vld [vmem:[%s5835_s4 + $0xa68] sm:$0xff]  ;;  %v373_v51 = vld [vmem:[%s5835_s4 + $0x170] sm:$0xff] }
 0x168   : > { %3951 = vmatpush2.bf16.msra.mxu1 %v5231_v17  ;;  %v784_v6 = vld [vmem:[%s5835_s4 + $0xe48] sm:$0xff]  ;;  %v5191_v17 = vcombine.low %v792_v52, %v796_v54  ;;  %v5056_v18 = vcombine.high %v656_v3, %v660_v4  ;;  %v497_v54 = vld [vmem:[%s5835_s4 + $0x550] sm:$0xff] }
 0x169   : > { %3952 = vmatprep.subr.bf16.mxu1 %v5224_v20  ;;  %v788_v10 = vld [vmem:[%s5835_s4 + $0xe68] sm:$0xff] }
 0x16a   : > { %3892 = vmatpush2.bf16.msra.mxu0 %v5095_v8  ;;  %v5184_v20 = vcombine.high %v784_v6, %v788_v10  ;;  %v648_v24 = vld [vmem:[%s5835_s4 + $0xa08] sm:$0xff]  ;;  %v5055_v8 = vcombine.low %v656_v3, %v660_v4  ;;  %v4905_v3 = vcombine.low %v505_v40, %v509_v41  ;;  %v4770_v4 = vcombine.high %v369_v50, %v373_v51 }
 0x16b   : > { %3893 = vmatprep.subr.bf16.mxu0 %v5088_v30  ;;  %v652_v25 = vld [vmem:[%s5835_s4 + $0xa28] sm:$0xff] }
 0x16c   : > { %3953 = vmatpush2.bf16.msra.mxu1 %v5223_v9  ;;  %v776_v27 = vld [vmem:[%s5835_s4 + $0xe08] sm:$0xff]  ;;  %v5183_v9 = vcombine.low %v784_v6, %v788_v10  ;;  %v5048_v30 = vcombine.high %v648_v24, %v652_v25 }
 0x16d   : > { %3954 = vmatprep.subr.bf16.mxu1 %v5216_v31  ;;  %v780_v28 = vld [vmem:[%s5835_s4 + $0xe28] sm:$0xff] }
 0x16e   : > { %3894 = vmatpush2.bf16.msra.mxu0 %v5087_v60  ;;  %v5176_v31 = vcombine.high %v776_v27, %v780_v28  ;;  %v5047_v60 = vcombine.low %v648_v24, %v652_v25  ;;  %v493_v24 = vld [vmem:[%s5835_s4 + $0x530] sm:$0xff] }
 0x16f   : > { %3895 = vmatprep.subr.bf16.mxu0 %v5080_v35  ;;  %v4786_v35 = vcombine.high %v385_v55, %v389_v12 }
 0x170   : > { %3955 = vmatpush2.bf16.msra.mxu1 %v5215_v61  ;;  %v5175_v61 = vcombine.low %v776_v27, %v780_v28  ;;  %v4769_v27 = vcombine.low %v369_v50, %v373_v51 }
 0x171   : > { %3956 = vmatprep.subr.bf16.mxu1 %v5208_v36  ;;  %v4914_v36 = vcombine.high %v513_v56, %v517_v32 }
 0x172   : > { %3896 = vmatpush2.bf16.msra.mxu0 %v5079_v44  ;;  %v4785_v44 = vcombine.low %v385_v55, %v389_v12  ;;  %v353_v55 = vld [vmem:[%s5835_s4 + $0xd0] sm:$0xff] }
 0x173   : > { %3897 = vmatprep.subr.bf16.mxu0 %v5072_v47  ;;  %v4778_v47 = vcombine.high %v377_v38, %v381_v39  ;;  %v357_v12 = vld [vmem:[%s5835_s4 + $0xf0] sm:$0xff] }
 0x174   : > { %3957 = vmatpush2.bf16.msra.mxu1 %v5207_v45  ;;  %v4913_v45 = vcombine.low %v513_v56, %v517_v32  ;;  %v481_v56 = vld [vmem:[%s5835_s4 + $0x4d0] sm:$0xff]  ;;  %v4753_v51 = vcombine.low %v353_v55, %v357_v12 }
 0x175   : > { %3958 = vmatprep.subr.bf16.mxu1 %v5200_v48  ;;  %v4906_v48 = vcombine.high %v505_v40, %v509_v41  ;;  %v485_v32 = vld [vmem:[%s5835_s4 + $0x4f0] sm:$0xff] }
 0x176   : > { %3898 = vmatpush2.bf16.msra.mxu0 %v5071_v62  ;;  %v501_v62 = vld [vmem:[%s5835_s4 + $0x570] sm:$0xff]  ;;  %v4882_v40 = vcombine.high %v481_v56, %v485_v32 }
 0x177   : > { %3899 = vmatprep.subr.bf16.mxu0 %v5064_v1  ;;  %v4777_v1 = vcombine.low %v377_v38, %v381_v39  ;;  %v4898_v10 = vcombine.high %v497_v54, %v501_v62  ;;  %v4754_v38 = vcombine.high %v353_v55, %v357_v12  ;;  %v345_v41 = vld [vmem:[%s5835_s4 + $0x90] sm:$0xff] }
 0x178   : > { %3959 = vmatpush2.bf16.msra.mxu1 %v5199_v63 }
 0x179   : > { %3960 = vmatprep.subr.bf16.mxu1 %v5192_v2 }
 0x17a   : > { %3900 = vmatpush2.bf16.msra.mxu0 %v5063_v14  ;;  %v361_v14 = vld [vmem:[%s5835_s4 + $0x110] sm:$0xff] }
 0x17b   : > { %3901 = vmatprep.subr.bf16.mxu0 %v5056_v18 }
 0x17c   : > { %3961 = vmatpush2.bf16.msra.mxu1 %v5191_v17  ;;  %v365_v17 = vld [vmem:[%s5835_s4 + $0x130] sm:$0xff] }
 0x17d   : > { %3962 = vmatprep.subr.bf16.mxu1 %v5184_v20  ;;  %v489_v20 = vld [vmem:[%s5835_s4 + $0x510] sm:$0xff] }
 0x17e   : > { %3902 = vmatpush2.bf16.msra.mxu0 %v5055_v8  ;;  %v4897_v8 = vcombine.low %v497_v54, %v501_v62  ;;  %v4881_v62 = vcombine.low %v481_v56, %v485_v32  ;;  %v329_v32 = vld [vmem:[%s5835_s4 + $0x10] sm:$0xff] }
 0x17f   : > { %3903 = vmatprep.subr.bf16.mxu0 %v5048_v30 }
 0x180   : > { %3963 = vmatpush2.bf16.msra.mxu1 %v5183_v9  ;;  %v4762_v9 = vcombine.high %v361_v14, %v365_v17 }
 0x181   : > { %3964 = vmatprep.subr.bf16.mxu1 %v5176_v31  ;;  %v4890_v31 = vcombine.high %v489_v20, %v493_v24 }
 0x182   : > { %3904 = vmatpush2.bf16.msra.mxu0 %v5047_v60  ;;  %v6291_v52 = vpop.f32.mrf.mxu0 }
 0x183   : > { %3995 = vmatprep.subr.bf16.mxu0 %v4786_v35 }
 0x184   : > { %3965 = vmatpush2.bf16.msra.mxu1 %v5175_v61  ;;  %v6296_v63 = vpop.f32.mrf.mxu1  ;;  %v6299_v2 = vpop.f32.mrf.mxu0  ;;  %v4761_v61 = vcombine.low %v361_v14, %v365_v17  ;;  %v341_v14 = vld [vmem:[%s5835_s4 + $0x70] sm:$0xff] }
 0x185   : > { %4056 = vmatprep.subr.bf16.mxu1 %v4914_v36  ;;  %3906 = vmatmul.mubr.bf16.vlgmr.msra.gmra.mxu0 %v6108_v16  ;;  %v4889_v36 = vcombine.low %v489_v20, %v493_v24  ;;  %v465_v20 = vld [vmem:[%s5835_s4 + $0x450] sm:$0xff] }
 0x186   : > { %3996 = vmatpush1.bf16.msra.mxu0 %v4785_v44  ;;  %v6301_v6 = vpop.f32.mrf.mxu1  ;;  %3915 = vmatprep.mubr.bf16.mxu0 %v6119_v29  ;;  %v6306_v18 = vpop.f32.mrf.mxu0  ;;  %v349_v44 = vld [vmem:[%s5835_s4 + $0xb0] sm:$0xff] }
 0x187   : > { %3967 = vmatmul.mubr.bf16.vlgmr.msra.gmra.mxu1 %v6115_v21  ;;  %3997 = vmatprep.subr.bf16.mxu0 %v4778_v47  ;;  %v473_v47 = vld [vmem:[%s5835_s4 + $0x490] sm:$0xff] }
 0x188   : > { %4057 = vmatpush1.bf16.msra.mxu1 %v4913_v45  ;;  %3976 = vmatprep.mubr.bf16.mxu1 %v6126_v13  ;;  %v6311_v25 = vpop.f32.mrf.mxu1  ;;  %v6313_v28 = vpop.f32.mrf.mxu0  ;;  %v469_v24 = vld [vmem:[%s5835_s4 + $0x470] sm:$0xff] }
 0x189   : > { %4058 = vmatprep.subr.bf16.mxu1 %v4906_v48  ;;  %v477_v48 = vld [vmem:[%s5835_s4 + $0x4b0] sm:$0xff]  ;;  %v4866_v56 = vcombine.high %v465_v20, %v469_v24 }
 0x18a   : > { %3998 = vmatpush1.bf16.msra.mxu0 %v4777_v1  ;;  %v6315_v30 = vpop.f32.mrf.mxu1  ;;  %v4746_v1 = vcombine.high %v345_v41, %v349_v44 }
 0x18b   : > { %3999 = vmatprep.subr.bf16.mxu0 %v4770_v4  ;;  %v6322_v60 = vpop.f32.mrf.mxu0  ;;  %v4874_v4 = vcombine.high %v473_v47, %v477_v48 }
 0x18c   : > { %4059 = vmatpush1.bf16.msra.mxu1 %v4905_v3  ;;  %v6325_v35 = vpop.f32.mrf.mxu1 }
 0x18d   : > { %4060 = vmatprep.subr.bf16.mxu1 %v4898_v10  ;;  %3916 = vmatmul.mubr.bf16.gmra.mxu0 %v6132_v37  ;;  %v6327_v39 = vpop.f32.mrf.mxu0  ;;  %v337_v10 = vld [vmem:[%s5835_s4 + $0x50] sm:$0xff] }
 0x18e   : > { %4000 = vmatpush1.bf16.msra.mxu0 %v4769_v27  ;;  %3925 = vmatprep.mubr.bf16.mxu0 %v6141_v49  ;;  %v6332_v45 = vpop.f32.mrf.mxu1  ;;  %v4738_v55 = vcombine.high %v337_v10, %v341_v14 }
 0x18f   : > { %3977 = vmatmul.mubr.bf16.gmra.mxu1 %v6138_v42  ;;  %4001 = vmatprep.subr.bf16.mxu0 %v4762_v9  ;;  %v6337_v50 = vpop.f32.mrf.mxu0 }
 0x190   : > { %4061 = vmatpush1.bf16.msra.mxu1 %v4897_v8  ;;  %3986 = vmatprep.mubr.bf16.mxu1 %v6148_v57  ;;  %v6339_v54 = vpop.f32.mrf.mxu1  ;;  %v4745_v8 = vcombine.low %v345_v41, %v349_v44  ;;  %v4737_v44 = vcombine.low %v337_v10, %v341_v14 }
 0x191   : > { %4062 = vmatprep.subr.bf16.mxu1 %v4890_v31  ;;  %v6341_v3 = vpop.f32.mrf.mxu0  ;;  %v4873_v31 = vcombine.low %v473_v47, %v477_v48  ;;  %v4865_v48 = vcombine.low %v465_v20, %v469_v24  ;;  %v441_v24 = vld [vmem:[%s5835_s4 + $0x390] sm:$0xff] }
 0x192   : > { %4002 = vmatpush1.bf16.msra.mxu0 %v4761_v61  ;;  %v6345_v17 = vpop.f32.mrf.mxu1  ;;  %v333_v61 = vld [vmem:[%s5835_s4 + $0x30] sm:$0xff] }
 0x193   : > { %4003 = vmatprep.subr.bf16.mxu0 %v4754_v38  ;;  %v457_v38 = vld [vmem:[%s5835_s4 + $0x410] sm:$0xff] }
 0x194   : > { %4063 = vmatpush1.bf16.msra.mxu1 %v4889_v36  ;;  %v6350_v27 = vpop.f32.mrf.mxu0  ;;  %v6353_v9 = vpop.f32.mrf.mxu1 }
 0x195   : > { %4064 = vmatprep.subr.bf16.mxu1 %v4882_v40  ;;  %3926 = vmatmul.mubr.bf16.gmra.mxu0 %v6154_v5  ;;  %v461_v40 = vld [vmem:[%s5835_s4 + $0x430] sm:$0xff] }
 0x196   : > { %4004 = vmatpush1.bf16.msra.mxu0 %v4753_v51  ;;  %v6355_v12 = vpop.f32.mrf.mxu0  ;;  %v6359_v36 = vpop.f32.mrf.mxu1  ;;  %4027 = vmatprep.mubr.bf16.mxu0 %v5925_v59  ;;  %v4730_v51 = vcombine.high %v329_v32, %v333_v61  ;;  %v453_v59 = vld [vmem:[%s5835_s4 + $0x3f0] sm:$0xff]  ;;  %v4857_v10 = vcombine.low %v457_v38, %v461_v40 }
 0x197   : > { %3987 = vmatmul.mubr.bf16.gmra.mxu1 %v6159_v15  ;;  %4005 = vmatprep.subr.bf16.mxu0 %v4746_v1  ;;  %v4858_v1 = vcombine.high %v457_v38, %v461_v40  ;;  %v577_v15 = vld [vmem:[%s5835_s4 + $0x7d0] sm:$0xff] }
 0x198   : > { %4065 = vmatpush1.bf16.msra.mxu1 %v4881_v62  ;;  %v3565_v41 = vpop.f32.mrf.mxu0  ;;  %4088 = vmatprep.mubr.bf16.mxu1 %v5937_v0  ;;  %v3626_v47 = vpop.f32.mrf.mxu1  ;;  %v581_v5 = vld [vmem:[%s5835_s4 + $0x7f0] sm:$0xff] }
 0x199   : > { %4066 = vmatprep.subr.bf16.mxu1 %v4874_v4  ;;  %v449_v4 = vld [vmem:[%s5835_s4 + $0x3d0] sm:$0xff]  ;;  %v4978_v20 = vcombine.high %v577_v15, %v581_v5 }
 0x19a   : > { %4006 = vmatpush1.bf16.msra.mxu0 %v4745_v8  ;;  %v3566_v62 = vpop.f32.mrf.mxu0  ;;  %v3627_v41 = vpop.f32.mrf.mxu1  ;;  %v4729_v8 = vcombine.low %v329_v32, %v333_v61  ;;  %v4850_v14 = vcombine.high %v449_v4, %v453_v59  ;;  %v4849_v47 = vcombine.low %v449_v4, %v453_v59  ;;  %v433_v38 = vld [vmem:[%s5835_s4 + $0x350] sm:$0xff] }
 0x19b   : > { %4007 = vmatprep.subr.bf16.mxu0 %v4738_v55  ;;  %v569_v55 = vld [vmem:[%s5835_s4 + $0x790] sm:$0xff] }
 0x19c   : > { %4067 = vmatpush1.bf16.msra.mxu1 %v4873_v31  ;;  %v445_v31 = vld [vmem:[%s5835_s4 + $0x3b0] sm:$0xff] }
 0x19d   : > { %4068 = vmatprep.subr.bf16.mxu1 %v4866_v56  ;;  %v573_v56 = vld [vmem:[%s5835_s4 + $0x7b0] sm:$0xff]  ;;  %v4842_v32 = vcombine.high %v441_v24, %v445_v31  ;;  %v4841_v62 = vcombine.low %v441_v24, %v445_v31 }
 0x19e   : > { %4008 = vmatpush1.bf16.msra.mxu0 %v4737_v44  ;;  %v4977_v44 = vcombine.low %v577_v15, %v581_v5  ;;  %v4970_v61 = vcombine.high %v569_v55, %v573_v56  ;;  %v437_v40 = vld [vmem:[%s5835_s4 + $0x370] sm:$0xff] }
 0x19f   : > { %4009 = vmatprep.subr.bf16.mxu0 %v4730_v51  ;;  %v565_v51 = vld [vmem:[%s5835_s4 + $0x770] sm:$0xff]  ;;  %v4834_v59 = vcombine.high %v433_v38, %v437_v40 }
 0x1a0   : > { %4069 = vmatpush1.bf16.msra.mxu1 %v4865_v48  ;;  %v561_v48 = vld [vmem:[%s5835_s4 + $0x750] sm:$0xff] }
 0x1a1   : > { %4070 = vmatprep.subr.bf16.mxu1 %v4858_v1  ;;  %v4969_v1 = vcombine.low %v569_v55, %v573_v56  ;;  %v4962_v5 = vcombine.high %v561_v48, %v565_v51  ;;  %v425_v15 = vld [vmem:[%s5835_s4 + $0x310] sm:$0xff] }
 0x1a2   : > { %4010 = vmatpush1.bf16.msra.mxu0 %v4729_v8  ;;  %v429_v4 = vld [vmem:[%s5835_s4 + $0x330] sm:$0xff] }
 0x1a3   : > { %4011 = vmatprep.subr.bf16.mxu0 %v4850_v14  ;;  %v553_v41 = vld [vmem:[%s5835_s4 + $0x710] sm:$0xff]  ;;  %v4961_v14 = vcombine.low %v561_v48, %v565_v51 }
 0x1a4   : > { %4071 = vmatpush1.bf16.msra.mxu1 %v4857_v10  ;;  %v557_v8 = vld [vmem:[%s5835_s4 + $0x730] sm:$0xff]  ;;  %v4833_v10 = vcombine.low %v433_v38, %v437_v40 }
 0x1a5   : > { %4072 = vmatprep.subr.bf16.mxu1 %v4978_v20  ;;  %v4826_v20 = vcombine.high %v425_v15, %v429_v4  ;;  %v4954_v24 = vcombine.high %v553_v41, %v557_v8  ;;  %v417_v31 = vld [vmem:[%s5835_s4 + $0x2d0] sm:$0xff] }
 0x1a6   : > { %4012 = vmatpush2.bf16.msra.mxu0 %v4849_v47  ;;  %v421_v55 = vld [vmem:[%s5835_s4 + $0x2f0] sm:$0xff] }
 0x1a7   : > { %4013 = vmatprep.subr.bf16.mxu0 %v4842_v32  ;;  %v545_v56 = vld [vmem:[%s5835_s4 + $0x6d0] sm:$0xff]  ;;  %v4953_v32 = vcombine.low %v553_v41, %v557_v8 }
 0x1a8   : > { %4073 = vmatpush2.bf16.msra.mxu1 %v4977_v44  ;;  %v549_v47 = vld [vmem:[%s5835_s4 + $0x6f0] sm:$0xff]  ;;  %v4825_v44 = vcombine.low %v425_v15, %v429_v4 }
 0x1a9   : > { %4074 = vmatprep.subr.bf16.mxu1 %v4970_v61  ;;  %v4818_v61 = vcombine.high %v417_v31, %v421_v55  ;;  %v4946_v38 = vcombine.high %v545_v56, %v549_v47  ;;  %v409_v40 = vld [vmem:[%s5835_s4 + $0x290] sm:$0xff] }
 0x1aa   : > { %4014 = vmatpush2.bf16.msra.mxu0 %v4841_v62  ;;  %v413_v48 = vld [vmem:[%s5835_s4 + $0x2b0] sm:$0xff] }
 0x1ab   : > { %4015 = vmatprep.subr.bf16.mxu0 %v4834_v59  ;;  %v537_v51 = vld [vmem:[%s5835_s4 + $0x690] sm:$0xff]  ;;  %v4945_v59 = vcombine.low %v545_v56, %v549_v47 }
 0x1ac   : > { %4075 = vmatpush2.bf16.msra.mxu1 %v4969_v1  ;;  %v541_v62 = vld [vmem:[%s5835_s4 + $0x6b0] sm:$0xff]  ;;  %v4817_v1 = vcombine.low %v417_v31, %v421_v55 }
 0x1ad   : > { %4076 = vmatprep.subr.bf16.mxu1 %v4962_v5  ;;  %v4810_v5 = vcombine.high %v409_v40, %v413_v48  ;;  %v4938_v15 = vcombine.high %v537_v51, %v541_v62  ;;  %v401_v4 = vld [vmem:[%s5835_s4 + $0x250] sm:$0xff] }
 0x1ae   : > { %4016 = vmatpush2.bf16.msra.mxu0 %v4833_v10  ;;  %v405_v41 = vld [vmem:[%s5835_s4 + $0x270] sm:$0xff] }
 0x1af   : > { %4017 = vmatprep.subr.bf16.mxu0 %v4826_v20  ;;  %v529_v8 = vld [vmem:[%s5835_s4 + $0x650] sm:$0xff]  ;;  %v4937_v20 = vcombine.low %v537_v51, %v541_v62 }
 0x1b0   : > { %4077 = vmatpush2.bf16.msra.mxu1 %v4961_v14  ;;  %v533_v10 = vld [vmem:[%s5835_s4 + $0x670] sm:$0xff]  ;;  %v4809_v14 = vcombine.low %v409_v40, %v413_v48 }
 0x1b1   : > { %4078 = vmatprep.subr.bf16.mxu1 %v4954_v24  ;;  %v4802_v24 = vcombine.high %v401_v4, %v405_v41  ;;  %v4930_v31 = vcombine.high %v529_v8, %v533_v10  ;;  %v393_v55 = vld [vmem:[%s5835_s4 + $0x210] sm:$0xff] }
 0x1b2   : > { %4018 = vmatpush2.bf16.msra.mxu0 %v4825_v44  ;;  %v397_v56 = vld [vmem:[%s5835_s4 + $0x230] sm:$0xff] }
 0x1b3   : > { %4019 = vmatprep.subr.bf16.mxu0 %v4818_v61  ;;  %v521_v47 = vld [vmem:[%s5835_s4 + $0x610] sm:$0xff]  ;;  %v4929_v61 = vcombine.low %v529_v8, %v533_v10 }
 0x1b4   : > { %4079 = vmatpush2.bf16.msra.mxu1 %v4953_v32  ;;  %v525_v44 = vld [vmem:[%s5835_s4 + $0x630] sm:$0xff]  ;;  %v4801_v32 = vcombine.low %v401_v4, %v405_v41 }
 0x1b5   : > { %4080 = vmatprep.subr.bf16.mxu1 %v4946_v38  ;;  %v4794_v38 = vcombine.high %v393_v55, %v397_v56  ;;  %v4922_v40 = vcombine.high %v521_v47, %v525_v44  ;;  %v641_v48 = vld [vmem:[%s5835_s4 + $0x9d0] sm:$0xff] }
 0x1b6   : > { %4020 = vmatpush2.bf16.msra.mxu0 %v4817_v1  ;;  %v645_v51 = vld [vmem:[%s5835_s4 + $0x9f0] sm:$0xff] }
 0x1b7   : > { %4021 = vmatprep.subr.bf16.mxu0 %v4810_v5  ;;  %v769_v62 = vld [vmem:[%s5835_s4 + $0xdd0] sm:$0xff]  ;;  %v4921_v5 = vcombine.low %v521_v47, %v525_v44 }
 0x1b8   : > { %4081 = vmatpush2.bf16.msra.mxu1 %v4945_v59  ;;  %v773_v1 = vld [vmem:[%s5835_s4 + $0xdf0] sm:$0xff]  ;;  %v4793_v59 = vcombine.low %v393_v55, %v397_v56  ;;  %v3603_v56 = vadd.f32 %v6296_v63, %v6291_v52  ;;  %v267_v63 = vld [vmem:[%s5844_s6] sm:$0xff] }
 0x1b9   : > { %4082 = vmatprep.subr.bf16.mxu1 %v4938_v15  ;;  %v5042_v15 = vcombine.high %v641_v48, %v645_v51  ;;  %v5170_v4 = vcombine.high %v769_v62, %v773_v1  ;;  %v633_v41 = vld [vmem:[%s5835_s4 + $0x990] sm:$0xff] }
 0x1ba   : > { %4022 = vmatpush2.bf16.msra.mxu0 %v4809_v14  ;;  %v637_v8 = vld [vmem:[%s5835_s4 + $0x9b0] sm:$0xff] }
 0x1bb   : > { %4023 = vmatprep.subr.bf16.mxu0 %v4802_v24  ;;  %v761_v10 = vld [vmem:[%s5835_s4 + $0xd90] sm:$0xff]  ;;  %v5169_v24 = vcombine.low %v769_v62, %v773_v1  ;;  %v5033_v52 = vcombine.low %v633_v41, %v637_v8 }
 0x1bc   : > { %4083 = vmatpush2.bf16.msra.mxu1 %v4937_v20  ;;  %v765_v14 = vld [vmem:[%s5835_s4 + $0xdb0] sm:$0xff]  ;;  %v5041_v20 = vcombine.low %v641_v48, %v645_v51 }
 0x1bd   : > { %4084 = vmatprep.subr.bf16.mxu1 %v4930_v31  ;;  %v5034_v31 = vcombine.high %v633_v41, %v637_v8  ;;  %v6406_v55 = vld [vmem:[%s5835_s4 + $0x950] sm:$0xff]  ;;  %v5162_v47 = vcombine.high %v761_v10, %v765_v14  ;;  %v5161_v1 = vcombine.low %v761_v10, %v765_v14  ;;  %v268_v14 = vld [vmem:[%s5844_s6 + $0x8] sm:$0xff] }
 0x1be   : > { %4024 = vmatpush2.bf16.msra.mxu0 %v4801_v32  ;;  %v6411_v44 = vld [vmem:[%s5835_s4 + $0x970] sm:$0xff] }
 0x1bf   : > { %4025 = vmatprep.subr.bf16.mxu0 %v4794_v38  ;;  %v6414_v32 = vld [vmem:[%s5835_s4 + $0xd50] sm:$0xff] }
 0x1c0   : > { %4085 = vmatpush2.bf16.msra.mxu1 %v4929_v61  ;;  %v6417_v61 = vld [vmem:[%s5835_s4 + $0xd70] sm:$0xff] }
 0x1c1   : > { %4086 = vmatprep.subr.bf16.mxu1 %v4922_v40  ;;  %v3605_v40 = vadd.f32 %v6301_v6, %v6299_v2  ;;  %v5154_v2 = vcombine.high %v6414_v32, %v6417_v61  ;;  %v6429_v6 = vld [vmem:[%s5835_s4 + $0x910] sm:$0xff] }
 0x1c2   : > { %4026 = vmatpush2.bf16.msra.mxu0 %v4793_v59  ;;  %v5026_v59 = vcombine.high %v6406_v55, %v6411_v44  ;;  %v6434_v8 = vld [vmem:[%s5835_s4 + $0x930] sm:$0xff] }
 0x1c3   : > { %4117 = vmatprep.subr.bf16.mxu0 %v5042_v15  ;;  %v6440_v10 = vld [vmem:[%s5835_s4 + $0xd30] sm:$0xff] }
 0x1c4   : > { %4087 = vmatpush2.bf16.msra.mxu1 %v4921_v5  ;;  %v3607_v5 = vadd.f32 %v6311_v25, %v6306_v18  ;;  %v3609_v18 = vadd.f32 %v6315_v30, %v6313_v28  ;;  %v6457_v30 = vld [vmem:[%s5835_s4 + $0x8d0] sm:$0xff] }
 0x1c5   : > { %4178 = vmatprep.subr.bf16.mxu1 %v5170_v4  ;;  %v3663_v38 = vpop.f32.mrf.mxu0  ;;  %4028 = vmatmul.mubr.bf16.vlgmr.msra.gmra.mxu0 %v5982_v22 }
 0x1c6   : > { %v3664_v48 = vadd.f32 %v3663_v38, %v3603_v56  ;;  %4118 = vmatpush1.bf16.msra.mxu0 %v5041_v20  ;;  %v6437_v20 = vld [vmem:[%s5835_s4 + $0xd10] sm:$0xff]  ;;  %4037 = vmatprep.mubr.bf16.mxu0 %v5995_v33 }
 0x1c7   : > { %v3724_v51 = vpop.f32.mrf.mxu1  ;;  %4089 = vmatmul.mubr.bf16.vlgmr.msra.gmra.mxu1 %v5989_v26  ;;  %v3665_v62 = vpop.f32.mrf.mxu0  ;;  %4119 = vmatprep.subr.bf16.mxu0 %v5034_v31  ;;  %v5025_v31 = vcombine.low %v6406_v55, %v6411_v44  ;;  %v5153_v55 = vcombine.low %v6414_v32, %v6417_v61  ;;  %v5018_v44 = vcombine.high %v6429_v6, %v6434_v8  ;;  %v6466_v32 = vld [vmem:[%s5835_s4 + $0xcd0] sm:$0xff] }
 0x1c8   : > { %4179 = vmatpush1.bf16.msra.mxu1 %v5169_v24  ;;  %v3725_v15 = vadd.f32 %v3724_v51, %v3664_v48  ;;  %v3666_v4 = vadd.f32 %v3665_v62, %v3605_v40  ;;  %4098 = vmatprep.mubr.bf16.mxu1 %v6000_v34  ;;  %v275_v40 = vld [vmem:[%s5844_s6 + $0x40] sm:$0xff]  ;;  %v5146_v28 = vcombine.high %v6437_v20, %v6440_v10  ;;  %v6469_v61 = vld [vmem:[%s5835_s4 + $0xcf0] sm:$0xff] }
 0x1c9   : > { %v3726_v41 = vpop.f32.mrf.mxu1  ;;  %4180 = vmatprep.subr.bf16.mxu1 %v5162_v47  ;;  %v3667_v24 = vpop.f32.mrf.mxu0  ;;  %v3613_v51 = vadd.f32 %v6325_v35, %v6322_v60  ;;  %v5017_v60 = vcombine.low %v6429_v6, %v6434_v8  ;;  %v5145_v35 = vcombine.low %v6437_v20, %v6440_v10  ;;  %v283_v6 = vld [vmem:[%s5844_s6 + $0x80] sm:$0xff]  ;;  %v5138_v20 = vcombine.high %v6466_v32, %v6469_v61  ;;  %v6489_v10 = vld [vmem:[%s5835_s4 + $0x890] sm:$0xff] }
 0x1ca   : > { %v4483_v25 = vadd.f32 %v3725_v15, %v267_v63  ;;  %v3727_v56 = vadd.f32 %v3726_v41, %v3666_v4  ;;  %v3668_v47 = vadd.f32 %v3667_v24, %v3607_v5  ;;  %4120 = vmatpush1.bf16.msra.mxu0 %v5033_v52  ;;  %v3615_v5 = vadd.f32 %v6332_v45, %v6327_v39  ;;  %v276_v15 = vld [vmem:[%s5844_s6 + $0x48] sm:$0xff] }
 0x1cb   : > { %v3728_v38 = vpop.f32.mrf.mxu1  ;;  %v3669_v48 = vpop.f32.mrf.mxu0  ;;  %4121 = vmatprep.subr.bf16.mxu0 %v5026_v59  ;;  %v6463_v59 = vld [vmem:[%s5835_s4 + $0x8f0] sm:$0xff]  ;;  %v3617_v39 = vadd.f32 %v6339_v54, %v6337_v50 }
 0x1cc   : > { %4181 = vmatpush1.bf16.msra.mxu1 %v5161_v1  ;;  %4523 = vst [vmem:[%s5844_s6] sm:$0xff] %v4483_v25  ;;  %v4484_v52 = vadd.f32 %v3727_v56, %v268_v14  ;;  %v3729_v63 = vadd.f32 %v3728_v38, %v3668_v47  ;;  %v3670_v62 = vadd.f32 %v3669_v48, %v3609_v18  ;;  %v6493_v54 = vld [vmem:[%s5835_s4 + $0x8b0] sm:$0xff] }
 0x1cd   : > { %v3730_v1 = vpop.f32.mrf.mxu1  ;;  %4182 = vmatprep.subr.bf16.mxu1 %v5154_v2  ;;  %v3673_v4 = vpop.f32.mrf.mxu0  ;;  %4038 = vmatmul.mubr.bf16.gmra.mxu0 %v6009_v43  ;;  %v5010_v8 = vcombine.high %v6457_v30, %v6463_v59  ;;  %v6496_v56 = vld [vmem:[%s5835_s4 + $0xc90] sm:$0xff]  ;;  %v5009_v48 = vcombine.low %v6457_v30, %v6463_v59  ;;  %v5137_v30 = vcombine.low %v6466_v32, %v6469_v61 }
 0x1ce   : > { %4524 = vst [vmem:[%s5844_s6 + $0x8] sm:$0xff] %v4484_v52  ;;  %v4491_v2 = vadd.f32 %v3729_v63, %v275_v40  ;;  %v3731_v41 = vadd.f32 %v3730_v1, %v3670_v62  ;;  %v3674_v14 = vadd.f32 %v3673_v4, %v3613_v51  ;;  %4122 = vmatpush1.bf16.msra.mxu0 %v5025_v31  ;;  %v6499_v47 = vld [vmem:[%s5835_s4 + $0xcb0] sm:$0xff]  ;;  %v284_v40 = vld [vmem:[%s5844_s6 + $0x88] sm:$0xff]  ;;  %v291_v62 = vld [vmem:[%s5844_s6 + $0xc0] sm:$0xff] }
 0x1cf   : > { %v3734_v24 = vpop.f32.mrf.mxu1  ;;  %4099 = vmatmul.mubr.bf16.gmra.mxu1 %v6012_v46  ;;  %v3675_v45 = vpop.f32.mrf.mxu0  ;;  %4123 = vmatprep.subr.bf16.mxu0 %v5018_v44  ;;  %v6517_v1 = vld [vmem:[%s5835_s4 + $0x850] sm:$0xff]  ;;  %v3623_v59 = vadd.f32 %v6353_v9, %v6350_v27 }
 0x1d0   : > { %4183 = vmatpush1.bf16.msra.mxu1 %v5153_v55  ;;  %4531 = vst [vmem:[%s5844_s6 + $0x40] sm:$0xff] %v4491_v2  ;;  %v4492_v31 = vadd.f32 %v3731_v41, %v276_v15  ;;  %v3676_v18 = vadd.f32 %v3675_v45, %v3615_v5  ;;  %v3735_v25 = vadd.f32 %v3734_v24, %v3674_v14  ;;  %v597_v32 = vld [vmem:[%s5835_s4 + $0x870] sm:$0xff]  ;;  %v292_v14 = vld [vmem:[%s5844_s6 + $0xc8] sm:$0xff] }
 0x1d1   : > { %v3736_v50 = vpop.f32.mrf.mxu1  ;;  %4184 = vmatprep.subr.bf16.mxu1 %v5146_v28  ;;  %4047 = vmatprep.mubr.bf16.mxu0 %v6017_v53  ;;  %v3677_v38 = vpop.f32.mrf.mxu0  ;;  %v3619_v55 = vadd.f32 %v6345_v17, %v6341_v3  ;;  %v5002_v3 = vcombine.high %v6489_v10, %v6493_v54  ;;  %v5130_v17 = vcombine.high %v6496_v56, %v6499_v47  ;;  %v721_v61 = vld [vmem:[%s5835_s4 + $0xc50] sm:$0xff] }
 0x1d2   : > { %4108 = vmatprep.mubr.bf16.mxu1 %v6022_v58  ;;  %4532 = vst [vmem:[%s5844_s6 + $0x48] sm:$0xff] %v4492_v31  ;;  %v4499_v44 = vadd.f32 %v3735_v25, %v283_v6  ;;  %v3678_v28 = vadd.f32 %v3677_v38, %v3617_v39  ;;  %v3737_v51 = vadd.f32 %v3736_v50, %v3676_v18  ;;  %v585_v50 = vld [vmem:[%s5835_s4 + $0x810] sm:$0xff]  ;;  %v300_v38 = vld [vmem:[%s5844_s6 + $0x108] sm:$0xff] }
 0x1d3   : > { %4124 = vmatpush1.bf16.msra.mxu0 %v5017_v60  ;;  %v3738_v52 = vpop.f32.mrf.mxu1  ;;  %v3679_v63 = vpop.f32.mrf.mxu0  ;;  %v3625_v2 = vadd.f32 %v6359_v36, %v6355_v12  ;;  %v5001_v24 = vcombine.low %v6489_v10, %v6493_v54  ;;  %v299_v36 = vld [vmem:[%s5844_s6 + $0x100] sm:$0xff]  ;;  %v5129_v6 = vcombine.low %v6496_v56, %v6499_v47  ;;  %v589_v54 = vld [vmem:[%s5835_s4 + $0x830] sm:$0xff] }
 0x1d4   : > { %4185 = vmatpush1.bf16.msra.mxu1 %v5145_v35  ;;  %4125 = vmatprep.subr.bf16.mxu0 %v5010_v8  ;;  %4539 = vst [vmem:[%s5844_s6 + $0x80] sm:$0xff] %v4499_v44  ;;  %v4500_v5 = vadd.f32 %v3737_v51, %v284_v40  ;;  %v3680_v15 = vadd.f32 %v3679_v63, %v3619_v55  ;;  %v725_v35 = vld [vmem:[%s5835_s4 + $0xc70] sm:$0xff] }
 0x1d5   : > { %v3739_v4 = vadd.f32 %v3738_v52, %v3678_v28  ;;  %v3740_v60 = vpop.f32.mrf.mxu1  ;;  %4186 = vmatprep.subr.bf16.mxu1 %v5138_v20  ;;  %v3683_v41 = vpop.f32.mrf.mxu0  ;;  %4048 = vmatmul.mubr.bf16.gmra.mxu0 %v6030_v7  ;;  %v4994_v8 = vcombine.high %v6517_v1, %v597_v32  ;;  %v5122_v20 = vcombine.high %v721_v61, %v725_v35  ;;  %v713_v40 = vld [vmem:[%s5835_s4 + $0xc10] sm:$0xff] }
 0x1d6   : > { %4540 = vst [vmem:[%s5844_s6 + $0x88] sm:$0xff] %v4500_v5  ;;  %v3684_v9 = vadd.f32 %v3683_v41, %v3623_v59  ;;  %v3741_v39 = vadd.f32 %v3740_v60, %v3680_v15  ;;  %4149 = vmatprep.mubr.bf16.mxu0 %v6051_v19  ;;  %v4993_v44 = vcombine.low %v6517_v1, %v597_v32  ;;  %v833_v5 = vld [vmem:[%s5835_s4 + $0xfd0] sm:$0xff] }
 0x1d7   : > { %v4507_v27 = vadd.f32 %v3739_v4, %v291_v62  ;;  %4126 = vmatpush1.bf16.msra.mxu0 %v5009_v48  ;;  %v3744_v45 = vpop.f32.mrf.mxu1  ;;  %4109 = vmatmul.mubr.bf16.gmra.mxu1 %v6039_v11  ;;  %v3685_v12 = vpop.f32.mrf.mxu0  ;;  %v717_v48 = vld [vmem:[%s5835_s4 + $0xc30] sm:$0xff]  ;;  %v5121_v51 = vcombine.low %v721_v61, %v725_v35  ;;  %v4986_v52 = vcombine.high %v585_v50, %v589_v54 }
 0x1d8   : > { %4187 = vmatpush1.bf16.msra.mxu1 %v5137_v30  ;;  %4127 = vmatprep.subr.bf16.mxu0 %v5002_v3  ;;  %v4508_v10 = vadd.f32 %v3741_v39, %v292_v14  ;;  %v3686_v31 = vadd.f32 %v3685_v12, %v3625_v2  ;;  %v3745_v18 = vadd.f32 %v3744_v45, %v3684_v9  ;;  %v705_v3 = vld [vmem:[%s5835_s4 + $0xbd0] sm:$0xff] }
 0x1d9   : > { %4547 = vst [vmem:[%s5844_s6 + $0xc0] sm:$0xff] %v4507_v27  ;;  %v3746_v25 = vpop.f32.mrf.mxu1  ;;  %4188 = vmatprep.subr.bf16.mxu1 %v5130_v17  ;;  %v3687_v55 = vpop.f32.mrf.mxu0  ;;  %4210 = vmatprep.mubr.bf16.mxu1 %v6058_v23  ;;  %v5114_v30 = vcombine.high %v713_v40, %v717_v48  ;;  %v709_v17 = vld [vmem:[%s5835_s4 + $0xbf0] sm:$0xff]  ;;  %v4985_v15 = vcombine.low %v585_v50, %v589_v54 }
 0x1da   : > { %4548 = vst [vmem:[%s5844_s6 + $0xc8] sm:$0xff] %v4508_v10  ;;  %v4515_v56 = vadd.f32 %v3745_v18, %v299_v36  ;;  %v3747_v47 = vadd.f32 %v3746_v25, %v3686_v31  ;;  %v837_v1 = vld [vmem:[%s5835_s4 + $0xff0] sm:$0xff]  ;;  %v5113_v4 = vcombine.low %v713_v40, %v717_v48  ;;  %v5106_v60 = vcombine.high %v705_v3, %v709_v17 }
 0x1db   : > { %4128 = vmatpush1.bf16.msra.mxu0 %v5001_v24  ;;  %v3748_v28 = vpop.f32.mrf.mxu1  ;;  %v3688_v63 = vpop.f32.mrf.mxu0  ;;  %v5234_v32 = vcombine.high %v833_v5, %v837_v1  ;;  %v697_v61 = vld [vmem:[%s5835_s4 + $0xb90] sm:$0xff]  ;;  %v5105_v14 = vcombine.low %v705_v3, %v709_v17  ;;  %v5233_v24 = vcombine.low %v833_v5, %v837_v1 }
 0x1dc   : > { %4189 = vmatpush1.bf16.msra.mxu1 %v5129_v6  ;;  %4129 = vmatprep.subr.bf16.mxu0 %v4994_v8  ;;  %4555 = vst [vmem:[%s5844_s6 + $0x100] sm:$0xff] %v4515_v56  ;;  %v4516_v62 = vadd.f32 %v3747_v47, %v300_v38  ;;  %v701_v35 = vld [vmem:[%s5835_s4 + $0xbb0] sm:$0xff] }
 0x1dd   : > { %4190 = vmatprep.subr.bf16.mxu1 %v5122_v20  ;;  %v3749_v59 = vpop.f32.mrf.mxu1  ;;  %v825_v2 = vld [vmem:[%s5835_s4 + $0xf90] sm:$0xff]  ;;  %v5098_v27 = vcombine.high %v697_v61, %v701_v35  ;;  %v5097_v6 = vcombine.low %v697_v61, %v701_v35 }
 0x1de   : > { %4556 = vst [vmem:[%s5844_s6 + $0x108] sm:$0xff] %v4516_v62  ;;  %v829_v41 = vld [vmem:[%s5835_s4 + $0xfb0] sm:$0xff] }
 0x1df   : > { %4130 = vmatpush1.bf16.msra.mxu0 %v4993_v44  ;;  %v5226_v9 = vcombine.high %v825_v2, %v829_v41  ;;  %v689_v39 = vld [vmem:[%s5835_s4 + $0xb50] sm:$0xff]  ;;  %v5225_v8 = vcombine.low %v825_v2, %v829_v41 }
 0x1e0   : > { %4191 = vmatpush1.bf16.msra.mxu1 %v5121_v51  ;;  %4131 = vmatprep.subr.bf16.mxu0 %v4986_v52  ;;  %v693_v45 = vld [vmem:[%s5835_s4 + $0xb70] sm:$0xff] }
 0x1e1   : > { %4192 = vmatprep.subr.bf16.mxu1 %v5114_v30  ;;  %v817_v12 = vld [vmem:[%s5835_s4 + $0xf50] sm:$0xff]  ;;  %v5090_v20 = vcombine.high %v689_v39, %v693_v45  ;;  %v5089_v54 = vcombine.low %v689_v39, %v693_v45 }
 0x1e2   : > { %v821_v36 = vld [vmem:[%s5835_s4 + $0xf70] sm:$0xff] }
 0x1e3   : > { %4132 = vmatpush1.bf16.msra.mxu0 %v4985_v15  ;;  %v5218_v10 = vcombine.high %v817_v12, %v821_v36  ;;  %v681_v31 = vld [vmem:[%s5835_s4 + $0xb10] sm:$0xff]  ;;  %v5217_v38 = vcombine.low %v817_v12, %v821_v36 }
 0x1e4   : > { %4193 = vmatpush1.bf16.msra.mxu1 %v5113_v4  ;;  %4133 = vmatprep.subr.bf16.mxu0 %v5106_v60  ;;  %v685_v18 = vld [vmem:[%s5835_s4 + $0xb30] sm:$0xff] }
 0x1e5   : > { %4194 = vmatprep.subr.bf16.mxu1 %v5234_v32  ;;  %v809_v25 = vld [vmem:[%s5835_s4 + $0xf10] sm:$0xff]  ;;  %v5082_v40 = vcombine.high %v681_v31, %v685_v18  ;;  %v5081_v28 = vcombine.low %v681_v31, %v685_v18  ;;  %v518_v31 = vld [vmem:[%s5835_s4 + $0x5f8] sm:$0xff] }
 0x1e6   : > { %v813_v50 = vld [vmem:[%s5835_s4 + $0xf30] sm:$0xff] }
 0x1e7   : > { %4134 = vmatpush2.bf16.msra.mxu0 %v5105_v14  ;;  %v5210_v48 = vcombine.high %v809_v25, %v813_v50  ;;  %v673_v55 = vld [vmem:[%s5835_s4 + $0xad0] sm:$0xff]  ;;  %v5209_v51 = vcombine.low %v809_v25, %v813_v50 }
 0x1e8   : > { %4195 = vmatpush2.bf16.msra.mxu1 %v5233_v24  ;;  %4135 = vmatprep.subr.bf16.mxu0 %v5098_v27  ;;  %v677_v56 = vld [vmem:[%s5835_s4 + $0xaf0] sm:$0xff] }
 0x1e9   : > { %4196 = vmatprep.subr.bf16.mxu1 %v5226_v9  ;;  %v801_v47 = vld [vmem:[%s5835_s4 + $0xed0] sm:$0xff]  ;;  %v5074_v52 = vcombine.high %v673_v55, %v677_v56  ;;  %v5073_v59 = vcombine.low %v673_v55, %v677_v56  ;;  %v510_v55 = vld [vmem:[%s5835_s4 + $0x5b8] sm:$0xff] }
 0x1ea   : > { %v805_v44 = vld [vmem:[%s5835_s4 + $0xef0] sm:$0xff] }
 0x1eb   : > { %4136 = vmatpush2.bf16.msra.mxu0 %v5097_v6  ;;  %v5202_v63 = vcombine.high %v801_v47, %v805_v44  ;;  %v665_v62 = vld [vmem:[%s5835_s4 + $0xa90] sm:$0xff]  ;;  %v5201_v5 = vcombine.low %v801_v47, %v805_v44 }
 0x1ec   : > { %4197 = vmatpush2.bf16.msra.mxu1 %v5225_v8  ;;  %4137 = vmatprep.subr.bf16.mxu0 %v5090_v20  ;;  %v669_v30 = vld [vmem:[%s5835_s4 + $0xab0] sm:$0xff]  ;;  %v386_v8 = vld [vmem:[%s5835_s4 + $0x1d8] sm:$0xff] }
 0x1ed   : > { %4198 = vmatprep.subr.bf16.mxu1 %v5218_v10  ;;  %v793_v3 = vld [vmem:[%s5835_s4 + $0xe90] sm:$0xff]  ;;  %v5066_v1 = vcombine.high %v665_v62, %v669_v30  ;;  %v5065_v35 = vcombine.low %v665_v62, %v669_v30  ;;  %v390_v20 = vld [vmem:[%s5835_s4 + $0x1f8] sm:$0xff] }
 0x1ee   : > { %v797_v17 = vld [vmem:[%s5835_s4 + $0xeb0] sm:$0xff]  ;;  %v514_v10 = vld [vmem:[%s5835_s4 + $0x5d8] sm:$0xff]  ;;  %v4788_v50 = vcombine.high %v386_v8, %v390_v20  ;;  %v4787_v56 = vcombine.low %v386_v8, %v390_v20 }
 0x1ef   : > { %4138 = vmatpush2.bf16.msra.mxu0 %v5089_v54  ;;  %v5194_v15 = vcombine.high %v793_v3, %v797_v17  ;;  %v657_v4 = vld [vmem:[%s5835_s4 + $0xa50] sm:$0xff]  ;;  %v5193_v2 = vcombine.low %v793_v3, %v797_v17  ;;  %v4916_v54 = vcombine.high %v514_v10, %v518_v31  ;;  %v4915_v47 = vcombine.low %v514_v10, %v518_v31  ;;  %v498_v62 = vld [vmem:[%s5835_s4 + $0x558] sm:$0xff] }
 0x1f0   : > { %4199 = vmatpush2.bf16.msra.mxu1 %v5217_v38  ;;  %4139 = vmatprep.subr.bf16.mxu0 %v5082_v40  ;;  %v661_v60 = vld [vmem:[%s5835_s4 + $0xa70] sm:$0xff]  ;;  %v378_v38 = vld [vmem:[%s5835_s4 + $0x198] sm:$0xff] }
 0x1f1   : > { %4200 = vmatprep.subr.bf16.mxu1 %v5210_v48  ;;  %v785_v32 = vld [vmem:[%s5835_s4 + $0xe50] sm:$0xff]  ;;  %v5058_v41 = vcombine.high %v657_v4, %v661_v60  ;;  %v5057_v45 = vcombine.low %v657_v4, %v661_v60  ;;  %v382_v40 = vld [vmem:[%s5835_s4 + $0x1b8] sm:$0xff] }
 0x1f2   : > { %v789_v61 = vld [vmem:[%s5835_s4 + $0xe70] sm:$0xff]  ;;  %v506_v48 = vld [vmem:[%s5835_s4 + $0x598] sm:$0xff]  ;;  %v4780_v44 = vcombine.high %v378_v38, %v382_v40  ;;  %v4779_v17 = vcombine.low %v378_v38, %v382_v40 }
 0x1f3   : > { %4140 = vmatpush2.bf16.msra.mxu0 %v5081_v28  ;;  %v5186_v14 = vcombine.high %v785_v32, %v789_v61  ;;  %v649_v24 = vld [vmem:[%s5835_s4 + $0xa10] sm:$0xff]  ;;  %v5185_v12 = vcombine.low %v785_v32, %v789_v61  ;;  %v4908_v28 = vcombine.high %v506_v48, %v510_v55  ;;  %v502_v30 = vld [vmem:[%s5835_s4 + $0x578] sm:$0xff] }
 0x1f4   : > { %4201 = vmatpush2.bf16.msra.mxu1 %v5209_v51  ;;  %4141 = vmatprep.subr.bf16.mxu0 %v5074_v52  ;;  %v653_v27 = vld [vmem:[%s5835_s4 + $0xa30] sm:$0xff]  ;;  %v370_v51 = vld [vmem:[%s5835_s4 + $0x158] sm:$0xff]  ;;  %v4900_v4 = vcombine.high %v498_v62, %v502_v30 }
 0x1f5   : > { %4202 = vmatprep.subr.bf16.mxu1 %v5202_v63  ;;  %v777_v9 = vld [vmem:[%s5835_s4 + $0xe10] sm:$0xff]  ;;  %v5050_v36 = vcombine.high %v649_v24, %v653_v27  ;;  %v5049_v18 = vcombine.low %v649_v24, %v653_v27  ;;  %v374_v52 = vld [vmem:[%s5835_s4 + $0x178] sm:$0xff]  ;;  %v4899_v27 = vcombine.low %v498_v62, %v502_v30 }
 0x1f6   : > { %v781_v39 = vld [vmem:[%s5835_s4 + $0xe30] sm:$0xff]  ;;  %v362_v60 = vld [vmem:[%s5835_s4 + $0x118] sm:$0xff] }
 0x1f7   : > { %4142 = vmatpush2.bf16.msra.mxu0 %v5073_v59  ;;  %v5178_v6 = vcombine.high %v777_v9, %v781_v39  ;;  %v5177_v25 = vcombine.low %v777_v9, %v781_v39  ;;  %v366_v32 = vld [vmem:[%s5835_s4 + $0x138] sm:$0xff] }
 0x1f8   : > { %4203 = vmatpush2.bf16.msra.mxu1 %v5201_v5  ;;  %4143 = vmatprep.subr.bf16.mxu0 %v5066_v1  ;;  %v4907_v5 = vcombine.low %v506_v48, %v510_v55  ;;  %v4772_v1 = vcombine.high %v370_v51, %v374_v52  ;;  %v4764_v9 = vcombine.high %v362_v60, %v366_v32  ;;  %v486_v8 = vld [vmem:[%s5835_s4 + $0x4f8] sm:$0xff] }
 0x1f9   : > { %4204 = vmatprep.subr.bf16.mxu1 %v5194_v15  ;;  %v4763_v10 = vcombine.low %v362_v60, %v366_v32  ;;  %v346_v38 = vld [vmem:[%s5835_s4 + $0x98] sm:$0xff] }
 0x1fa   : > { %v350_v40 = vld [vmem:[%s5835_s4 + $0xb8] sm:$0xff] }
 0x1fb   : > { %4144 = vmatpush2.bf16.msra.mxu0 %v5065_v35  ;;  %v490_v35 = vld [vmem:[%s5835_s4 + $0x518] sm:$0xff] }
 0x1fc   : > { %4205 = vmatpush2.bf16.msra.mxu1 %v5193_v2  ;;  %4145 = vmatprep.subr.bf16.mxu0 %v5058_v41  ;;  %v494_v2 = vld [vmem:[%s5835_s4 + $0x538] sm:$0xff] }
 0x1fd   : > { %4206 = vmatprep.subr.bf16.mxu1 %v5186_v14  ;;  %v4771_v14 = vcombine.low %v370_v51, %v374_v52  ;;  %v474_v55 = vld [vmem:[%s5835_s4 + $0x498] sm:$0xff]  ;;  %v4748_v52 = vcombine.high %v346_v38, %v350_v40 }
 0x1fe   : > { %v466_v60 = vld [vmem:[%s5835_s4 + $0x458] sm:$0xff] }
 0x1ff   : > { %4146 = vmatpush2.bf16.msra.mxu0 %v5057_v45  ;;  %v4892_v45 = vcombine.high %v490_v35, %v494_v2  ;;  %v470_v32 = vld [vmem:[%s5835_s4 + $0x478] sm:$0xff] }
 0x200   : > { %4207 = vmatpush2.bf16.msra.mxu1 %v5185_v12  ;;  %4147 = vmatprep.subr.bf16.mxu0 %v5050_v36  ;;  %v354_v12 = vld [vmem:[%s5835_s4 + $0xd8] sm:$0xff] }
 0x201   : > { %4208 = vmatprep.subr.bf16.mxu1 %v5178_v6  ;;  %v358_v36 = vld [vmem:[%s5835_s4 + $0xf8] sm:$0xff] }
 0x202   : > { %v482_v6 = vld [vmem:[%s5835_s4 + $0x4d8] sm:$0xff] }
 0x203   : > { %4148 = vmatpush2.bf16.msra.mxu0 %v5049_v18  ;;  %v4891_v18 = vcombine.low %v490_v35, %v494_v2  ;;  %v4883_v51 = vcombine.low %v482_v6, %v486_v8  ;;  %v7076_v2 = vld [vmem:[#allocation20_spill] sm:$0xff] }
 0x204   : > { %4209 = vmatpush2.bf16.msra.mxu1 %v5177_v25  ;;  %4239 = vmatprep.subr.bf16.mxu0 %v4788_v50  ;;  %v4756_v25 = vcombine.high %v354_v12, %v358_v36 }
 0x205   : > { %4300 = vmatprep.subr.bf16.mxu1 %v4916_v54  ;;  %v6591_v63 = vpop.f32.mrf.mxu0  ;;  %v4884_v54 = vcombine.high %v482_v6, %v486_v8  ;;  %v330_v6 = vld [vmem:[%s5835_s4 + $0x18] sm:$0xff] }
 0x206   : > { %4150 = vmatmul.mubr.bf16.vlgmr.msra.gmra.mxu0 %v6108_v16  ;;  %v334_v8 = vld [vmem:[%s5835_s4 + $0x38] sm:$0xff] }
 0x207   : > { %v6596_v3 = vpop.f32.mrf.mxu1  ;;  %4211 = vmatmul.mubr.bf16.vlgmr.msra.gmra.mxu1 %v6115_v21  ;;  %4240 = vmatpush1.bf16.msra.mxu0 %v4787_v56  ;;  %v6599_v59 = vpop.f32.mrf.mxu0  ;;  %v478_v56 = vld [vmem:[%s5835_s4 + $0x4b8] sm:$0xff] }
 0x208   : > { %4301 = vmatpush1.bf16.msra.mxu1 %v4915_v47  ;;  %4241 = vmatprep.subr.bf16.mxu0 %v4780_v44  ;;  %v4755_v44 = vcombine.low %v354_v12, %v358_v36  ;;  %v4876_v30 = vcombine.high %v474_v55, %v478_v56  ;;  %v4868_v36 = vcombine.high %v466_v60, %v470_v32 }
 0x209   : > { %v6601_v15 = vpop.f32.mrf.mxu1  ;;  %4302 = vmatprep.subr.bf16.mxu1 %v4908_v28  ;;  %4159 = vmatprep.mubr.bf16.mxu0 %v6119_v29  ;;  %v6606_v61 = vpop.f32.mrf.mxu0 }
 0x20a   : > { %4220 = vmatprep.mubr.bf16.mxu1 %v6126_v13 }
 0x20b   : > { %v6611_v41 = vpop.f32.mrf.mxu1  ;;  %4242 = vmatpush1.bf16.msra.mxu0 %v4779_v17  ;;  %v6613_v24 = vpop.f32.mrf.mxu0  ;;  %v338_v17 = vld [vmem:[%s5835_s4 + $0x58] sm:$0xff] }
 0x20c   : > { %4303 = vmatpush1.bf16.msra.mxu1 %v4907_v5  ;;  %4243 = vmatprep.subr.bf16.mxu0 %v4772_v1  ;;  %v342_v5 = vld [vmem:[%s5835_s4 + $0x78] sm:$0xff] }
 0x20d   : > { %v6615_v39 = vpop.f32.mrf.mxu1  ;;  %4304 = vmatprep.subr.bf16.mxu1 %v4900_v4  ;;  %v6622_v20 = vpop.f32.mrf.mxu0  ;;  %v7075_v4 = vld [vmem:[#allocation19_spill] sm:$0xff] }
 0x20e   : > { %4160 = vmatmul.mubr.bf16.gmra.mxu0 %v6132_v37 }
 0x20f   : > { %4244 = vmatpush1.bf16.msra.mxu0 %v4771_v14  ;;  %4221 = vmatmul.mubr.bf16.gmra.mxu1 %v6138_v42  ;;  %v6625_v31 = vpop.f32.mrf.mxu1  ;;  %v6627_v50 = vpop.f32.mrf.mxu0  ;;  %v4747_v14 = vcombine.low %v346_v38, %v350_v40  ;;  %v4739_v40 = vcombine.low %v338_v17, %v342_v5 }
 0x210   : > { %4305 = vmatpush1.bf16.msra.mxu1 %v4899_v27  ;;  %4245 = vmatprep.subr.bf16.mxu0 %v4764_v9  ;;  %v4875_v9 = vcombine.low %v474_v55, %v478_v56  ;;  %v4867_v56 = vcombine.low %v466_v60, %v470_v32  ;;  %v442_v32 = vld [vmem:[%s5835_s4 + $0x398] sm:$0xff] }
 0x211   : > { %4306 = vmatprep.subr.bf16.mxu1 %v4892_v45  ;;  %4169 = vmatprep.mubr.bf16.mxu0 %v6141_v49  ;;  %v6632_v48 = vpop.f32.mrf.mxu1  ;;  %v6637_v47 = vpop.f32.mrf.mxu0  ;;  %v4740_v45 = vcombine.high %v338_v17, %v342_v5 }
 0x212   : > { %4230 = vmatprep.mubr.bf16.mxu1 %v6148_v57 }
 0x213   : > { %4246 = vmatpush1.bf16.msra.mxu0 %v4763_v10  ;;  %v6639_v28 = vpop.f32.mrf.mxu1  ;;  %v6641_v62 = vpop.f32.mrf.mxu0 }
 0x214   : > { %4307 = vmatpush1.bf16.msra.mxu1 %v4891_v18  ;;  %4247 = vmatprep.subr.bf16.mxu0 %v4756_v25  ;;  %v7077_v18 = vld [vmem:[#allocation18_spill] sm:$0xff]  ;;  %v458_v25 = vld [vmem:[%s5835_s4 + $0x418] sm:$0xff] }
 0x215   : > { %4308 = vmatprep.subr.bf16.mxu1 %v4884_v54  ;;  %v6645_v1 = vpop.f32.mrf.mxu1  ;;  %v6650_v35 = vpop.f32.mrf.mxu0  ;;  %v462_v54 = vld [vmem:[%s5835_s4 + $0x438] sm:$0xff] }
 0x216   : > { %4170 = vmatmul.mubr.bf16.gmra.mxu0 %v7075_v4  ;;  %v582_v4 = vld [vmem:[%s5835_s4 + $0x7f8] sm:$0xff]  ;;  %v4859_v17 = vcombine.low %v458_v25, %v462_v54 }
 0x217   : > { %4248 = vmatpush1.bf16.msra.mxu0 %v4755_v44  ;;  %4231 = vmatmul.mubr.bf16.gmra.mxu1 %v7076_v2  ;;  %v6653_v27 = vpop.f32.mrf.mxu1  ;;  %v6655_v12 = vpop.f32.mrf.mxu0  ;;  %v4732_v44 = vcombine.high %v330_v6, %v334_v8  ;;  %v578_v2 = vld [vmem:[%s5835_s4 + $0x7d8] sm:$0xff] }
 0x218   : > { %4309 = vmatpush1.bf16.msra.mxu1 %v4883_v51  ;;  %4249 = vmatprep.subr.bf16.mxu0 %v4748_v52  ;;  %v4860_v52 = vcombine.high %v458_v25, %v462_v54  ;;  %v4980_v60 = vcombine.high %v578_v2, %v582_v4  ;;  %v434_v25 = vld [vmem:[%s5835_s4 + $0x358] sm:$0xff] }
 0x219   : > { %4310 = vmatprep.subr.bf16.mxu1 %v4876_v30  ;;  %v6659_v10 = vpop.f32.mrf.mxu1  ;;  %4271 = vmatprep.mubr.bf16.mxu0 %v7077_v18  ;;  %v3809_v38 = vpop.f32.mrf.mxu0  ;;  %v450_v30 = vld [vmem:[%s5835_s4 + $0x3d8] sm:$0xff] }
 0x21a   : > { %4332 = vmatprep.mubr.bf16.mxu1 %v5937_v0  ;;  %v454_v18 = vld [vmem:[%s5835_s4 + $0x3f8] sm:$0xff]  ;;  %v4731_v0 = vcombine.low %v330_v6, %v334_v8 }
 0x21b   : > { %4250 = vmatpush1.bf16.msra.mxu0 %v4747_v14  ;;  %v3870_v55 = vpop.f32.mrf.mxu1  ;;  %v3810_v51 = vpop.f32.mrf.mxu0  ;;  %v4852_v5 = vcombine.high %v450_v30, %v454_v18  ;;  %v446_v14 = vld [vmem:[%s5835_s4 + $0x3b8] sm:$0xff] }
 0x21c   : > { %4311 = vmatpush1.bf16.msra.mxu1 %v4875_v9  ;;  %4251 = vmatprep.subr.bf16.mxu0 %v4740_v45  ;;  %v570_v9 = vld [vmem:[%s5835_s4 + $0x798] sm:$0xff]  ;;  %v4844_v6 = vcombine.high %v442_v32, %v446_v14 }
 0x21d   : > { %4312 = vmatprep.subr.bf16.mxu1 %v4868_v36  ;;  %v3871_v38 = vpop.f32.mrf.mxu1  ;;  %v574_v45 = vld [vmem:[%s5835_s4 + $0x7b8] sm:$0xff]  ;;  %v4851_v36 = vcombine.low %v450_v30, %v454_v18 }
 0x21e   : > { %v4972_v8 = vcombine.high %v570_v9, %v574_v45  ;;  %v438_v54 = vld [vmem:[%s5835_s4 + $0x378] sm:$0xff]  ;;  %v4971_v51 = vcombine.low %v570_v9, %v574_v45 }
 0x21f   : > { %4252 = vmatpush1.bf16.msra.mxu0 %v4739_v40  ;;  %v4979_v40 = vcombine.low %v578_v2, %v582_v4  ;;  %v562_v55 = vld [vmem:[%s5835_s4 + $0x758] sm:$0xff] }
 0x220   : > { %4313 = vmatpush1.bf16.msra.mxu1 %v4867_v56  ;;  %4253 = vmatprep.subr.bf16.mxu0 %v4732_v44  ;;  %v566_v56 = vld [vmem:[%s5835_s4 + $0x778] sm:$0xff]  ;;  %v4843_v44 = vcombine.low %v442_v32, %v446_v14 }
 0x221   : > { %4314 = vmatprep.subr.bf16.mxu1 %v4860_v52  ;;  %v4836_v52 = vcombine.high %v434_v25, %v438_v54  ;;  %v4964_v4 = vcombine.high %v562_v55, %v566_v56  ;;  %v426_v2 = vld [vmem:[%s5835_s4 + $0x318] sm:$0xff] }
 0x222   : > { %v430_v30 = vld [vmem:[%s5835_s4 + $0x338] sm:$0xff] }
 0x223   : > { %4254 = vmatpush1.bf16.msra.mxu0 %v4731_v0  ;;  %v554_v18 = vld [vmem:[%s5835_s4 + $0x718] sm:$0xff]  ;;  %v4835_v0 = vcombine.low %v434_v25, %v438_v54 }
 0x224   : > { %4315 = vmatpush1.bf16.msra.mxu1 %v4859_v17  ;;  %4255 = vmatprep.subr.bf16.mxu0 %v4852_v5  ;;  %v558_v38 = vld [vmem:[%s5835_s4 + $0x738] sm:$0xff]  ;;  %v4963_v17 = vcombine.low %v562_v55, %v566_v56  ;;  %v4828_v5 = vcombine.high %v426_v2, %v430_v30 }
 0x225   : > { %4316 = vmatprep.subr.bf16.mxu1 %v4980_v60  ;;  %v4956_v60 = vcombine.high %v554_v18, %v558_v38  ;;  %v418_v32 = vld [vmem:[%s5835_s4 + $0x2d8] sm:$0xff] }
 0x226   : > { %v422_v14 = vld [vmem:[%s5835_s4 + $0x2f8] sm:$0xff] }
 0x227   : > { %4256 = vmatpush2.bf16.msra.mxu0 %v4851_v36  ;;  %v546_v9 = vld [vmem:[%s5835_s4 + $0x6d8] sm:$0xff]  ;;  %v4827_v36 = vcombine.low %v426_v2, %v430_v30 }
 0x228   : > { %4317 = vmatpush2.bf16.msra.mxu1 %v4979_v40  ;;  %4257 = vmatprep.subr.bf16.mxu0 %v4844_v6  ;;  %v550_v45 = vld [vmem:[%s5835_s4 + $0x6f8] sm:$0xff]  ;;  %v4955_v40 = vcombine.low %v554_v18, %v558_v38  ;;  %v4820_v6 = vcombine.high %v418_v32, %v422_v14 }
 0x229   : > { %4318 = vmatprep.subr.bf16.mxu1 %v4972_v8  ;;  %v4948_v8 = vcombine.high %v546_v9, %v550_v45  ;;  %v410_v25 = vld [vmem:[%s5835_s4 + $0x298] sm:$0xff] }
 0x22a   : > { %v414_v54 = vld [vmem:[%s5835_s4 + $0x2b8] sm:$0xff] }
 0x22b   : > { %4258 = vmatpush2.bf16.msra.mxu0 %v4843_v44  ;;  %v538_v55 = vld [vmem:[%s5835_s4 + $0x698] sm:$0xff]  ;;  %v4819_v44 = vcombine.low %v418_v32, %v422_v14 }
 0x22c   : > { %4319 = vmatpush2.bf16.msra.mxu1 %v4971_v51  ;;  %4259 = vmatprep.subr.bf16.mxu0 %v4836_v52  ;;  %v542_v56 = vld [vmem:[%s5835_s4 + $0x6b8] sm:$0xff]  ;;  %v4947_v51 = vcombine.low %v546_v9, %v550_v45  ;;  %v4812_v52 = vcombine.high %v410_v25, %v414_v54 }
 0x22d   : > { %4320 = vmatprep.subr.bf16.mxu1 %v4964_v4  ;;  %v4940_v4 = vcombine.high %v538_v55, %v542_v56  ;;  %v402_v2 = vld [vmem:[%s5835_s4 + $0x258] sm:$0xff] }
 0x22e   : > { %v406_v30 = vld [vmem:[%s5835_s4 + $0x278] sm:$0xff] }
 0x22f   : > { %4260 = vmatpush2.bf16.msra.mxu0 %v4835_v0  ;;  %v530_v18 = vld [vmem:[%s5835_s4 + $0x658] sm:$0xff]  ;;  %v4811_v0 = vcombine.low %v410_v25, %v414_v54 }
 0x230   : > { %4321 = vmatpush2.bf16.msra.mxu1 %v4963_v17  ;;  %4261 = vmatprep.subr.bf16.mxu0 %v4828_v5  ;;  %v534_v38 = vld [vmem:[%s5835_s4 + $0x678] sm:$0xff]  ;;  %v4939_v17 = vcombine.low %v538_v55, %v542_v56  ;;  %v4804_v5 = vcombine.high %v402_v2, %v406_v30 }
 0x231   : > { %4322 = vmatprep.subr.bf16.mxu1 %v4956_v60  ;;  %v4932_v60 = vcombine.high %v530_v18, %v534_v38  ;;  %v394_v32 = vld [vmem:[%s5835_s4 + $0x218] sm:$0xff] }
 0x232   : > { %v398_v14 = vld [vmem:[%s5835_s4 + $0x238] sm:$0xff] }
 0x233   : > { %4262 = vmatpush2.bf16.msra.mxu0 %v4827_v36  ;;  %v522_v9 = vld [vmem:[%s5835_s4 + $0x618] sm:$0xff]  ;;  %v4803_v36 = vcombine.low %v402_v2, %v406_v30 }
 0x234   : > { %4323 = vmatpush2.bf16.msra.mxu1 %v4955_v40  ;;  %4263 = vmatprep.subr.bf16.mxu0 %v4820_v6  ;;  %v526_v45 = vld [vmem:[%s5835_s4 + $0x638] sm:$0xff]  ;;  %v4931_v40 = vcombine.low %v530_v18, %v534_v38  ;;  %v4796_v6 = vcombine.high %v394_v32, %v398_v14 }
 0x235   : > { %4324 = vmatprep.subr.bf16.mxu1 %v4948_v8  ;;  %v4924_v8 = vcombine.high %v522_v9, %v526_v45  ;;  %v642_v25 = vld [vmem:[%s5835_s4 + $0x9d8] sm:$0xff] }
 0x236   : > { %v646_v54 = vld [vmem:[%s5835_s4 + $0x9f8] sm:$0xff] }
 0x237   : > { %4264 = vmatpush2.bf16.msra.mxu0 %v4819_v44  ;;  %v770_v55 = vld [vmem:[%s5835_s4 + $0xdd8] sm:$0xff]  ;;  %v4795_v44 = vcombine.low %v394_v32, %v398_v14  ;;  %v3847_v32 = vadd.f32 %v6596_v3, %v6591_v63  ;;  %v269_v3 = vld [vmem:[%s5844_s6 + $0x10] sm:$0xff] }
 0x238   : > { %4325 = vmatpush2.bf16.msra.mxu1 %v4947_v51  ;;  %4265 = vmatprep.subr.bf16.mxu0 %v4812_v52  ;;  %v774_v56 = vld [vmem:[%s5835_s4 + $0xdf8] sm:$0xff]  ;;  %v4923_v51 = vcombine.low %v522_v9, %v526_v45  ;;  %v5044_v52 = vcombine.high %v642_v25, %v646_v54 }
 0x239   : > { %4326 = vmatprep.subr.bf16.mxu1 %v4940_v4  ;;  %v5172_v4 = vcombine.high %v770_v55, %v774_v56  ;;  %v634_v2 = vld [vmem:[%s5835_s4 + $0x998] sm:$0xff] }
 0x23a   : > { %v638_v30 = vld [vmem:[%s5835_s4 + $0x9b8] sm:$0xff] }
 0x23b   : > { %4266 = vmatpush2.bf16.msra.mxu0 %v4811_v0  ;;  %v762_v18 = vld [vmem:[%s5835_s4 + $0xd98] sm:$0xff]  ;;  %v5043_v0 = vcombine.low %v642_v25, %v646_v54  ;;  %v5035_v63 = vcombine.low %v634_v2, %v638_v30 }
 0x23c   : > { %4327 = vmatpush2.bf16.msra.mxu1 %v4939_v17  ;;  %4267 = vmatprep.subr.bf16.mxu0 %v4804_v5  ;;  %v766_v38 = vld [vmem:[%s5835_s4 + $0xdb8] sm:$0xff]  ;;  %v5171_v17 = vcombine.low %v770_v55, %v774_v56  ;;  %v5036_v5 = vcombine.high %v634_v2, %v638_v30 }
 0x23d   : > { %4328 = vmatprep.subr.bf16.mxu1 %v4932_v60  ;;  %v6706_v60 = vld [vmem:[%s5835_s4 + $0x958] sm:$0xff]  ;;  %v5164_v14 = vcombine.high %v762_v18, %v766_v38  ;;  %v5163_v55 = vcombine.low %v762_v18, %v766_v38 }
 0x23e   : > { %v6711_v9 = vld [vmem:[%s5835_s4 + $0x978] sm:$0xff] }
 0x23f   : > { %4268 = vmatpush2.bf16.msra.mxu0 %v4803_v36  ;;  %v6714_v45 = vld [vmem:[%s5835_s4 + $0xd58] sm:$0xff]  ;;  %v5027_v38 = vcombine.low %v6706_v60, %v6711_v9 }
 0x240   : > { %4329 = vmatpush2.bf16.msra.mxu1 %v4931_v40  ;;  %4269 = vmatprep.subr.bf16.mxu0 %v4796_v6  ;;  %v6717_v36 = vld [vmem:[%s5835_s4 + $0xd78] sm:$0xff]  ;;  %v3849_v6 = vadd.f32 %v6601_v15, %v6599_v59 }
 0x241   : > { %4330 = vmatprep.subr.bf16.mxu1 %v4924_v8  ;;  %v5156_v59 = vcombine.high %v6714_v45, %v6717_v36  ;;  %v6729_v15 = vld [vmem:[%s5835_s4 + $0x918] sm:$0xff] }
 0x242   : > { %v6740_v2 = vld [vmem:[%s5835_s4 + $0xd38] sm:$0xff] }
 0x243   : > { %4270 = vmatpush2.bf16.msra.mxu0 %v4795_v44  ;;  %v270_v30 = vld [vmem:[%s5844_s6 + $0x18] sm:$0xff] }
 0x244   : > { %4331 = vmatpush2.bf16.msra.mxu1 %v4923_v51  ;;  %4361 = vmatprep.subr.bf16.mxu0 %v5044_v52  ;;  %v6734_v52 = vld [vmem:[%s5835_s4 + $0x938] sm:$0xff] }
 0x245   : > { %4422 = vmatprep.subr.bf16.mxu1 %v5172_v4  ;;  %v3907_v40 = vpop.f32.mrf.mxu0  ;;  %v6737_v4 = vld [vmem:[%s5835_s4 + $0xd18] sm:$0xff] }
 0x246   : > { %4272 = vmatmul.mubr.bf16.vlgmr.msra.gmra.mxu0 %v5982_v22  ;;  %v3908_v8 = vadd.f32 %v3907_v40, %v3847_v32  ;;  %v5028_v22 = vcombine.high %v6706_v60, %v6711_v9  ;;  %v277_v32 = vld [vmem:[%s5844_s6 + $0x50] sm:$0xff]  ;;  %v5020_v60 = vcombine.high %v6729_v15, %v6734_v52 }
 0x247   : > { %v3968_v25 = vpop.f32.mrf.mxu1  ;;  %4333 = vmatmul.mubr.bf16.vlgmr.msra.gmra.mxu1 %v5989_v26  ;;  %4362 = vmatpush1.bf16.msra.mxu0 %v5043_v0  ;;  %v3909_v54 = vpop.f32.mrf.mxu0  ;;  %v3851_v26 = vadd.f32 %v6611_v41, %v6606_v61  ;;  %v3853_v61 = vadd.f32 %v6615_v39, %v6613_v24  ;;  %v5148_v24 = vcombine.high %v6737_v4, %v6740_v2  ;;  %v6757_v39 = vld [vmem:[%s5835_s4 + $0x8d8] sm:$0xff] }
 0x248   : > { %4423 = vmatpush1.bf16.msra.mxu1 %v5171_v17  ;;  %4363 = vmatprep.subr.bf16.mxu0 %v5036_v5  ;;  %v3969_v56 = vadd.f32 %v3968_v25, %v3908_v8  ;;  %v3910_v44 = vadd.f32 %v3909_v54, %v3849_v6  ;;  %v6763_v25 = vld [vmem:[%s5835_s4 + $0x8f8] sm:$0xff] }
 0x249   : > { %v3970_v51 = vpop.f32.mrf.mxu1  ;;  %4424 = vmatprep.subr.bf16.mxu1 %v5164_v14  ;;  %4281 = vmatprep.mubr.bf16.mxu0 %v5995_v33  ;;  %v3911_v18 = vpop.f32.mrf.mxu0  ;;  %v3857_v14 = vadd.f32 %v6625_v31, %v6622_v20  ;;  %v5019_v20 = vcombine.low %v6729_v15, %v6734_v52  ;;  %v5147_v31 = vcombine.low %v6737_v4, %v6740_v2  ;;  %v285_v15 = vld [vmem:[%s5844_s6 + $0x90] sm:$0xff]  ;;  %v6796_v4 = vld [vmem:[%s5835_s4 + $0xc98] sm:$0xff] }
 0x24a   : > { %4342 = vmatprep.mubr.bf16.mxu1 %v6000_v34  ;;  %v4485_v41 = vadd.f32 %v3969_v56, %v269_v3  ;;  %v3971_v0 = vadd.f32 %v3970_v51, %v3910_v44  ;;  %v3912_v17 = vadd.f32 %v3911_v18, %v3851_v26  ;;  %v5155_v34 = vcombine.low %v6714_v45, %v6717_v36  ;;  %v6766_v45 = vld [vmem:[%s5835_s4 + $0xcd8] sm:$0xff] }
 0x24b   : > { %v3972_v5 = vpop.f32.mrf.mxu1  ;;  %4364 = vmatpush1.bf16.msra.mxu0 %v5035_v63  ;;  %v3913_v33 = vpop.f32.mrf.mxu0  ;;  %v6769_v36 = vld [vmem:[%s5835_s4 + $0xcf8] sm:$0xff]  ;;  %v3859_v63 = vadd.f32 %v6632_v48, %v6627_v50  ;;  %v3861_v50 = vadd.f32 %v6639_v28, %v6637_v47 }
 0x24c   : > { %4425 = vmatpush1.bf16.msra.mxu1 %v5163_v55  ;;  %4365 = vmatprep.subr.bf16.mxu0 %v5028_v22  ;;  %4525 = vst [vmem:[%s5844_s6 + $0x10] sm:$0xff] %v4485_v41  ;;  %v4486_v9 = vadd.f32 %v3971_v0, %v270_v30  ;;  %v3973_v40 = vadd.f32 %v3972_v5, %v3912_v17  ;;  %v278_v3 = vld [vmem:[%s5844_s6 + $0x58] sm:$0xff] }
 0x24d   : > { %v3914_v6 = vadd.f32 %v3913_v33, %v3853_v61  ;;  %v3974_v8 = vpop.f32.mrf.mxu1  ;;  %4426 = vmatprep.subr.bf16.mxu1 %v5156_v59  ;;  %v3917_v54 = vpop.f32.mrf.mxu0  ;;  %v5140_v56 = vcombine.high %v6766_v45, %v6769_v36  ;;  %v6789_v44 = vld [vmem:[%s5835_s4 + $0x898] sm:$0xff]  ;;  %v3863_v61 = vadd.f32 %v6645_v1, %v6641_v62 }
 0x24e   : > { %4282 = vmatmul.mubr.bf16.gmra.mxu0 %v6009_v43  ;;  %4526 = vst [vmem:[%s5844_s6 + $0x18] sm:$0xff] %v4486_v9  ;;  %v4493_v55 = vadd.f32 %v3973_v40, %v277_v32  ;;  %v3918_v59 = vadd.f32 %v3917_v54, %v3857_v14  ;;  %v5012_v43 = vcombine.high %v6757_v39, %v6763_v25  ;;  %v6793_v28 = vld [vmem:[%s5835_s4 + $0x8b8] sm:$0xff]  ;;  %v293_v32 = vld [vmem:[%s5844_s6 + $0xd0] sm:$0xff] }
 0x24f   : > { %v3975_v22 = vadd.f32 %v3974_v8, %v3914_v6  ;;  %4366 = vmatpush1.bf16.msra.mxu0 %v5027_v38  ;;  %v3978_v26 = vpop.f32.mrf.mxu1  ;;  %4343 = vmatmul.mubr.bf16.gmra.mxu1 %v6012_v46  ;;  %v3919_v48 = vpop.f32.mrf.mxu0  ;;  %v6799_v2 = vld [vmem:[%s5835_s4 + $0xcb8] sm:$0xff]  ;;  %v5011_v38 = vcombine.low %v6757_v39, %v6763_v25  ;;  %v5004_v62 = vcombine.high %v6789_v44, %v6793_v28 }
 0x250   : > { %4427 = vmatpush1.bf16.msra.mxu1 %v5155_v34  ;;  %4367 = vmatprep.subr.bf16.mxu0 %v5020_v60  ;;  %4533 = vst [vmem:[%s5844_s6 + $0x50] sm:$0xff] %v4493_v55  ;;  %v3920_v51 = vadd.f32 %v3919_v48, %v3859_v63  ;;  %v3979_v52 = vadd.f32 %v3978_v26, %v3918_v59  ;;  %v286_v18 = vld [vmem:[%s5844_s6 + $0x98] sm:$0xff] }
 0x251   : > { %v4494_v46 = vadd.f32 %v3975_v22, %v278_v3  ;;  %v3980_v47 = vpop.f32.mrf.mxu1  ;;  %4428 = vmatprep.subr.bf16.mxu1 %v5148_v24  ;;  %4291 = vmatprep.mubr.bf16.mxu0 %v6017_v53  ;;  %v3921_v30 = vpop.f32.mrf.mxu0  ;;  %v5132_v1 = vcombine.high %v6796_v4, %v6799_v2  ;;  %v6817_v33 = vld [vmem:[%s5835_s4 + $0x858] sm:$0xff]  ;;  %v3867_v34 = vadd.f32 %v6653_v27, %v6650_v35 }
 0x252   : > { %4352 = vmatprep.mubr.bf16.mxu1 %v6022_v58  ;;  %v4501_v41 = vadd.f32 %v3979_v52, %v285_v15  ;;  %v3922_v0 = vadd.f32 %v3921_v30, %v3861_v50  ;;  %v3981_v17 = vadd.f32 %v3980_v47, %v3920_v51  ;;  %v5139_v58 = vcombine.low %v6766_v45, %v6769_v36  ;;  %v598_v9 = vld [vmem:[%s5835_s4 + $0x878] sm:$0xff] }
 0x253   : > { %4534 = vst [vmem:[%s5844_s6 + $0x58] sm:$0xff] %v4494_v46  ;;  %4368 = vmatpush1.bf16.msra.mxu0 %v5019_v20  ;;  %v3982_v5 = vpop.f32.mrf.mxu1  ;;  %v3923_v53 = vpop.f32.mrf.mxu0  ;;  %v722_v40 = vld [vmem:[%s5835_s4 + $0xc58] sm:$0xff]  ;;  %v3869_v8 = vadd.f32 %v6659_v10, %v6655_v12  ;;  %v5003_v36 = vcombine.low %v6789_v44, %v6793_v28  ;;  %v301_v10 = vld [vmem:[%s5844_s6 + $0x110] sm:$0xff]  ;;  %v4996_v54 = vcombine.high %v6817_v33, %v598_v9 }
 0x254   : > { %4429 = vmatpush1.bf16.msra.mxu1 %v5147_v31  ;;  %4369 = vmatprep.subr.bf16.mxu0 %v5012_v43  ;;  %4541 = vst [vmem:[%s5844_s6 + $0x90] sm:$0xff] %v4501_v41  ;;  %v4502_v60 = vadd.f32 %v3981_v17, %v286_v18  ;;  %v3924_v24 = vadd.f32 %v3923_v53, %v3863_v61  ;;  %v726_v6 = vld [vmem:[%s5835_s4 + $0xc78] sm:$0xff] }
 0x255   : > { %v3983_v39 = vadd.f32 %v3982_v5, %v3922_v0  ;;  %v3984_v14 = vpop.f32.mrf.mxu1  ;;  %4430 = vmatprep.subr.bf16.mxu1 %v5140_v56  ;;  %v3927_v25 = vpop.f32.mrf.mxu0  ;;  %v294_v45 = vld [vmem:[%s5844_s6 + $0xd8] sm:$0xff]  ;;  %v5124_v20 = vcombine.high %v722_v40, %v726_v6  ;;  %v4995_v46 = vcombine.low %v6817_v33, %v598_v9 }
 0x256   : > { %4292 = vmatmul.mubr.bf16.gmra.mxu0 %v6030_v7  ;;  %4542 = vst [vmem:[%s5844_s6 + $0x98] sm:$0xff] %v4502_v60  ;;  %v3928_v27 = vadd.f32 %v3927_v25, %v3867_v34  ;;  %v3985_v63 = vadd.f32 %v3984_v14, %v3924_v24  ;;  %v5131_v7 = vcombine.low %v6796_v4, %v6799_v2  ;;  %v590_v26 = vld [vmem:[%s5835_s4 + $0x838] sm:$0xff] }
 0x257   : > { %v4509_v35 = vadd.f32 %v3983_v39, %v293_v32  ;;  %4370 = vmatpush1.bf16.msra.mxu0 %v5011_v38  ;;  %v3988_v3 = vpop.f32.mrf.mxu1  ;;  %4353 = vmatmul.mubr.bf16.gmra.mxu1 %v6039_v11  ;;  %v3929_v12 = vpop.f32.mrf.mxu0  ;;  %v586_v11 = vld [vmem:[%s5835_s4 + $0x818] sm:$0xff] }
 0x258   : > { %4431 = vmatpush1.bf16.msra.mxu1 %v5139_v58  ;;  %4371 = vmatprep.subr.bf16.mxu0 %v5004_v62  ;;  %v4510_v31 = vadd.f32 %v3985_v63, %v294_v45  ;;  %v3930_v55 = vadd.f32 %v3929_v12, %v3869_v8  ;;  %v3989_v22 = vadd.f32 %v3988_v3, %v3928_v27  ;;  %v302_v50 = vld [vmem:[%s5844_s6 + $0x118] sm:$0xff] }
 0x259   : > { %4549 = vst [vmem:[%s5844_s6 + $0xd0] sm:$0xff] %v4509_v35  ;;  %v3990_v59 = vpop.f32.mrf.mxu1  ;;  %4432 = vmatprep.subr.bf16.mxu1 %v5132_v1  ;;  %4393 = vmatprep.mubr.bf16.mxu0 %v6051_v19  ;;  %v714_v48 = vld [vmem:[%s5835_s4 + $0xc18] sm:$0xff]  ;;  %v3931_v43 = vpop.f32.mrf.mxu0  ;;  %v5123_v19 = vcombine.low %v722_v40, %v726_v6  ;;  %v4988_v52 = vcombine.high %v586_v11, %v590_v26 }
 0x25a   : > { %v718_v15 = vld [vmem:[%s5835_s4 + $0xc38] sm:$0xff]  ;;  %4454 = vmatprep.mubr.bf16.mxu1 %v6058_v23  ;;  %4550 = vst [vmem:[%s5844_s6 + $0xd8] sm:$0xff] %v4510_v31  ;;  %v4517_v56 = vadd.f32 %v3989_v22, %v301_v10  ;;  %v3991_v44 = vadd.f32 %v3990_v59, %v3930_v55  ;;  %v4987_v61 = vcombine.low %v586_v11, %v590_v26 }
 0x25b   : > { %4372 = vmatpush1.bf16.msra.mxu0 %v5003_v36  ;;  %v3992_v51 = vpop.f32.mrf.mxu1  ;;  %v3932_v47 = vpop.f32.mrf.mxu0  ;;  %v5116_v23 = vcombine.high %v714_v48, %v718_v15  ;;  %v706_v4 = vld [vmem:[%s5835_s4 + $0xbd8] sm:$0xff]  ;;  %v5115_v41 = vcombine.low %v714_v48, %v718_v15 }
 0x25c   : > { %4433 = vmatpush1.bf16.msra.mxu1 %v5131_v7  ;;  %4373 = vmatprep.subr.bf16.mxu0 %v4996_v54  ;;  %4557 = vst [vmem:[%s5844_s6 + $0x110] sm:$0xff] %v4517_v56  ;;  %v4518_v28 = vadd.f32 %v3991_v44, %v302_v50  ;;  %v710_v2 = vld [vmem:[%s5835_s4 + $0xbf8] sm:$0xff] }
 0x25d   : > { %4434 = vmatprep.subr.bf16.mxu1 %v5124_v20  ;;  %v3993_v30 = vpop.f32.mrf.mxu1  ;;  %v834_v18 = vld [vmem:[%s5835_s4 + $0xfd8] sm:$0xff]  ;;  %v5108_v0 = vcombine.high %v706_v4, %v710_v2  ;;  %v5107_v62 = vcombine.low %v706_v4, %v710_v2 }
 0x25e   : > { %v838_v38 = vld [vmem:[%s5835_s4 + $0xff8] sm:$0xff]  ;;  %4558 = vst [vmem:[%s5844_s6 + $0x118] sm:$0xff] %v4518_v28 }
 0x25f   : > { %4374 = vmatpush1.bf16.msra.mxu0 %v4995_v46  ;;  %v5236_v17 = vcombine.high %v834_v18, %v838_v38  ;;  %v698_v5 = vld [vmem:[%s5835_s4 + $0xb98] sm:$0xff]  ;;  %v5235_v1 = vcombine.low %v834_v18, %v838_v38 }
 0x260   : > { %4435 = vmatpush1.bf16.msra.mxu1 %v5123_v19  ;;  %4375 = vmatprep.subr.bf16.mxu0 %v4988_v52  ;;  %v702_v53 = vld [vmem:[%s5835_s4 + $0xbb8] sm:$0xff] }
 0x261   : > { %4436 = vmatprep.subr.bf16.mxu1 %v5116_v23  ;;  %v826_v32 = vld [vmem:[%s5835_s4 + $0xf98] sm:$0xff]  ;;  %v5100_v33 = vcombine.high %v698_v5, %v702_v53  ;;  %v5099_v9 = vcombine.low %v698_v5, %v702_v53 }
 0x262   : > { %v830_v58 = vld [vmem:[%s5835_s4 + $0xfb8] sm:$0xff] }
 0x263   : > { %4376 = vmatpush1.bf16.msra.mxu0 %v4987_v61  ;;  %v5228_v34 = vcombine.high %v826_v32, %v830_v58  ;;  %v690_v60 = vld [vmem:[%s5835_s4 + $0xb58] sm:$0xff]  ;;  %v5227_v40 = vcombine.low %v826_v32, %v830_v58 }
 0x264   : > { %4437 = vmatpush1.bf16.msra.mxu1 %v5115_v41  ;;  %4377 = vmatprep.subr.bf16.mxu0 %v5108_v0  ;;  %v694_v24 = vld [vmem:[%s5835_s4 + $0xb78] sm:$0xff] }
 0x265   : > { %4438 = vmatprep.subr.bf16.mxu1 %v5236_v17  ;;  %v818_v39 = vld [vmem:[%s5835_s4 + $0xf58] sm:$0xff]  ;;  %v5092_v6 = vcombine.high %v690_v60, %v694_v24  ;;  %v5091_v27 = vcombine.low %v690_v60, %v694_v24 }
 0x266   : > { %v822_v14 = vld [vmem:[%s5835_s4 + $0xf78] sm:$0xff] }
 0x267   : > { %4378 = vmatpush2.bf16.msra.mxu0 %v5107_v62  ;;  %v5220_v8 = vcombine.high %v818_v39, %v822_v14  ;;  %v682_v25 = vld [vmem:[%s5835_s4 + $0xb18] sm:$0xff]  ;;  %v5219_v63 = vcombine.low %v818_v39, %v822_v14 }
 0x268   : > { %4439 = vmatpush2.bf16.msra.mxu1 %v5235_v1  ;;  %4379 = vmatprep.subr.bf16.mxu0 %v5100_v33  ;;  %v686_v45 = vld [vmem:[%s5835_s4 + $0xb38] sm:$0xff] }
 0x269   : > { %4440 = vmatprep.subr.bf16.mxu1 %v5228_v34  ;;  %v810_v36 = vld [vmem:[%s5835_s4 + $0xf18] sm:$0xff]  ;;  %v5084_v3 = vcombine.high %v682_v25, %v686_v45  ;;  %v5083_v31 = vcombine.low %v682_v25, %v686_v45  ;;  %v7079_v25 = vld [vmem:[#allocation20_spill] sm:$0xff] }
 0x26a   : > { %v814_v35 = vld [vmem:[%s5835_s4 + $0xf38] sm:$0xff] }
 0x26b   : > { %4380 = vmatpush2.bf16.msra.mxu0 %v5099_v9  ;;  %v5212_v12 = vcombine.high %v810_v36, %v814_v35  ;;  %v674_v10 = vld [vmem:[%s5835_s4 + $0xad8] sm:$0xff]  ;;  %v5211_v55 = vcombine.low %v810_v36, %v814_v35 }
 0x26c   : > { %4441 = vmatpush2.bf16.msra.mxu1 %v5227_v40  ;;  %4381 = vmatprep.subr.bf16.mxu0 %v5092_v6  ;;  %v678_v7 = vld [vmem:[%s5835_s4 + $0xaf8] sm:$0xff]  ;;  %v7078_v6 = vld [vmem:[#allocation19_spill] sm:$0xff] }
 0x26d   : > { %4442 = vmatprep.subr.bf16.mxu1 %v5220_v8  ;;  %v802_v54 = vld [vmem:[%s5835_s4 + $0xed8] sm:$0xff]  ;;  %v5076_v22 = vcombine.high %v674_v10, %v678_v7  ;;  %v5075_v15 = vcombine.low %v674_v10, %v678_v7  ;;  %v271_v7 = vld [vmem:[%s5844_s6 + $0x20] sm:$0xff] }
 0x26e   : > { %v806_v20 = vld [vmem:[%s5835_s4 + $0xef8] sm:$0xff] }
 0x26f   : > { %4382 = vmatpush2.bf16.msra.mxu0 %v5091_v27  ;;  %v5204_v59 = vcombine.high %v802_v54, %v806_v20  ;;  %v666_v11 = vld [vmem:[%s5835_s4 + $0xa98] sm:$0xff]  ;;  %v5203_v43 = vcombine.low %v802_v54, %v806_v20 }
 0x270   : > { %4443 = vmatpush2.bf16.msra.mxu1 %v5219_v63  ;;  %4383 = vmatprep.subr.bf16.mxu0 %v5084_v3  ;;  %v670_v26 = vld [vmem:[%s5835_s4 + $0xab8] sm:$0xff] }
 0x271   : > { %4444 = vmatprep.subr.bf16.mxu1 %v5212_v12  ;;  %v794_v50 = vld [vmem:[%s5835_s4 + $0xe98] sm:$0xff]  ;;  %v5068_v56 = vcombine.high %v666_v11, %v670_v26  ;;  %v5067_v47 = vcombine.low %v666_v11, %v670_v26 }
 0x272   : > { %v798_v48 = vld [vmem:[%s5835_s4 + $0xeb8] sm:$0xff] }
 0x273   : > { %4384 = vmatpush2.bf16.msra.mxu0 %v5083_v31  ;;  %v5196_v44 = vcombine.high %v794_v50, %v798_v48  ;;  %v658_v46 = vld [vmem:[%s5835_s4 + $0xa58] sm:$0xff]  ;;  %v5195_v28 = vcombine.low %v794_v50, %v798_v48 }
 0x274   : > { %4445 = vmatpush2.bf16.msra.mxu1 %v5211_v55  ;;  %4385 = vmatprep.subr.bf16.mxu0 %v5076_v22  ;;  %v662_v51 = vld [vmem:[%s5835_s4 + $0xa78] sm:$0xff] }
 0x275   : > { %4446 = vmatprep.subr.bf16.mxu1 %v5204_v59  ;;  %v786_v19 = vld [vmem:[%s5835_s4 + $0xe58] sm:$0xff]  ;;  %v5060_v23 = vcombine.high %v658_v46, %v662_v51  ;;  %v5059_v61 = vcombine.low %v658_v46, %v662_v51  ;;  %v272_v59 = vld [vmem:[%s5844_s6 + $0x28] sm:$0xff] }
 0x276   : > { %v790_v52 = vld [vmem:[%s5835_s4 + $0xe78] sm:$0xff] }
 0x277   : > { %4386 = vmatpush2.bf16.msra.mxu0 %v5075_v15  ;;  %v5188_v4 = vcombine.high %v786_v19, %v790_v52  ;;  %v650_v2 = vld [vmem:[%s5835_s4 + $0xa18] sm:$0xff]  ;;  %v5187_v41 = vcombine.low %v786_v19, %v790_v52 }
 0x278   : > { %4447 = vmatpush2.bf16.msra.mxu1 %v5203_v43  ;;  %4387 = vmatprep.subr.bf16.mxu0 %v5068_v56  ;;  %v654_v30 = vld [vmem:[%s5835_s4 + $0xa38] sm:$0xff]  ;;  %v279_v56 = vld [vmem:[%s5844_s6 + $0x60] sm:$0xff] }
 0x279   : > { %4448 = vmatprep.subr.bf16.mxu1 %v5196_v44  ;;  %v778_v18 = vld [vmem:[%s5835_s4 + $0xe18] sm:$0xff]  ;;  %v5052_v0 = vcombine.high %v650_v2, %v654_v30  ;;  %v5051_v5 = vcombine.low %v650_v2, %v654_v30 }
 0x27a   : > { %v782_v38 = vld [vmem:[%s5835_s4 + $0xe38] sm:$0xff] }
 0x27b   : > { %4388 = vmatpush2.bf16.msra.mxu0 %v5067_v47  ;;  %v5180_v17 = vcombine.high %v778_v18, %v782_v38  ;;  %v5179_v53 = vcombine.low %v778_v18, %v782_v38 }
 0x27c   : > { %4449 = vmatpush2.bf16.msra.mxu1 %v5195_v28  ;;  %4389 = vmatprep.subr.bf16.mxu0 %v5060_v23  ;;  %v280_v28 = vld [vmem:[%s5844_s6 + $0x68] sm:$0xff] }
 0x27d   : > { %4450 = vmatprep.subr.bf16.mxu1 %v5188_v4 }
 0x27f   : > { %4390 = vmatpush2.bf16.msra.mxu0 %v5059_v61 }
 0x280   : > { %4451 = vmatpush2.bf16.msra.mxu1 %v5187_v41  ;;  %4391 = vmatprep.subr.bf16.mxu0 %v5052_v0  ;;  %v287_v41 = vld [vmem:[%s5844_s6 + $0xa0] sm:$0xff] }
 0x281   : > { %4452 = vmatprep.subr.bf16.mxu1 %v5180_v17 }
 0x283   : > { %4392 = vmatpush2.bf16.msra.mxu0 %v5051_v5 }
 0x284   : > { %4453 = vmatpush2.bf16.msra.mxu1 %v5179_v53 }
 0x285   : > { %v4029_v32 = vpop.f32.mrf.mxu0 }
 0x286   : > { %4394 = vmatmul.mubr.bf16.vlgmr.msra.gmra.mxu0 %v6108_v16 }
 0x287   : > { %v4090_v58 = vpop.f32.mrf.mxu1  ;;  %4455 = vmatmul.mubr.bf16.vlgmr.msra.gmra.mxu1 %v6115_v21  ;;  %4403 = vmatprep.mubr.bf16.mxu0 %v6119_v29  ;;  %v4031_v62 = vpop.f32.mrf.mxu0 }
 0x288   : > { %4464 = vmatprep.mubr.bf16.mxu1 %v6126_v13  ;;  %v4091_v27 = vadd.f32 %v4090_v58, %v4029_v32 }
 0x289   : > { %v4092_v1 = vpop.f32.mrf.mxu1  ;;  %v4033_v33 = vpop.f32.mrf.mxu0 }
 0x28a   : > { %v4093_v3 = vadd.f32 %v4092_v1, %v4031_v62  ;;  %v288_v62 = vld [vmem:[%s5844_s6 + $0xa8] sm:$0xff] }
 0x28b   : > { %v4094_v34 = vpop.f32.mrf.mxu1  ;;  %v4035_v60 = vpop.f32.mrf.mxu0 }
 0x28c   : > { %v4095_v20 = vadd.f32 %v4094_v34, %v4033_v33 }
 0x28d   : > { %v4096_v24 = vpop.f32.mrf.mxu1  ;;  %v4039_v39 = vpop.f32.mrf.mxu0 }
 0x28e   : > { %4404 = vmatmul.mubr.bf16.gmra.mxu0 %v6132_v37  ;;  %v4097_v26 = vadd.f32 %v4096_v24, %v4035_v60 }
 0x28f   : > { %4465 = vmatmul.mubr.bf16.gmra.mxu1 %v6138_v42  ;;  %4413 = vmatprep.mubr.bf16.mxu0 %v6141_v49  ;;  %v4100_v16 = vpop.f32.mrf.mxu1  ;;  %v4041_v21 = vpop.f32.mrf.mxu0 }
 0x290   : > { %4474 = vmatprep.mubr.bf16.mxu1 %v6148_v57  ;;  %v4101_v46 = vadd.f32 %v4100_v16, %v4039_v39  ;;  %v295_v16 = vld [vmem:[%s5844_s6 + $0xe0] sm:$0xff] }
 0x291   : > { %v4102_v29 = vpop.f32.mrf.mxu1  ;;  %v4043_v14 = vpop.f32.mrf.mxu0 }
 0x292   : > { %v4103_v4 = vadd.f32 %v4102_v29, %v4041_v21 }
 0x293   : > { %v4104_v9 = vpop.f32.mrf.mxu1  ;;  %v4045_v13 = vpop.f32.mrf.mxu0 }
 0x294   : > { %v4105_v0 = vadd.f32 %v4104_v9, %v4043_v14 }
 0x295   : > { %v4106_v40 = vpop.f32.mrf.mxu1  ;;  %v4049_v8 = vpop.f32.mrf.mxu0 }
 0x296   : > { %4414 = vmatmul.mubr.bf16.gmra.mxu0 %v7078_v6  ;;  %v4107_v1 = vadd.f32 %v4106_v40, %v4045_v13 }
 0x297   : > { %4475 = vmatmul.mubr.bf16.gmra.mxu1 %v7079_v25  ;;  %v4110_v37 = vpop.f32.mrf.mxu1  ;;  %v6891_v45 = vpop.f32.mrf.mxu0 }
 0x298   : > { %v4111_v21 = vadd.f32 %v4110_v37, %v4049_v8  ;;  %v303_v37 = vld [vmem:[%s5844_s6 + $0x120] sm:$0xff] }
 0x299   : > { %v6893_v42 = vpop.f32.mrf.mxu1  ;;  %v4053_v49 = vpop.f32.mrf.mxu0 }
 0x29a   : > { %v296_v49 = vld [vmem:[%s5844_s6 + $0xe8] sm:$0xff]  ;;  %v4113_v13 = vadd.f32 %v6893_v42, %v6891_v45 }
 0x29b   : > { %v4114_v57 = vpop.f32.mrf.mxu1  ;;  %v4054_v36 = vpop.f32.mrf.mxu0 }
 0x29d   : > { %v4115_v35 = vpop.f32.mrf.mxu1 }
 0x2c6   : > { %v4151_v63 = vpop.f32.mrf.mxu0 }
 0x2c7   : > { %v4152_v12 = vadd.f32 %v4151_v63, %v4091_v27  ;;  %v4212_v10 = vpop.f32.mrf.mxu1 }
 0x2c8   : > { %v4153_v54 = vpop.f32.mrf.mxu0 }
 0x2c9   : > { %v4213_v31 = vadd.f32 %v4212_v10, %v4152_v12  ;;  %v4154_v55 = vadd.f32 %v4153_v54, %v4093_v3  ;;  %v4214_v22 = vpop.f32.mrf.mxu1  ;;  %v304_v10 = vld [vmem:[%s5844_s6 + $0x128] sm:$0xff] }
 0x2ca   : > { %v4155_v11 = vpop.f32.mrf.mxu0 }
 0x2cb   : > { %v4487_v50 = vadd.f32 %v4213_v31, %v271_v7  ;;  %v4215_v48 = vadd.f32 %v4214_v22, %v4154_v55  ;;  %v4156_v15 = vadd.f32 %v4155_v11, %v4095_v20  ;;  %v4216_v43 = vpop.f32.mrf.mxu1 }
 0x2cc   : > { %v4157_v44 = vpop.f32.mrf.mxu0 }
 0x2cd   : > { %4527 = vst [vmem:[%s5844_s6 + $0x20] sm:$0xff] %v4487_v50  ;;  %v4488_v51 = vadd.f32 %v4215_v48, %v272_v59  ;;  %v4217_v19 = vadd.f32 %v4216_v43, %v4156_v15  ;;  %v4158_v52 = vadd.f32 %v4157_v44, %v4097_v26  ;;  %v4218_v47 = vpop.f32.mrf.mxu1 }
 0x2ce   : > { %v4161_v23 = vpop.f32.mrf.mxu0 }
 0x2cf   : > { %4528 = vst [vmem:[%s5844_s6 + $0x28] sm:$0xff] %v4488_v51  ;;  %v4495_v2 = vadd.f32 %v4217_v19, %v279_v56  ;;  %v4219_v30 = vadd.f32 %v4218_v47, %v4158_v52  ;;  %v4162_v18 = vadd.f32 %v4161_v23, %v4101_v46  ;;  %v4222_v38 = vpop.f32.mrf.mxu1 }
 0x2d0   : > { %v4163_v61 = vpop.f32.mrf.mxu0 }
 0x2d1   : > { %4535 = vst [vmem:[%s5844_s6 + $0x60] sm:$0xff] %v4495_v2  ;;  %v4496_v17 = vadd.f32 %v4219_v30, %v280_v28  ;;  %v4164_v5 = vadd.f32 %v4163_v61, %v4103_v4  ;;  %v4223_v53 = vadd.f32 %v4222_v38, %v4162_v18  ;;  %v4224_v32 = vpop.f32.mrf.mxu1 }
 0x2d2   : > { %v4165_v58 = vpop.f32.mrf.mxu0 }
 0x2d3   : > { %4536 = vst [vmem:[%s5844_s6 + $0x68] sm:$0xff] %v4496_v17  ;;  %v4503_v33 = vadd.f32 %v4223_v53, %v287_v41  ;;  %v4166_v34 = vadd.f32 %v4165_v58, %v4105_v0  ;;  %v4225_v60 = vadd.f32 %v4224_v32, %v4164_v5  ;;  %v4226_v24 = vpop.f32.mrf.mxu1  ;;  %v273_v58 = vld [vmem:[%s5844_s6 + $0x30] sm:$0xff] }
 0x2d4   : > { %v4167_v39 = vpop.f32.mrf.mxu0 }
 0x2d5   : > { %4543 = vst [vmem:[%s5844_s6 + $0xa0] sm:$0xff] %v4503_v33  ;;  %v4504_v29 = vadd.f32 %v4225_v60, %v288_v62  ;;  %v4168_v14 = vadd.f32 %v4167_v39, %v4107_v1  ;;  %v4227_v9 = vadd.f32 %v4226_v24, %v4166_v34  ;;  %v4228_v6 = vpop.f32.mrf.mxu1  ;;  %v274_v24 = vld [vmem:[%s5844_s6 + $0x38] sm:$0xff] }
 0x2d6   : > { %v4171_v25 = vpop.f32.mrf.mxu0 }
 0x2d7   : > { %4544 = vst [vmem:[%s5844_s6 + $0xa8] sm:$0xff] %v4504_v29  ;;  %v4511_v40 = vadd.f32 %v4227_v9, %v295_v16  ;;  %v4172_v57 = vadd.f32 %v4171_v25, %v4111_v21  ;;  %v4229_v36 = vadd.f32 %v4228_v6, %v4168_v14  ;;  %v4232_v35 = vpop.f32.mrf.mxu1  ;;  %v281_v6 = vld [vmem:[%s5844_s6 + $0x70] sm:$0xff] }
 0x2d8   : > { %v4173_v8 = vpop.f32.mrf.mxu0 }
 0x2d9   : > { %4551 = vst [vmem:[%s5844_s6 + $0xe0] sm:$0xff] %v4511_v40  ;;  %v4512_v27 = vadd.f32 %v4229_v36, %v296_v49  ;;  %v4174_v63 = vadd.f32 %v4173_v8, %v4113_v13  ;;  %v4233_v3 = vadd.f32 %v4232_v35, %v4172_v57  ;;  %v4234_v12 = vpop.f32.mrf.mxu1  ;;  %v282_v35 = vld [vmem:[%s5844_s6 + $0x78] sm:$0xff] }
 0x2da   : > { %v4175_v7 = vpop.f32.mrf.mxu0 }
 0x2db   : > { %4552 = vst [vmem:[%s5844_s6 + $0xe8] sm:$0xff] %v4512_v27  ;;  %v4519_v54 = vadd.f32 %v4233_v3, %v303_v37  ;;  %v4235_v20 = vadd.f32 %v4234_v12, %v4174_v63  ;;  %v4236_v45 = vpop.f32.mrf.mxu1 }
 0x2dc   : > { %v4176_v42 = vpop.f32.mrf.mxu0 }
 0x2dd   : > { %4559 = vst [vmem:[%s5844_s6 + $0x120] sm:$0xff] %v4519_v54  ;;  %v4520_v31 = vadd.f32 %v4235_v20, %v304_v10  ;;  %v4237_v55 = vpop.f32.mrf.mxu1  ;;  %v289_v10 = vld [vmem:[%s5844_s6 + $0xb0] sm:$0xff] }
 0x2de   : > { %v290_v55 = vld [vmem:[%s5844_s6 + $0xb8] sm:$0xff] }
 0x2df   : > { %4560 = vst [vmem:[%s5844_s6 + $0x128] sm:$0xff] %v4520_v31 }
 0x306   : > { %v4273_v22 = vpop.f32.mrf.mxu0 }
 0x307   : > { %v4334_v59 = vpop.f32.mrf.mxu1 }
 0x308   : > { %v4275_v11 = vpop.f32.mrf.mxu0  ;;  %v4335_v0 = vadd.f32 %v4334_v59, %v4273_v22 }
 0x309   : > { %v4336_v26 = vpop.f32.mrf.mxu1 }
 0x30a   : > { %v4277_v50 = vpop.f32.mrf.mxu0  ;;  %v4337_v5 = vadd.f32 %v4336_v26, %v4275_v11 }
 0x30b   : > { %v4338_v48 = vpop.f32.mrf.mxu1 }
 0x30c   : > { %v4279_v15 = vpop.f32.mrf.mxu0  ;;  %v4339_v1 = vadd.f32 %v4338_v48, %v4277_v50 }
 0x30d   : > { %v4340_v43 = vpop.f32.mrf.mxu1 }
 0x30e   : > { %v4283_v56 = vpop.f32.mrf.mxu0  ;;  %v4341_v16 = vadd.f32 %v4340_v43, %v4279_v15  ;;  %v297_v15 = vld [vmem:[%s5844_s6 + $0xf0] sm:$0xff] }
 0x30f   : > { %v4344_v44 = vpop.f32.mrf.mxu1 }
 0x310   : > { %v4285_v46 = vpop.f32.mrf.mxu0  ;;  %v4345_v49 = vadd.f32 %v4344_v44, %v4283_v56 }
 0x311   : > { %v4346_v51 = vpop.f32.mrf.mxu1 }
 0x312   : > { %v4287_v19 = vpop.f32.mrf.mxu0  ;;  %v4347_v37 = vadd.f32 %v4346_v51, %v4285_v46 }
 0x313   : > { %v4348_v52 = vpop.f32.mrf.mxu1 }
 0x314   : > { %v4289_v47 = vpop.f32.mrf.mxu0  ;;  %v4349_v54 = vadd.f32 %v4348_v52, %v4287_v19  ;;  %v298_v52 = vld [vmem:[%s5844_s6 + $0xf8] sm:$0xff] }
 0x315   : > { %v4350_v28 = vpop.f32.mrf.mxu1 }
 0x316   : > { %v4293_v23 = vpop.f32.mrf.mxu0  ;;  %v4351_v59 = vadd.f32 %v4350_v28, %v4289_v47 }
 0x317   : > { %v4354_v4 = vpop.f32.mrf.mxu1 }
 0x318   : > { %v6917_v2 = vpop.f32.mrf.mxu0  ;;  %v4355_v56 = vadd.f32 %v4354_v4, %v4293_v23  ;;  %v305_v4 = vld [vmem:[%s5844_s6 + $0x130] sm:$0xff] }
 0x319   : > { %v6919_v30 = vpop.f32.mrf.mxu1 }
 0x31a   : > { %v4297_v18 = vpop.f32.mrf.mxu0  ;;  %v4357_v28 = vadd.f32 %v6919_v30, %v6917_v2 }
 0x31b   : > { %v4358_v38 = vpop.f32.mrf.mxu1 }
 0x31c   : > { %v4298_v61 = vpop.f32.mrf.mxu0 }
 0x31d   : > { %v4359_v41 = vpop.f32.mrf.mxu1 }
 0x346   : > { %v4395_v17 = vpop.f32.mrf.mxu0 }
 0x347   : > { %v4396_v53 = vadd.f32 %v4395_v17, %v4335_v0  ;;  %v4456_v32 = vpop.f32.mrf.mxu1 }
 0x348   : > { %v4397_v62 = vpop.f32.mrf.mxu0 }
 0x349   : > { %v4457_v33 = vadd.f32 %v4456_v32, %v4396_v53  ;;  %v4398_v34 = vadd.f32 %v4397_v62, %v4337_v5  ;;  %v4458_v60 = vpop.f32.mrf.mxu1  ;;  %v306_v32 = vld [vmem:[%s5844_s6 + $0x138] sm:$0xff] }
 0x34a   : > { %v4399_v39 = vpop.f32.mrf.mxu0 }
 0x34b   : > { %v4489_v21 = vadd.f32 %v4457_v33, %v273_v58  ;;  %v4459_v29 = vadd.f32 %v4458_v60, %v4398_v34  ;;  %v4400_v14 = vadd.f32 %v4399_v39, %v4339_v1  ;;  %v4460_v9 = vpop.f32.mrf.mxu1 }
 0x34c   : > { %v4401_v25 = vpop.f32.mrf.mxu0 }
 0x34d   : > { %4529 = vst [vmem:[%s5844_s6 + $0x30] sm:$0xff] %v4489_v21  ;;  %v4490_v13 = vadd.f32 %v4459_v29, %v274_v24  ;;  %v4461_v40 = vadd.f32 %v4460_v9, %v4400_v14  ;;  %v4402_v57 = vadd.f32 %v4401_v25, %v4341_v16  ;;  %v4462_v36 = vpop.f32.mrf.mxu1 }
 0x34e   : > { %v4405_v8 = vpop.f32.mrf.mxu0 }
 0x34f   : > { %4530 = vst [vmem:[%s5844_s6 + $0x38] sm:$0xff] %v4490_v13  ;;  %v4497_v27 = vadd.f32 %v4461_v40, %v281_v6  ;;  %v4463_v63 = vadd.f32 %v4462_v36, %v4402_v57  ;;  %v4406_v3 = vadd.f32 %v4405_v8, %v4345_v49  ;;  %v4466_v12 = vpop.f32.mrf.mxu1 }
 0x350   : > { %v4407_v7 = vpop.f32.mrf.mxu0 }
 0x351   : > { %4537 = vst [vmem:[%s5844_s6 + $0x70] sm:$0xff] %v4497_v27  ;;  %v4498_v20 = vadd.f32 %v4463_v63, %v282_v35  ;;  %v4467_v45 = vadd.f32 %v4466_v12, %v4406_v3  ;;  %v4408_v42 = vadd.f32 %v4407_v7, %v4347_v37  ;;  %v4468_v31 = vpop.f32.mrf.mxu1 }
 0x352   : > { %v4409_v22 = vpop.f32.mrf.mxu0 }
 0x353   : > { %4538 = vst [vmem:[%s5844_s6 + $0x78] sm:$0xff] %v4498_v20  ;;  %v4505_v11 = vadd.f32 %v4467_v45, %v289_v10  ;;  %v4469_v26 = vadd.f32 %v4468_v31, %v4408_v42  ;;  %v4410_v50 = vadd.f32 %v4409_v22, %v4349_v54  ;;  %v4470_v48 = vpop.f32.mrf.mxu1 }
 0x354   : > { %v4411_v43 = vpop.f32.mrf.mxu0 }
 0x355   : > { %4545 = vst [vmem:[%s5844_s6 + $0xb0] sm:$0xff] %v4505_v11  ;;  %v4506_v44 = vadd.f32 %v4469_v26, %v290_v55  ;;  %v4471_v46 = vadd.f32 %v4470_v48, %v4410_v50  ;;  %v4412_v51 = vadd.f32 %v4411_v43, %v4351_v59  ;;  %v4472_v19 = vpop.f32.mrf.mxu1 }
 0x356   : > { %v4415_v47 = vpop.f32.mrf.mxu0 }
 0x357   : > { %4546 = vst [vmem:[%s5844_s6 + $0xb8] sm:$0xff] %v4506_v44  ;;  %v4513_v18 = vadd.f32 %v4471_v46, %v297_v15  ;;  %v4473_v38 = vadd.f32 %v4472_v19, %v4412_v51  ;;  %v4416_v61 = vadd.f32 %v4415_v47, %v4355_v56  ;;  %v4476_v23 = vpop.f32.mrf.mxu1 }
 0x358   : > { %v4417_v41 = vpop.f32.mrf.mxu0 }
 0x359   : > { %4553 = vst [vmem:[%s5844_s6 + $0xf0] sm:$0xff] %v4513_v18  ;;  %v4514_v0 = vadd.f32 %v4473_v38, %v298_v52  ;;  %v4477_v17 = vadd.f32 %v4476_v23, %v4416_v61  ;;  %v4418_v5 = vadd.f32 %v4417_v41, %v4357_v28  ;;  %v4478_v53 = vpop.f32.mrf.mxu1 }
 0x35a   : > { %v4419_v2 = vpop.f32.mrf.mxu0 }
 0x35b   : > { %4554 = vst [vmem:[%s5844_s6 + $0xf8] sm:$0xff] %v4514_v0  ;;  %v4521_v30 = vadd.f32 %v4477_v17, %v305_v4  ;;  %v4479_v58 = vadd.f32 %v4478_v53, %v4418_v5  ;;  %v4480_v62 = vpop.f32.mrf.mxu1 }
 0x35c   : > { %v4420_v1 = vpop.f32.mrf.mxu0 }
 0x35d   : > { %4561 = vst [vmem:[%s5844_s6 + $0x130] sm:$0xff] %v4521_v30  ;;  %v4522_v33 = vadd.f32 %v4479_v58, %v306_v32  ;;  %v4481_v34 = vpop.f32.mrf.mxu1 }
 0x35f   : > { %4562 = vst [vmem:[%s5844_s6 + $0x138] sm:$0xff] %v4522_v33 }
 0x360   : > { %5462 = shalt.err (!%p5459_p9)
}
 0x361   : > { %s5463_s0 = scalar_lea.hbm %s6946_s27, 5120  ;;  %s5467_s12 = scalar_lea.hbm %s7081_s26, 10240 }
 0x362   : > { %p5464_p3 = scmp.ne.s32.totalorder %s6946_s27, %s5463_s0  ;;  %p5468_p7 = scmp.lt.s32.totalorder %s6946_s27, %s7081_s26 }
 0x363   : > { %p5469_p8 = scmp.lt.s32.totalorder %s5467_s12, %s5463_s0 }
 0x364   : > { %p5465_p2 = pnand %p5464_p3, %p5790_p13 }
 0x365   : > { %p5470_p12 = por %p5469_p8, %p5468_p7 }
 0x366   : > { %p5466_p11 = pneg %p5465_p2 }
 0x368   : > { %p5471_p4 = pnand %p5470_p12, %p5466_p11 }
 0x36a   : > { %5474 = shalt.err (!%p5471_p4)
}
 0x36b   : > { %s5606_s7 = smov 1024   ;;  %s5607_s17 = smov 2048  }
 0x36c   : > { %s5608_s18 = smov 64  }
 0x36d   : > { %5251 = dma.vmem_to_hbm [thread:$0]  (%p5790_p13), %s6948_s19, 5120, %s6946_s27, %s6954_s25, %s5606_s7, %s5607_s17, %s5608_s18  }
 0x36e PF: > { %p5265_p10 = scmp.ge.s32.totalorder %s5597_s22, 2  ;;  %s4592_s3 = sand.u32 1, %s5545_s9  }
 0x36f   : > { %s4593_s29 = scalar_lea.sflag [#allocation4], %s4592_s3 }
 0x370   : > { %p5261_p1 = pnand %p5265_p10, %p5800_p5 }
 0x372   : > { %p5262_p0 = pneg %p5261_p1 }
 0x374   : > { %5540 = dma.done.wait (%p5262_p0), %s4593_s29, 5120  }
 0x375   : > { %5542 = vsyncadd (%p5262_p0), %s4593_s29, 4294962176  ;;  %s21_s22 = sadd.s32 1, %s5597_s22   ;;  %s7083_s28 = sld [smem:[#allocation11_spill]] }
 0x376   : > { %p6982_p6 = scmp.ge.s32.totalorder %s21_s22, 6   ;;  %s7084_s17 = sld [smem:[#allocation16_spill]] }
 0x377   : > { %s7085_s19 = sld [smem:[#allocation14_spill]]  ;;  %s7088_s9 = smov %s5549_s10 }
 0x378   : > { %s7086_s23 = sld [smem:[#allocation15_spill]]  ;;  %s7089_s10 = smov %s5553_s11 }
 0x379   : > { %s7087_s21 = sld [smem:[#allocation17_spill]]  ;;  %s7090_s11 = smov %s5795_s8 }
 0x37a   : > { %s7091_s12 = smov %s5561_s13  ;;  %s7092_s13 = smov %s5565_s14 }
 0x37b   : > { %s7093_s14 = smov %s5798_s15  ;;  %s7094_s15 = smov %s5573_s16 }
 0x37c   : > { %s7095_s16 = smov %s7083_s28  ;;  %s7096_s18 = smov %s5589_s20 }
 0x37d   :  { %20 = sbr.rel (!%p6982_p6) target bundleno = 15 (0xf), region = 90 }
 0x37e   : > { %s7097_s20 = smov %s7086_s23 }
 0x382   :  { %4598 = vsyncpa [#allocation3], 1 }
 0x383   :  { %4600 = vsyncpa [#allocation3 + $0x1], 1 }
 0x384   :  { %4601 = vsyncpa [#allocation6], 1 }
 0x385   :  { %4603 = vsyncpa [#allocation6 + $0x1], 1 }
 0x386   :  { %4604 = vsyncpa [#allocation4], 1 }
 0x387   :  { %4606 = vsyncpa [#allocation4 + $0x1], 1 }

</bundles_post_ra>
